<compile_context>
chip_gen: v6e
topology: v6e:2x2x1
jax: 0.10.0
libtpu: 0.0.40
codegen_flags: <defaults>
</compile_context>

<pallas_src>
import functools

import jax
import jax.numpy as jnp
from jax.experimental import pallas as pl
from jax.experimental.pallas import tpu as pltpu

EMB_DIM = 768        # ProjectionHead(embedding_dim=768, ...)
PROJ_DIM = 1024      # ProjectionHead(..., projection_dim=1024)
MARGIN = 10.0        # nn.TripletMarginLoss(margin=10.0)
EPS_PAIRDIST = 1e-6  # F.pairwise_distance eps used inside TripletMarginLoss
LN_EPS = 1e-5        # nn.LayerNorm default eps
MAX_TM = 512         # batch-tile rows (review: bigger tiles amortize per-step cost)
_SQRT1_2 = 0.7071067811865476

# Abramowitz & Stegun 7.1.26 erf coefficients.
_ERF_P = 0.3275911
_ERF_A = (0.254829592, -0.284496736, 1.421413741, -1.453152027, 1.061405429)


def _gelu_exact(x_f32):
    """PyTorch-default exact-erf GELU, returned in bf16 ready for the MXU.

    erf via the A&S 7.1.26 rational approximation.  The rational term 1/(1+p|x|)
    runs as an approximate reciprocal on the EUP (f32-only lowering, free bundle
    slot); the polynomial, exp and sign select run in bf16 so v6e/v7x pack two
    elements per VALU lane.  bf16 evaluation error is at the same level as the
    bf16 precision handed to the second matmul anyway.
    """
    x_bf = x_f32.astype(jnp.bfloat16)
    u32 = x_f32 * _SQRT1_2
    ax32 = jnp.abs(u32)
    # EUP approximate reciprocal (erf error ~1e-4 absolute, irrelevant for GELU).
    t = pl.reciprocal(1.0 + _ERF_P * ax32, approx=True).astype(jnp.bfloat16)
    ax = ax32.astype(jnp.bfloat16)
    a1, a2, a3, a4, a5 = _ERF_A
    poly = ((((a5 * t + a4) * t + a3) * t + a2) * t + a1) * t          # bf16
    erf_abs = 1.0 - poly * jnp.exp(-(ax * ax))                          # bf16
    erf = jnp.where(x_bf >= 0.0, erf_abs, -erf_abs)                     # bf16
    return (0.5 * x_bf) * (1.0 + erf)                                   # bf16


def _walk_text_fused_kernel(x_ref, w1_ref, b1_ref, w2_ref, b2_ref, g_ref, beta_ref,
                            text_ref, text_perm_ref, mask_ref,
                            feat_ref, loss_ref, *, tm, batch):
    step = pl.program_id(0)

    # -------- ProjectionHead: Linear(768->1024) -> GELU -> Linear(1024->1024)
    #          -> dropout (eval identity) -> +residual -> LayerNorm ---------------
    x = x_ref[...]                                                     # (tm, 768) f32
    proj = jnp.dot(x.astype(jnp.bfloat16), w1_ref[...],
                   preferred_element_type=jnp.float32) + b1_ref[...]   # (tm, 1024) f32
    act = _gelu_exact(proj)                                            # bf16
    h = jnp.dot(act, w2_ref[...],
                preferred_element_type=jnp.float32) + b2_ref[...]      # (tm, 1024) f32
    # TODO(synk): dropout is treated as identity (eval mode); the train-mode mask
    # is not modeled.
    h = h + proj                                                       # residual (f32)

    # LayerNorm — single sweep for both statistics (sum and sum of squares).
    inv_d = 1.0 / PROJ_DIM
    s1 = jnp.sum(h, axis=-1, keepdims=True)
    s2 = jnp.sum(h * h, axis=-1, keepdims=True)
    mean = s1 * inv_d
    var = jnp.maximum(s2 * inv_d - mean * mean, 0.0)
    feat = (h - mean) * jax.lax.rsqrt(var + LN_EPS) * g_ref[...] + beta_ref[...]
    # NOTE: padded rows of the final partial batch tile are computed from whatever
    # bytes Pallas staged out-of-bounds.  This is harmless: the feat writeback is
    # clipped to B rows and those rows are masked out of the hinge sum below.
    feat_ref[...] = feat

    # -------- ContrastiveLoss == TripletMarginLoss(margin=10, p=2, eps=1e-6) -----
    a = feat                                         # anchor   = motion_features
    pos = text_ref[...]                              # positive = text_features
    # negative_features = where(ids match, motion_features, text_features[perm])
    neg = jnp.where(mask_ref[...] > 0.5, a, text_perm_ref[...])
    d_ap = jnp.sqrt(jnp.sum((a - pos + EPS_PAIRDIST) ** 2, axis=-1, keepdims=True))
    d_an = jnp.sqrt(jnp.sum((a - neg + EPS_PAIRDIST) ** 2, axis=-1, keepdims=True))
    hinge = jnp.maximum(d_ap - d_an + MARGIN, 0.0)                     # (tm, 1)

    if batch % tm != 0:  # mask padded rows of the final (partial) batch tile
        row = jax.lax.broadcasted_iota(jnp.int32, hinge.shape, 0) + step * tm
        hinge = jnp.where(row < batch, hinge, 0.0)

    # Per-tile partial hinge sum, written as a lane-dense (8,128) block so the
    # grid can be fully "parallel" (no resident accumulator, no cross-core race).
    partial = jnp.sum(hinge, axis=0, keepdims=True)                    # (1, 1)
    loss_ref[...] = jnp.broadcast_to(partial, (8, 128))


def walk_text_forward(motion_embeddings, text_features, feature_ids, params, perm_key):
    """WalkText.forward given pre-computed encoder outputs.

    motion_embeddings: (B, 768)  f32 -- encoder(batch)['mu']
    text_features:     (B, 1024) f32 -- AnglE text embeddings
    feature_ids:       (B,)    int32 -- batch['id'] already mapped through id_to_int
    """
    w1, b1, w2, b2, gamma, beta = params
    B = motion_embeddings.shape[0]
    tm = min(MAX_TM, B)
    num_tiles = pl.cdiv(B, tm)

    # ContrastiveLoss glue (torch.randperm + id-equality mask + gather): tiny, XLA-side.
    perm = jax.random.permutation(perm_key, B)
    mask = (feature_ids == feature_ids[perm]).astype(jnp.float32).reshape(B, 1)
    text_perm = text_features[perm]

    def row_spec(cols):                 # batch-tiled operands
        return pl.BlockSpec((tm, cols), lambda i: (i, 0))

    def pinned(shape):                  # weights / params: constant index_map ->
        return pl.BlockSpec(shape, lambda i: (0, 0))   # fetched once, resident

    motion_features, loss_partials = pl.pallas_call(
        functools.partial(_walk_text_fused_kernel, tm=tm, batch=B),
        grid=(num_tiles,),
        in_specs=[
            row_spec(EMB_DIM),                 # x
            pinned((EMB_DIM, PROJ_DIM)),       # w1  (bf16, fetched once)
            pinned((1, PROJ_DIM)),             # b1  (f32)
            pinned((PROJ_DIM, PROJ_DIM)),      # w2  (bf16, fetched once)
            pinned((1, PROJ_DIM)),             # b2
            pinned((1, PROJ_DIM)),             # LayerNorm gamma
            pinned((1, PROJ_DIM)),             # LayerNorm beta
            row_spec(PROJ_DIM),                # text_features (positive)
            row_spec(PROJ_DIM),                # text_features[perm]
            row_spec(1),                       # same-id mask
        ],
        out_specs=(
            row_spec(PROJ_DIM),                          # motion_features
            pl.BlockSpec((8, 128), lambda i: (i, 0)),    # per-tile loss partials
        ),
        out_shape=(
            jax.ShapeDtypeStruct((B, PROJ_DIM), jnp.float32),
            jax.ShapeDtypeStruct((num_tiles * 8, 128), jnp.float32),
        ),
        compiler_params=pltpu.CompilerParams(
            # No cross-step state left -> batch tiles shard across both v7x TCs.
            dimension_semantics=("parallel",),
            vmem_limit_bytes=48 * 1024 * 1024,
        ),
    )(motion_embeddings, w1, b1, w2, b2, gamma, beta, text_features, text_perm, mask)

    # Final mean-reduction of the per-tile partials in XLA (each (8,128) block of
    # loss_partials carries one tile's hinge sum, replicated).
    loss = jnp.sum(loss_partials[::8, 0]) * (1.0 / B)
    return loss, motion_features


if __name__ == "__main__":
    key = jax.random.PRNGKey(0)
    keys = jax.random.split(key, 5)
    B = 8

    # TODO(synk): the pretrained VAE motion encoder ('mu') and the AnglE
    # 'WhereIsAI/UAE-Large-V1' text encoder are external modules with no Pallas
    # equivalent; their embeddings are synthesized deterministically here.
    motion_embeddings = jax.random.normal(keys[0], (B, EMB_DIM), jnp.float32)
    text_features = jax.random.normal(keys[1], (B, PROJ_DIM), jnp.float32)
    # batch['id'] strings already mapped through id_to_int, with repeated ids.
    feature_ids = jnp.array([0, 1, 2, 0, 1, 2, 3, 3], dtype=jnp.int32)

    # Deterministic xavier_uniform init (matches _init_weights for dim>1 params);
    # biases / LayerNorm keep their defaults.  Matmul weights are stored as bf16
    # once up front (f32 master weights would be cast outside the hot loop).
    def xavier(k, shape):
        fan_in, fan_out = shape
        bound = (6.0 / (fan_in + fan_out)) ** 0.5
        return jax.random.uniform(k, shape, jnp.float32, -bound, bound)

    params = (
        xavier(keys[2], (EMB_DIM, PROJ_DIM)).astype(jnp.bfloat16),   # projection W
        jnp.zeros((1, PROJ_DIM), jnp.float32),                       # projection b
        xavier(keys[3], (PROJ_DIM, PROJ_DIM)).astype(jnp.bfloat16),  # fc W
        jnp.zeros((1, PROJ_DIM), jnp.float32),                       # fc b
        jnp.ones((1, PROJ_DIM), jnp.float32),                        # LayerNorm gamma
        jnp.zeros((1, PROJ_DIM), jnp.float32),                       # LayerNorm beta
    )

    fwd = jax.jit(walk_text_forward)
    loss, motion_features = fwd(motion_embeddings, text_features, feature_ids,
                                params, keys[4])
    loss = jax.block_until_ready(loss)
    motion_features = jax.block_until_ready(motion_features)
    losses = {"loss": float(loss)}   # mirrors losses = {'loss': loss.item()}
    print("KERNEL_OK")
</pallas_src>

<mosaic_0001>
module attributes {stable_mosaic.version = 11 : i64} {
  func.func @_walk_text_fused_kernel(%arg0: i32, %arg1: memref<8x768xf32, #tpu.memory_space<vmem>>, %arg2: memref<768x1024xbf16, #tpu.memory_space<vmem>>, %arg3: memref<1x1024xf32, #tpu.memory_space<vmem>>, %arg4: memref<1024x1024xbf16, #tpu.memory_space<vmem>>, %arg5: memref<1x1024xf32, #tpu.memory_space<vmem>>, %arg6: memref<1x1024xf32, #tpu.memory_space<vmem>>, %arg7: memref<1x1024xf32, #tpu.memory_space<vmem>>, %arg8: memref<8x1024xf32, #tpu.memory_space<vmem>>, %arg9: memref<8x1024xf32, #tpu.memory_space<vmem>>, %arg10: memref<8x1xf32, #tpu.memory_space<vmem>>, %arg11: memref<8x1024xf32, #tpu.memory_space<vmem>>, %arg12: memref<8x128xf32, #tpu.memory_space<vmem>>) attributes {dimension_semantics = [#tpu.dimension_semantics<parallel>], iteration_bounds = array<i64: 1>, scalar_prefetch = 0 : i64, scratch_operands = 0 : i64, tpu.core_type = #tpu.core_type<tc>, window_params = [{transform_indices = @transform_0, window_bounds = array<i64: 8, 768>}, {pipeline_mode = #tpu.pipeline_mode<synchronous>, transform_indices = @transform_1, window_bounds = array<i64: 768, 1024>}, {pipeline_mode = #tpu.pipeline_mode<synchronous>, transform_indices = @transform_2, window_bounds = array<i64: 1, 1024>}, {pipeline_mode = #tpu.pipeline_mode<synchronous>, transform_indices = @transform_3, window_bounds = array<i64: 1024, 1024>}, {pipeline_mode = #tpu.pipeline_mode<synchronous>, transform_indices = @transform_4, window_bounds = array<i64: 1, 1024>}, {pipeline_mode = #tpu.pipeline_mode<synchronous>, transform_indices = @transform_5, window_bounds = array<i64: 1, 1024>}, {pipeline_mode = #tpu.pipeline_mode<synchronous>, transform_indices = @transform_6, window_bounds = array<i64: 1, 1024>}, {transform_indices = @transform_7, window_bounds = array<i64: 8, 1024>}, {transform_indices = @transform_8, window_bounds = array<i64: 8, 1024>}, {transform_indices = @transform_9, window_bounds = array<i64: 8, 1>}, {transform_indices = @transform_10, window_bounds = array<i64: 8, 1024>}, {transform_indices = @transform_11, window_bounds = array<i64: 8, 128>}]} {
    %c0 = arith.constant 0 : index
    %c0_0 = arith.constant 0 : index
    %0 = vector.load %arg1[%c0, %c0_0] : memref<8x768xf32, #tpu.memory_space<vmem>>, vector<8x768xf32>
    %1 = arith.truncf %0 : vector<8x768xf32> to vector<8x768xbf16>
    %c0_1 = arith.constant 0 : index
    %c0_2 = arith.constant 0 : index
    %2 = vector.load %arg2[%c0_1, %c0_2] : memref<768x1024xbf16, #tpu.memory_space<vmem>>, vector<768x1024xbf16>
    %cst = arith.constant dense<0.000000e+00> : vector<8x1024xf32>
    %3 = tpu.matmul %1, %2, %cst {dimension_numbers = #tpu.dot_dimension_numbers<[1], [0], [0], [1], [0, 0, 1, 1], [], []>} : vector<8x768xbf16>, vector<768x1024xbf16>, vector<8x1024xf32> -> vector<8x1024xf32>
    %c0_3 = arith.constant 0 : index
    %c0_4 = arith.constant 0 : index
    %4 = vector.load %arg3[%c0_3, %c0_4] : memref<1x1024xf32, #tpu.memory_space<vmem>>, vector<1x1024xf32>
    %5 = vector.broadcast %4 : vector<1x1024xf32> to vector<8x1024xf32>
    %6 = arith.addf %3, %5 : vector<8x1024xf32>
    %7 = arith.truncf %6 : vector<8x1024xf32> to vector<8x1024xbf16>
    %cst_5 = arith.constant 0.707106769 : f32
    %8 = vector.broadcast %cst_5 : f32 to vector<8x1024xf32>
    %9 = arith.mulf %6, %8 : vector<8x1024xf32>
    %10 = math.absf %9 : vector<8x1024xf32>
    %cst_6 = arith.constant 0.327591091 : f32
    %11 = vector.broadcast %cst_6 : f32 to vector<8x1024xf32>
    %12 = arith.mulf %11, %10 : vector<8x1024xf32>
    %cst_7 = arith.constant 1.000000e+00 : f32
    %13 = vector.broadcast %cst_7 : f32 to vector<8x1024xf32>
    %14 = arith.addf %13, %12 : vector<8x1024xf32>
    %15 = tpu.reciprocal %14 {approx = true} : vector<8x1024xf32> -> vector<8x1024xf32>
    %16 = arith.truncf %15 : vector<8x1024xf32> to vector<8x1024xbf16>
    %17 = arith.truncf %10 : vector<8x1024xf32> to vector<8x1024xbf16>
    %cst_8 = arith.constant 1.062500e+00 : bf16
    %18 = vector.broadcast %cst_8 : bf16 to vector<8x1024xbf16>
    %19 = arith.mulf %18, %16 : vector<8x1024xbf16>
    %cst_9 = arith.constant -1.453130e+00 : bf16
    %20 = vector.broadcast %cst_9 : bf16 to vector<8x1024xbf16>
    %21 = arith.addf %19, %20 : vector<8x1024xbf16>
    %22 = arith.mulf %21, %16 : vector<8x1024xbf16>
    %cst_10 = arith.constant 1.421880e+00 : bf16
    %23 = vector.broadcast %cst_10 : bf16 to vector<8x1024xbf16>
    %24 = arith.addf %22, %23 : vector<8x1024xbf16>
    %25 = arith.mulf %24, %16 : vector<8x1024xbf16>
    %cst_11 = arith.constant -2.851560e-01 : bf16
    %26 = vector.broadcast %cst_11 : bf16 to vector<8x1024xbf16>
    %27 = arith.addf %25, %26 : vector<8x1024xbf16>
    %28 = arith.mulf %27, %16 : vector<8x1024xbf16>
    %cst_12 = arith.constant 2.539060e-01 : bf16
    %29 = vector.broadcast %cst_12 : bf16 to vector<8x1024xbf16>
    %30 = arith.addf %28, %29 : vector<8x1024xbf16>
    %31 = arith.mulf %30, %16 : vector<8x1024xbf16>
    %32 = arith.mulf %17, %17 : vector<8x1024xbf16>
    %cst_13 = arith.constant 0.000000e+00 : bf16
    %33 = vector.broadcast %cst_13 : bf16 to vector<8x1024xbf16>
    %34 = arith.subf %33, %32 : vector<8x1024xbf16>
    %35 = math.exp %34 : vector<8x1024xbf16>
    %36 = arith.mulf %31, %35 : vector<8x1024xbf16>
    %cst_14 = arith.constant 1.000000e+00 : bf16
    %37 = vector.broadcast %cst_14 : bf16 to vector<8x1024xbf16>
    %38 = arith.subf %37, %36 : vector<8x1024xbf16>
    %cst_15 = arith.constant 0.000000e+00 : bf16
    %39 = vector.broadcast %cst_15 : bf16 to vector<8x1024xbf16>
    %40 = arith.cmpf oge, %7, %39 : vector<8x1024xbf16>
    %cst_16 = arith.constant 0.000000e+00 : bf16
    %41 = vector.broadcast %cst_16 : bf16 to vector<8x1024xbf16>
    %42 = arith.subf %41, %38 : vector<8x1024xbf16>
    %43 = arith.select %40, %38, %42 : vector<8x1024xi1>, vector<8x1024xbf16>
    %cst_17 = arith.constant 5.000000e-01 : bf16
    %44 = vector.broadcast %cst_17 : bf16 to vector<8x1024xbf16>
    %45 = arith.mulf %44, %7 : vector<8x1024xbf16>
    %cst_18 = arith.constant 1.000000e+00 : bf16
    %46 = vector.broadcast %cst_18 : bf16 to vector<8x1024xbf16>
    %47 = arith.addf %46, %43 : vector<8x1024xbf16>
    %48 = arith.mulf %45, %47 : vector<8x1024xbf16>
    %c0_19 = arith.constant 0 : index
    %c0_20 = arith.constant 0 : index
    %49 = vector.load %arg4[%c0_19, %c0_20] : memref<1024x1024xbf16, #tpu.memory_space<vmem>>, vector<1024x1024xbf16>
    %cst_21 = arith.constant dense<0.000000e+00> : vector<8x1024xf32>
    %50 = tpu.matmul %48, %49, %cst_21 {dimension_numbers = #tpu.dot_dimension_numbers<[1], [0], [0], [1], [0, 0, 1, 1], [], []>} : vector<8x1024xbf16>, vector<1024x1024xbf16>, vector<8x1024xf32> -> vector<8x1024xf32>
    %c0_22 = arith.constant 0 : index
    %c0_23 = arith.constant 0 : index
    %51 = vector.load %arg5[%c0_22, %c0_23] : memref<1x1024xf32, #tpu.memory_space<vmem>>, vector<1x1024xf32>
    %52 = vector.broadcast %51 : vector<1x1024xf32> to vector<8x1024xf32>
    %53 = arith.addf %50, %52 : vector<8x1024xf32>
    %54 = arith.addf %53, %6 : vector<8x1024xf32>
    %cst_24 = arith.constant dense<0.000000e+00> : vector<8xf32>
    %55 = vector.multi_reduction <add>, %54, %cst_24 [1] : vector<8x1024xf32> to vector<8xf32>
    %56 = vector.shape_cast %55 : vector<8xf32> to vector<8x1xf32>
    %57 = arith.mulf %54, %54 : vector<8x1024xf32>
    %cst_25 = arith.constant dense<0.000000e+00> : vector<8xf32>
    %58 = vector.multi_reduction <add>, %57, %cst_25 [1] : vector<8x1024xf32> to vector<8xf32>
    %59 = vector.shape_cast %58 : vector<8xf32> to vector<8x1xf32>
    %cst_26 = arith.constant 9.765625E-4 : f32
    %60 = vector.broadcast %cst_26 : f32 to vector<8x1xf32>
    %61 = arith.mulf %56, %60 : vector<8x1xf32>
    %cst_27 = arith.constant 9.765625E-4 : f32
    %62 = vector.broadcast %cst_27 : f32 to vector<8x1xf32>
    %63 = arith.mulf %59, %62 : vector<8x1xf32>
    %64 = arith.mulf %61, %61 : vector<8x1xf32>
    %65 = arith.subf %63, %64 : vector<8x1xf32>
    %cst_28 = arith.constant 0.000000e+00 : f32
    %66 = vector.broadcast %cst_28 : f32 to vector<8x1xf32>
    %67 = arith.maximumf %65, %66 : vector<8x1xf32>
    %68 = vector.broadcast %61 : vector<8x1xf32> to vector<8x1024xf32>
    %69 = arith.subf %54, %68 : vector<8x1024xf32>
    %cst_29 = arith.constant 9.99999974E-6 : f32
    %70 = vector.broadcast %cst_29 : f32 to vector<8x1xf32>
    %71 = arith.addf %67, %70 : vector<8x1xf32>
    %72 = math.rsqrt %71 : vector<8x1xf32>
    %73 = vector.broadcast %72 : vector<8x1xf32> to vector<8x1024xf32>
    %74 = arith.mulf %69, %73 : vector<8x1024xf32>
    %c0_30 = arith.constant 0 : index
    %c0_31 = arith.constant 0 : index
    %75 = vector.load %arg6[%c0_30, %c0_31] : memref<1x1024xf32, #tpu.memory_space<vmem>>, vector<1x1024xf32>
    %76 = vector.broadcast %75 : vector<1x1024xf32> to vector<8x1024xf32>
    %77 = arith.mulf %74, %76 : vector<8x1024xf32>
    %c0_32 = arith.constant 0 : index
    %c0_33 = arith.constant 0 : index
    %78 = vector.load %arg7[%c0_32, %c0_33] : memref<1x1024xf32, #tpu.memory_space<vmem>>, vector<1x1024xf32>
    %79 = vector.broadcast %78 : vector<1x1024xf32> to vector<8x1024xf32>
    %80 = arith.addf %77, %79 : vector<8x1024xf32>
    %c0_34 = arith.constant 0 : index
    %c0_35 = arith.constant 0 : index
    %81 = vector.load %arg11[%c0_34, %c0_35] : memref<8x1024xf32, #tpu.memory_space<vmem>>, vector<8x1024xf32>
    tpu.vector_store %arg11[%c0_34, %c0_35], %80 {strides = array<i32>} : memref<8x1024xf32, #tpu.memory_space<vmem>>, vector<8x1024xf32>,
    %c0_36 = arith.constant 0 : index
    %c0_37 = arith.constant 0 : index
    %82 = vector.load %arg8[%c0_36, %c0_37] : memref<8x1024xf32, #tpu.memory_space<vmem>>, vector<8x1024xf32>
    %c0_38 = arith.constant 0 : index
    %c0_39 = arith.constant 0 : index
    %83 = vector.load %arg10[%c0_38, %c0_39] : memref<8x1xf32, #tpu.memory_space<vmem>>, vector<8x1xf32>
    %cst_40 = arith.constant 5.000000e-01 : f32
    %84 = vector.broadcast %cst_40 : f32 to vector<8x1xf32>
    %85 = arith.cmpf ogt, %83, %84 : vector<8x1xf32>
    %c0_41 = arith.constant 0 : index
    %c0_42 = arith.constant 0 : index
    %86 = vector.load %arg9[%c0_41, %c0_42] : memref<8x1024xf32, #tpu.memory_space<vmem>>, vector<8x1024xf32>
    %87 = vector.shape_cast %85 : vector<8x1xi1> to vector<8x1xi1>
    %88 = vector.broadcast %87 : vector<8x1xi1> to vector<8x1024xi1>
    %89 = arith.select %88, %80, %86 : vector<8x1024xi1>, vector<8x1024xf32>
    %90 = arith.subf %80, %82 : vector<8x1024xf32>
    %cst_43 = arith.constant 9.99999997E-7 : f32
    %91 = vector.broadcast %cst_43 : f32 to vector<8x1024xf32>
    %92 = arith.addf %90, %91 : vector<8x1024xf32>
    %93 = arith.mulf %92, %92 : vector<8x1024xf32>
    %cst_44 = arith.constant dense<0.000000e+00> : vector<8xf32>
    %94 = vector.multi_reduction <add>, %93, %cst_44 [1] : vector<8x1024xf32> to vector<8xf32>
    %95 = vector.shape_cast %94 : vector<8xf32> to vector<8x1xf32>
    %96 = math.sqrt %95 : vector<8x1xf32>
    %97 = arith.subf %80, %89 : vector<8x1024xf32>
    %cst_45 = arith.constant 9.99999997E-7 : f32
    %98 = vector.broadcast %cst_45 : f32 to vector<8x1024xf32>
    %99 = arith.addf %97, %98 : vector<8x1024xf32>
    %100 = arith.mulf %99, %99 : vector<8x1024xf32>
    %cst_46 = arith.constant dense<0.000000e+00> : vector<8xf32>
    %101 = vector.multi_reduction <add>, %100, %cst_46 [1] : vector<8x1024xf32> to vector<8xf32>
    %102 = vector.shape_cast %101 : vector<8xf32> to vector<8x1xf32>
    %103 = math.sqrt %102 : vector<8x1xf32>
    %104 = arith.subf %96, %103 : vector<8x1xf32>
    %cst_47 = arith.constant 1.000000e+01 : f32
    %105 = vector.broadcast %cst_47 : f32 to vector<8x1xf32>
    %106 = arith.addf %104, %105 : vector<8x1xf32>
    %cst_48 = arith.constant 0.000000e+00 : f32
    %107 = vector.broadcast %cst_48 : f32 to vector<8x1xf32>
    %108 = arith.maximumf %106, %107 : vector<8x1xf32>
    %cst_49 = arith.constant dense<0.000000e+00> : vector<1xf32>
    %109 = vector.multi_reduction <add>, %108, %cst_49 [0] : vector<8x1xf32> to vector<1xf32>
    %110 = vector.shape_cast %109 : vector<1xf32> to vector<1x1xf32>
    %111 = vector.shape_cast %110 : vector<1x1xf32> to vector<1x1xf32>
    %112 = vector.broadcast %111 : vector<1x1xf32> to vector<8x128xf32>
    %c0_50 = arith.constant 0 : index
    %c0_51 = arith.constant 0 : index
    %113 = vector.load %arg12[%c0_50, %c0_51] : memref<8x128xf32, #tpu.memory_space<vmem>>, vector<8x128xf32>
    tpu.vector_store %arg12[%c0_50, %c0_51], %112 {strides = array<i32>} : memref<8x128xf32, #tpu.memory_space<vmem>>, vector<8x128xf32>,
    return
  }
  func.func @transform_0(%arg0: i32) -> (i32, i32) {
    %c0_i32 = arith.constant 0 : i32
    %c0_i32_0 = arith.constant 0 : i32
    return %arg0, %c0_i32 : i32, i32
  }
  func.func @transform_1(%arg0: i32) -> (i32, i32) {
    %c0_i32 = arith.constant 0 : i32
    %c0_i32_0 = arith.constant 0 : i32
    %c0_i32_1 = arith.constant 0 : i32
    return %c0_i32, %c0_i32_0 : i32, i32
  }
  func.func @transform_2(%arg0: i32) -> (i32, i32) {
    %c0_i32 = arith.constant 0 : i32
    %c0_i32_0 = arith.constant 0 : i32
    %c0_i32_1 = arith.constant 0 : i32
    return %c0_i32, %c0_i32_0 : i32, i32
  }
  func.func @transform_3(%arg0: i32) -> (i32, i32) {
    %c0_i32 = arith.constant 0 : i32
    %c0_i32_0 = arith.constant 0 : i32
    %c0_i32_1 = arith.constant 0 : i32
    return %c0_i32, %c0_i32_0 : i32, i32
  }
  func.func @transform_4(%arg0: i32) -> (i32, i32) {
    %c0_i32 = arith.constant 0 : i32
    %c0_i32_0 = arith.constant 0 : i32
    %c0_i32_1 = arith.constant 0 : i32
    return %c0_i32, %c0_i32_0 : i32, i32
  }
  func.func @transform_5(%arg0: i32) -> (i32, i32) {
    %c0_i32 = arith.constant 0 : i32
    %c0_i32_0 = arith.constant 0 : i32
    %c0_i32_1 = arith.constant 0 : i32
    return %c0_i32, %c0_i32_0 : i32, i32
  }
  func.func @transform_6(%arg0: i32) -> (i32, i32) {
    %c0_i32 = arith.constant 0 : i32
    %c0_i32_0 = arith.constant 0 : i32
    %c0_i32_1 = arith.constant 0 : i32
    return %c0_i32, %c0_i32_0 : i32, i32
  }
  func.func @transform_7(%arg0: i32) -> (i32, i32) {
    %c0_i32 = arith.constant 0 : i32
    %c0_i32_0 = arith.constant 0 : i32
    return %arg0, %c0_i32 : i32, i32
  }
  func.func @transform_8(%arg0: i32) -> (i32, i32) {
    %c0_i32 = arith.constant 0 : i32
    %c0_i32_0 = arith.constant 0 : i32
    return %arg0, %c0_i32 : i32, i32
  }
  func.func @transform_9(%arg0: i32) -> (i32, i32) {
    %c0_i32 = arith.constant 0 : i32
    %c0_i32_0 = arith.constant 0 : i32
    return %arg0, %c0_i32 : i32, i32
  }
  func.func @transform_10(%arg0: i32) -> (i32, i32) {
    %c0_i32 = arith.constant 0 : i32
    %c0_i32_0 = arith.constant 0 : i32
    return %arg0, %c0_i32 : i32, i32
  }
  func.func @transform_11(%arg0: i32) -> (i32, i32) {
    %c0_i32 = arith.constant 0 : i32
    %c0_i32_0 = arith.constant 0 : i32
    return %arg0, %c0_i32 : i32, i32
  }
}

</mosaic_0001>

<bundles_post_ra>
// kernel: walk_text_forward.1
= control target key start
LH: loop header
LB: loop body
LE: loop exit
PB: predicated region body
PF: predicated region fallthrough
CT: control target
= control target key end

     0   :  { %17 = vsyncpa [#allocation3], 0  ;;  %s9017_s0 = inlined_call_operand.hbm [shape: f32[8,768], index: 0, kind: input, shape index: {}]   ;;  %s9018_s1 = inlined_call_operand.hbm [shape: bf16[768,1024], index: 1, kind: input, shape index: {}]   ;;  %s9019_s2 = inlined_call_operand.hbm [shape: f32[1,1024], index: 2, kind: input, shape index: {}]   ;;  %s9020_s3 = inlined_call_operand.hbm [shape: bf16[1024,1024], index: 3, kind: input, shape index: {}]   ;;  %s9021_s4 = inlined_call_operand.hbm [shape: f32[1,1024], index: 4, kind: input, shape index: {}]   ;;  %s9022_s5 = inlined_call_operand.hbm [shape: f32[1,1024], index: 5, kind: input, shape index: {}]   ;;  %s9023_s6 = inlined_call_operand.hbm [shape: f32[1,1024], index: 6, kind: input, shape index: {}]   ;;  %s9024_s7 = inlined_call_operand.hbm [shape: f32[8,1024], index: 7, kind: input, shape index: {}]   ;;  %s9025_s8 = inlined_call_operand.vmem [shape: f32[8,1024], index: 8, kind: input, shape index: {}]   ;;  %s9026_s9 = inlined_call_operand.vmem [shape: f32[8,1], index: 9, kind: input, shape index: {}]   ;;  %s9027_s10 = inlined_call_operand.hbm [shape: f32[8,1024], index: 10, kind: output, shape index: {0}]   ;;  %s9028_s11 = inlined_call_operand.vmem [shape: f32[8,128], index: 11, kind: output, shape index: {1}]  }
   0x1   :  { %18 = vsyncpa [#allocation6], 0 }
   0x2   :  { %19 = vsyncpa [#allocation9], 0 }
   0x3   :  { %20 = vsyncpa [#allocation12], 0 }
   0x4   :  { %21 = vsyncpa [#allocation15], 0 }
   0x5   :  { %22 = vsyncpa [#allocation4], 0  ;;  %s8454_s17 = smov [#allocation5]  }
   0x6   :  { %s38_s18 = sshll.u32 %s8454_s17, 4  ;;  %s39_s18 = int_to_ptr.vmem [resolvable:$true] %s38_s18 }
   0x7   :  { %s8270_s19 = scalar_lea.vmem %s39_s18, 49152  ;;  %p8275_p1 = scmp.lt.s32.totalorder %s39_s18, %s39_s18 }
   0x8   :  { %p8271_p0 = scmp.ne.s32.totalorder %s39_s18, %s8270_s19  ;;  %p8276_p2 = scmp.lt.s32.totalorder %s8270_s19, %s8270_s19 }
   0xa   :  { %p8277_p3 = por %p8276_p2, %p8275_p1 }
   0xc   :  { %p8278_p4 = pnand %p8277_p3, %p8271_p0 }
   0xe   :  { %8281 = shalt.err (!%p8278_p4)
}
   0xf   :  { %s8455_s20 = smov 512   ;;  %s8456_s21 = smov 32  }
  0x10   :  { %44 = dma.hbm_to_vmem [thread:$0]  %s9018_s1, 49152, %s39_s18, [#allocation6], %s8455_s20, %s8455_s20, %s8456_s21  }
  0x11   :  { %s8457_s24 = smov [#allocation8]   ;;  %s8458_s26 = smov [#allocation11]  }
  0x12   :  { %s60_s25 = sshll.u32 %s8457_s24, 4  ;;  %s83_s27 = sshll.u32 %s8458_s26, 4  ;;  %s61_s25 = int_to_ptr.vmem [resolvable:$true] %s60_s25  ;;  %s84_s27 = int_to_ptr.vmem [resolvable:$true] %s83_s27 }
  0x13   :  { %s8290_s28 = scalar_lea.vmem %s61_s25, 65536  ;;  %p8295_p6 = scmp.lt.s32.totalorder %s61_s25, %s61_s25 }
  0x14   :  { %p8291_p5 = scmp.ne.s32.totalorder %s61_s25, %s8290_s28  ;;  %p8296_p7 = scmp.lt.s32.totalorder %s8290_s28, %s8290_s28 }
  0x16   :  { %p8297_p8 = por %p8296_p7, %p8295_p6 }
  0x18   :  { %p8298_p9 = pnand %p8297_p8, %p8291_p5 }
  0x1a   :  { %8301 = shalt.err (!%p8298_p9)
}
  0x1b   :  { %66 = dma.hbm_to_vmem [thread:$0]  %s9020_s3, 65536, %s61_s25, [#allocation9], %s8455_s20, %s8455_s20, %s8456_s21  }
  0x1c   :  { %s8310_s12 = scalar_lea.vmem %s84_s27, 128  ;;  %p8315_p11 = scmp.lt.s32.totalorder %s84_s27, %s84_s27 }
  0x1d   :  { %p8311_p10 = scmp.ne.s32.totalorder %s84_s27, %s8310_s12  ;;  %p8316_p12 = scmp.lt.s32.totalorder %s8310_s12, %s8310_s12 }
  0x1f   :  { %p8317_p13 = por %p8316_p12, %p8315_p11 }
  0x21   :  { %p8318_p0 = pnand %p8317_p13, %p8311_p10 }
  0x23   :  { %8321 = shalt.err (!%p8318_p0)
}
  0x24   :  { %86 = dma.hbm_to_vmem [thread:$0]  %s9022_s5, 128, %s84_s27, [#allocation12]  }
  0x25   :  { %s8459_s14 = smov [#allocation2]   ;;  %s8460_s16 = smov [#allocation7]  }
  0x26   :  { %s29_s15 = sshll.u32 %s8459_s14, 4  ;;  %s51_s17 = sshll.u32 %s8460_s16, 4  ;;  %s30_s15 = int_to_ptr.vmem [resolvable:$true] %s29_s15  ;;  %s52_s17 = int_to_ptr.vmem [resolvable:$true] %s51_s17 }
  0x27   :  { %s8330_s18 = scalar_lea.vmem %s30_s15, 768  ;;  %p8335_p2 = scmp.lt.s32.totalorder %s30_s15, %s30_s15 }
  0x28   :  { %p8331_p1 = scmp.ne.s32.totalorder %s30_s15, %s8330_s18  ;;  %p8336_p3 = scmp.lt.s32.totalorder %s8330_s18, %s8330_s18 }
  0x2a   :  { %p8337_p4 = por %p8336_p3, %p8335_p2 }
  0x2c   :  { %p8338_p5 = pnand %p8337_p4, %p8331_p1 }
  0x2e   :  { %8341 = shalt.err (!%p8338_p5)
}
  0x2f   :  { %32 = dma.hbm_to_vmem [thread:$0]  %s9017_s0, 768, %s30_s15, [#allocation3]  }
  0x30   :  { %s8350_s20 = scalar_lea.vmem %s52_s17, 128  ;;  %p8355_p7 = scmp.lt.s32.totalorder %s52_s17, %s52_s17 }
  0x31   :  { %p8351_p6 = scmp.ne.s32.totalorder %s52_s17, %s8350_s20  ;;  %p8356_p8 = scmp.lt.s32.totalorder %s8350_s20, %s8350_s20 }
  0x33   :  { %p8357_p9 = por %p8356_p8, %p8355_p7 }
  0x35   :  { %p8358_p10 = pnand %p8357_p9, %p8351_p6 }
  0x37   :  { %8361 = shalt.err (!%p8358_p10)
}
  0x38   :  { %54 = dma.hbm_to_vmem [thread:$0]  %s9019_s2, 128, %s52_s17, [#allocation6]  }
  0x39   :  { %s8461_s22 = smov [#allocation10]   ;;  %s8462_s24 = smov [#allocation13]  }
  0x3a   :  { %s73_s23 = sshll.u32 %s8461_s22, 4  ;;  %s93_s25 = sshll.u32 %s8462_s24, 4  ;;  %s74_s23 = int_to_ptr.vmem [resolvable:$true] %s73_s23  ;;  %s94_s25 = int_to_ptr.vmem [resolvable:$true] %s93_s25 }
  0x3b   :  { %s8370_s26 = scalar_lea.vmem %s74_s23, 128  ;;  %p8375_p12 = scmp.lt.s32.totalorder %s74_s23, %s74_s23 }
  0x3c   :  { %p8371_p11 = scmp.ne.s32.totalorder %s74_s23, %s8370_s26  ;;  %p8376_p13 = scmp.lt.s32.totalorder %s8370_s26, %s8370_s26 }
  0x3e   :  { %p8377_p0 = por %p8376_p13, %p8375_p12 }
  0x40   :  { %p8378_p1 = pnand %p8377_p0, %p8371_p11 }
  0x42   :  { %8381 = shalt.err (!%p8378_p1)
}
  0x43   :  { %76 = dma.hbm_to_vmem [thread:$0]  %s9021_s4, 128, %s74_s23, [#allocation9]  }
  0x44   :  { %s8390_s28 = scalar_lea.vmem %s94_s25, 128  ;;  %p8395_p3 = scmp.lt.s32.totalorder %s94_s25, %s94_s25 }
  0x45   :  { %p8391_p2 = scmp.ne.s32.totalorder %s94_s25, %s8390_s28  ;;  %p8396_p4 = scmp.lt.s32.totalorder %s8390_s28, %s8390_s28 }
  0x47   :  { %p8397_p5 = por %p8396_p4, %p8395_p3 }
  0x49   :  { %p8398_p6 = pnand %p8397_p5, %p8391_p2 }
  0x4b   :  { %8401 = shalt.err (!%p8398_p6)
}
  0x4c   :  { %96 = dma.hbm_to_vmem [thread:$0]  %s9023_s6, 128, %s94_s25, [#allocation12]  }
  0x4d   :  { %s8463_s30 = smov [#allocation14]  }
  0x4e   :  { %s103_s12 = sshll.u32 %s8463_s30, 4  ;;  %s104_s12 = int_to_ptr.vmem [resolvable:$true] %s103_s12 }
  0x4f   :  { %s8410_s1 = scalar_lea.vmem %s104_s12, 1024  ;;  %p8415_p8 = scmp.lt.s32.totalorder %s104_s12, %s104_s12 }
  0x50   :  { %p8411_p7 = scmp.ne.s32.totalorder %s104_s12, %s8410_s1  ;;  %p8416_p9 = scmp.lt.s32.totalorder %s8410_s1, %s8410_s1 }
  0x52   :  { %p8417_p10 = por %p8416_p9, %p8415_p8 }
  0x54   :  { %p8418_p11 = pnand %p8417_p10, %p8411_p7 }
  0x56   :  { %8421 = shalt.err (!%p8418_p11)
}
  0x57   :  { %106 = dma.hbm_to_vmem [thread:$0]  %s9024_s7, 1024, %s104_s12, [#allocation15]  }
  0x58   :  { %8442 = dma.done.wait [#allocation3], 768  }
  0x59   :  { %8443 = vsyncadd [#allocation3], 4294966528 }
  0x5a   :  { %8444 = dma.done.wait [#allocation6], 49280  }
  0x5b   :  { %8445 = vsyncadd [#allocation6], 4294918016 }
  0x5c   :  { %8446 = dma.done.wait [#allocation9], 65664  }
  0x5d   :  { %8447 = vsyncadd [#allocation9], 4294901632 }
  0x5e   :  { %8448 = dma.done.wait [#allocation12], 256  }
  0x5f   :  { %8449 = vsyncadd [#allocation12], 4294967040 }
  0x60   :  { %8450 = dma.done.wait [#allocation15], 1024  }
  0x61   :  { %8451 = vsyncadd [#allocation15], 4294966272  ;;  %v211_v0 = vld [vmem:[#allocation5 + $0x1c0] sm:$0xff]  ;;  %v144_v53 = vld [vmem:[#allocation2 + $0x8] sm:$0xff] }
  0x62   :  { %v215_v1 = vld [vmem:[#allocation5 + $0x1e0] sm:$0xff]  ;;  %v146_v54 = vld [vmem:[#allocation2 + $0x18] sm:$0xff]  ;;  %v8550_v58 = vpack.c.bf16 %v144_v53, %v144_v53 }
  0x63   :  { %v339_v2 = vld [vmem:[#allocation5 + $0x5c0] sm:$0xff]  ;;  %v7369_v3 = vcombine.high %v211_v0, %v215_v1  ;;  %v7368_v5 = vcombine.low %v211_v0, %v215_v1  ;;  %v8552_v59 = vpack.c.bf16 %v146_v54, %v146_v54 }
  0x64   :  { %v343_v4 = vld [vmem:[#allocation5 + $0x5e0] sm:$0xff]  ;;  %2533 = vmatprep.mubr.bf16.mxu0 %v8550_v58 }
  0x65   :  { %v203_v6 = vld [vmem:[#allocation5 + $0x180] sm:$0xff]  ;;  %v7497_v8 = vcombine.high %v339_v2, %v343_v4  ;;  %v7496_v9 = vcombine.low %v339_v2, %v343_v4  ;;  %2501 = vmatprep.subr.bf16.mxu0 %v7369_v3  ;;  %2574 = vmatprep.mubr.bf16.mxu1 %v8552_v59 }
  0x66   :  { %v207_v7 = vld [vmem:[#allocation5 + $0x1a0] sm:$0xff]  ;;  %2502 = vmatpush1.bf16.msra.mxu0 %v7368_v5 }
  0x67   :  { %v7361_v10 = vcombine.high %v203_v6, %v207_v7  ;;  %v331_v11 = vld [vmem:[#allocation5 + $0x580] sm:$0xff]  ;;  %2542 = vmatprep.subr.bf16.mxu1 %v7497_v8  ;;  %v7360_v18 = vcombine.low %v203_v6, %v207_v7 }
  0x68   :  { %v335_v12 = vld [vmem:[#allocation5 + $0x5a0] sm:$0xff]  ;;  %2543 = vmatpush1.bf16.msra.mxu1 %v7496_v9 }
  0x69   :  { %v195_v13 = vld [vmem:[#allocation5 + $0x140] sm:$0xff]  ;;  %v7489_v14 = vcombine.high %v331_v11, %v335_v12  ;;  %2503 = vmatprep.subr.bf16.mxu0 %v7361_v10  ;;  %v7488_v19 = vcombine.low %v331_v11, %v335_v12 }
  0x6a   :  { %v199_v15 = vld [vmem:[#allocation5 + $0x160] sm:$0xff]  ;;  %2504 = vmatpush1.bf16.msra.mxu0 %v7360_v18 }
  0x6b   :  { %v323_v16 = vld [vmem:[#allocation5 + $0x540] sm:$0xff]  ;;  %v7353_v20 = vcombine.high %v195_v13, %v199_v15  ;;  %2544 = vmatprep.subr.bf16.mxu1 %v7489_v14  ;;  %v7352_v26 = vcombine.low %v195_v13, %v199_v15 }
  0x6c   :  { %v327_v17 = vld [vmem:[#allocation5 + $0x560] sm:$0xff]  ;;  %2545 = vmatpush1.bf16.msra.mxu1 %v7488_v19 }
  0x6d   :  { %v7481_v21 = vcombine.high %v323_v16, %v327_v17  ;;  %v187_v22 = vld [vmem:[#allocation5 + $0x100] sm:$0xff]  ;;  %2505 = vmatprep.subr.bf16.mxu0 %v7353_v20  ;;  %v7480_v27 = vcombine.low %v323_v16, %v327_v17 }
  0x6e   :  { %v191_v23 = vld [vmem:[#allocation5 + $0x120] sm:$0xff]  ;;  %2506 = vmatpush1.bf16.msra.mxu0 %v7352_v26 }
  0x6f   :  { %v315_v24 = vld [vmem:[#allocation5 + $0x500] sm:$0xff]  ;;  %v7345_v28 = vcombine.high %v187_v22, %v191_v23  ;;  %2546 = vmatprep.subr.bf16.mxu1 %v7481_v21  ;;  %v7344_v34 = vcombine.low %v187_v22, %v191_v23 }
  0x70   :  { %v319_v25 = vld [vmem:[#allocation5 + $0x520] sm:$0xff]  ;;  %2547 = vmatpush1.bf16.msra.mxu1 %v7480_v27 }
  0x71   :  { %v7473_v29 = vcombine.high %v315_v24, %v319_v25  ;;  %v179_v30 = vld [vmem:[#allocation5 + $0xc0] sm:$0xff]  ;;  %2507 = vmatprep.subr.bf16.mxu0 %v7345_v28  ;;  %v7472_v35 = vcombine.low %v315_v24, %v319_v25 }
  0x72   :  { %v183_v31 = vld [vmem:[#allocation5 + $0xe0] sm:$0xff]  ;;  %2508 = vmatpush1.bf16.msra.mxu0 %v7344_v34 }
  0x73   :  { %v307_v32 = vld [vmem:[#allocation5 + $0x4c0] sm:$0xff]  ;;  %v7337_v36 = vcombine.high %v179_v30, %v183_v31  ;;  %2548 = vmatprep.subr.bf16.mxu1 %v7473_v29  ;;  %v7336_v42 = vcombine.low %v179_v30, %v183_v31 }
  0x74   :  { %v311_v33 = vld [vmem:[#allocation5 + $0x4e0] sm:$0xff]  ;;  %2549 = vmatpush1.bf16.msra.mxu1 %v7472_v35 }
  0x75   :  { %v7465_v37 = vcombine.high %v307_v32, %v311_v33  ;;  %v171_v38 = vld [vmem:[#allocation5 + $0x80] sm:$0xff]  ;;  %2509 = vmatprep.subr.bf16.mxu0 %v7337_v36  ;;  %v7464_v43 = vcombine.low %v307_v32, %v311_v33 }
  0x76   :  { %v175_v39 = vld [vmem:[#allocation5 + $0xa0] sm:$0xff]  ;;  %2510 = vmatpush1.bf16.msra.mxu0 %v7336_v42 }
  0x77   :  { %v299_v40 = vld [vmem:[#allocation5 + $0x480] sm:$0xff]  ;;  %v7329_v44 = vcombine.high %v171_v38, %v175_v39  ;;  %2550 = vmatprep.subr.bf16.mxu1 %v7465_v37  ;;  %v7328_v50 = vcombine.low %v171_v38, %v175_v39 }
  0x78   :  { %v303_v41 = vld [vmem:[#allocation5 + $0x4a0] sm:$0xff]  ;;  %2551 = vmatpush1.bf16.msra.mxu1 %v7464_v43 }
  0x79   :  { %v7457_v45 = vcombine.high %v299_v40, %v303_v41  ;;  %v163_v46 = vld [vmem:[#allocation5 + $0x40] sm:$0xff]  ;;  %2511 = vmatprep.subr.bf16.mxu0 %v7329_v44  ;;  %v7456_v51 = vcombine.low %v299_v40, %v303_v41 }
  0x7a   :  { %v167_v47 = vld [vmem:[#allocation5 + $0x60] sm:$0xff]  ;;  %2512 = vmatpush1.bf16.msra.mxu0 %v7328_v50 }
  0x7b   :  { %v291_v48 = vld [vmem:[#allocation5 + $0x440] sm:$0xff]  ;;  %v7321_v52 = vcombine.high %v163_v46, %v167_v47  ;;  %2552 = vmatprep.subr.bf16.mxu1 %v7457_v45  ;;  %v7320_v62 = vcombine.low %v163_v46, %v167_v47 }
  0x7c   :  { %v295_v49 = vld [vmem:[#allocation5 + $0x460] sm:$0xff]  ;;  %2553 = vmatpush1.bf16.msra.mxu1 %v7456_v51 }
  0x7d   :  { %v7449_v55 = vcombine.high %v291_v48, %v295_v49  ;;  %v155_v56 = vld [vmem:[#allocation5] sm:$0xff]  ;;  %2513 = vmatprep.subr.bf16.mxu0 %v7321_v52  ;;  %v7448_v63 = vcombine.low %v291_v48, %v295_v49 }
  0x7e   :  { %v159_v57 = vld [vmem:[#allocation5 + $0x20] sm:$0xff]  ;;  %2514 = vmatpush1.bf16.msra.mxu0 %v7320_v62 }
  0x7f   :  { %v283_v60 = vld [vmem:[#allocation5 + $0x400] sm:$0xff]  ;;  %v7313_v0 = vcombine.high %v155_v56, %v159_v57  ;;  %2554 = vmatprep.subr.bf16.mxu1 %v7449_v55  ;;  %v7312_v6 = vcombine.low %v155_v56, %v159_v57 }
  0x80   :  { %v287_v61 = vld [vmem:[#allocation5 + $0x420] sm:$0xff]  ;;  %2555 = vmatpush1.bf16.msra.mxu1 %v7448_v63 }
  0x81   :  { %v7441_v1 = vcombine.high %v283_v60, %v287_v61  ;;  %v275_v2 = vld [vmem:[#allocation5 + $0x3c0] sm:$0xff]  ;;  %2515 = vmatprep.subr.bf16.mxu0 %v7313_v0  ;;  %v7440_v7 = vcombine.low %v283_v60, %v287_v61 }
  0x82   :  { %v279_v3 = vld [vmem:[#allocation5 + $0x3e0] sm:$0xff]  ;;  %2516 = vmatpush1.bf16.msra.mxu0 %v7312_v6  ;;  %v212_v6 = vld [vmem:[#allocation5 + $0x1c8] sm:$0xff] }
  0x83   :  { %v403_v4 = vld [vmem:[#allocation5 + $0x7c0] sm:$0xff]  ;;  %v7433_v8 = vcombine.high %v275_v2, %v279_v3  ;;  %2556 = vmatprep.subr.bf16.mxu1 %v7441_v1  ;;  %v7432_v14 = vcombine.low %v275_v2, %v279_v3 }
  0x84   :  { %v407_v5 = vld [vmem:[#allocation5 + $0x7e0] sm:$0xff]  ;;  %2557 = vmatpush1.bf16.msra.mxu1 %v7440_v7  ;;  %v216_v7 = vld [vmem:[#allocation5 + $0x1e8] sm:$0xff] }
  0x85   :  { %v7561_v9 = vcombine.high %v403_v4, %v407_v5  ;;  %v267_v10 = vld [vmem:[#allocation5 + $0x380] sm:$0xff]  ;;  %2517 = vmatprep.subr.bf16.mxu0 %v7433_v8  ;;  %v7560_v15 = vcombine.low %v403_v4, %v407_v5 }
  0x86   :  { %v271_v11 = vld [vmem:[#allocation5 + $0x3a0] sm:$0xff]  ;;  %2518 = vmatpush2.bf16.msra.mxu0 %v7432_v14 }
  0x87   :  { %v395_v12 = vld [vmem:[#allocation5 + $0x780] sm:$0xff]  ;;  %v7425_v16 = vcombine.high %v267_v10, %v271_v11  ;;  %2558 = vmatprep.subr.bf16.mxu1 %v7561_v9  ;;  %v7424_v22 = vcombine.low %v267_v10, %v271_v11  ;;  %v143_v9 = vld [vmem:[#allocation2] sm:$0xff] }
  0x88   :  { %v399_v13 = vld [vmem:[#allocation5 + $0x7a0] sm:$0xff]  ;;  %2559 = vmatpush2.bf16.msra.mxu1 %v7560_v15 }
  0x89   :  { %v7553_v17 = vcombine.high %v395_v12, %v399_v13  ;;  %v259_v18 = vld [vmem:[#allocation5 + $0x340] sm:$0xff]  ;;  %2519 = vmatprep.subr.bf16.mxu0 %v7425_v16  ;;  %v7552_v23 = vcombine.low %v395_v12, %v399_v13  ;;  %v7371_v13 = vcombine.high %v212_v6, %v216_v7  ;;  %v8556_v16 = vpack.c.bf16 %v143_v9, %v143_v9 }
  0x8a   :  { %v263_v19 = vld [vmem:[#allocation5 + $0x360] sm:$0xff]  ;;  %2520 = vmatpush2.bf16.msra.mxu0 %v7424_v22  ;;  %v7370_v22 = vcombine.low %v212_v6, %v216_v7  ;;  %v156_v6 = vld [vmem:[#allocation5 + $0x8] sm:$0xff] }
  0x8b   :  { %v387_v20 = vld [vmem:[#allocation5 + $0x740] sm:$0xff]  ;;  %v7417_v24 = vcombine.high %v259_v18, %v263_v19  ;;  %2560 = vmatprep.subr.bf16.mxu1 %v7553_v17  ;;  %v7416_v30 = vcombine.low %v259_v18, %v263_v19  ;;  %v204_v17 = vld [vmem:[#allocation5 + $0x188] sm:$0xff]  ;;  %v148_v19 = vld [vmem:[#allocation2 + $0x28] sm:$0xff] }
  0x8c   :  { %v391_v21 = vld [vmem:[#allocation5 + $0x760] sm:$0xff]  ;;  %2561 = vmatpush2.bf16.msra.mxu1 %v7552_v23  ;;  %v208_v18 = vld [vmem:[#allocation5 + $0x1a8] sm:$0xff] }
  0x8d   :  { %v7545_v25 = vcombine.high %v387_v20, %v391_v21  ;;  %v251_v26 = vld [vmem:[#allocation5 + $0x300] sm:$0xff]  ;;  %2521 = vmatprep.subr.bf16.mxu0 %v7417_v24  ;;  %v7544_v31 = vcombine.low %v387_v20, %v391_v21  ;;  %v7363_v24 = vcombine.high %v204_v17, %v208_v18  ;;  %v160_v7 = vld [vmem:[#allocation5 + $0x28] sm:$0xff] }
  0x8e   :  { %v255_v27 = vld [vmem:[#allocation5 + $0x320] sm:$0xff]  ;;  %2522 = vmatpush2.bf16.msra.mxu0 %v7416_v30 }
  0x8f   :  { %v379_v28 = vld [vmem:[#allocation5 + $0x700] sm:$0xff]  ;;  %v7409_v32 = vcombine.high %v251_v26, %v255_v27  ;;  %2562 = vmatprep.subr.bf16.mxu1 %v7545_v25  ;;  %v7408_v38 = vcombine.low %v251_v26, %v255_v27  ;;  %v8560_v27 = vpack.c.bf16 %v148_v19, %v148_v19 }
  0x90   :  { %v383_v29 = vld [vmem:[#allocation5 + $0x720] sm:$0xff]  ;;  %2563 = vmatpush2.bf16.msra.mxu1 %v7544_v31  ;;  %v7362_v31 = vcombine.low %v204_v17, %v208_v18  ;;  %v7314_v18 = vcombine.low %v156_v6, %v160_v7 }
  0x91   :  { %v7537_v33 = vcombine.high %v379_v28, %v383_v29  ;;  %v243_v34 = vld [vmem:[#allocation5 + $0x2c0] sm:$0xff]  ;;  %2523 = vmatprep.subr.bf16.mxu0 %v7409_v32  ;;  %v7536_v39 = vcombine.low %v379_v28, %v383_v29  ;;  %v196_v28 = vld [vmem:[#allocation5 + $0x148] sm:$0xff] }
  0x92   :  { %v247_v35 = vld [vmem:[#allocation5 + $0x2e0] sm:$0xff]  ;;  %2524 = vmatpush2.bf16.msra.mxu0 %v7408_v38  ;;  %v200_v29 = vld [vmem:[#allocation5 + $0x168] sm:$0xff] }
  0x93   :  { %v371_v36 = vld [vmem:[#allocation5 + $0x6c0] sm:$0xff]  ;;  %v7401_v40 = vcombine.high %v243_v34, %v247_v35  ;;  %2564 = vmatprep.subr.bf16.mxu1 %v7537_v33  ;;  %v7400_v46 = vcombine.low %v243_v34, %v247_v35  ;;  %v7355_v33 = vcombine.high %v196_v28, %v200_v29 }
  0x94   :  { %v375_v37 = vld [vmem:[#allocation5 + $0x6e0] sm:$0xff]  ;;  %2565 = vmatpush2.bf16.msra.mxu1 %v7536_v39  ;;  %v7354_v39 = vcombine.low %v196_v28, %v200_v29 }
  0x95   :  { %v7529_v41 = vcombine.high %v371_v36, %v375_v37  ;;  %v235_v42 = vld [vmem:[#allocation5 + $0x280] sm:$0xff]  ;;  %2525 = vmatprep.subr.bf16.mxu0 %v7401_v40  ;;  %v7528_v47 = vcombine.low %v371_v36, %v375_v37  ;;  %v188_v36 = vld [vmem:[#allocation5 + $0x108] sm:$0xff] }
  0x96   :  { %v239_v43 = vld [vmem:[#allocation5 + $0x2a0] sm:$0xff]  ;;  %2526 = vmatpush2.bf16.msra.mxu0 %v7400_v46  ;;  %v192_v37 = vld [vmem:[#allocation5 + $0x128] sm:$0xff] }
  0x97   :  { %v363_v44 = vld [vmem:[#allocation5 + $0x680] sm:$0xff]  ;;  %v7393_v48 = vcombine.high %v235_v42, %v239_v43  ;;  %2566 = vmatprep.subr.bf16.mxu1 %v7529_v41  ;;  %v7392_v54 = vcombine.low %v235_v42, %v239_v43  ;;  %v7347_v41 = vcombine.high %v188_v36, %v192_v37 }
  0x98   :  { %v367_v45 = vld [vmem:[#allocation5 + $0x6a0] sm:$0xff]  ;;  %2567 = vmatpush2.bf16.msra.mxu1 %v7528_v47  ;;  %v7346_v47 = vcombine.low %v188_v36, %v192_v37 }
  0x99   :  { %v7521_v49 = vcombine.high %v363_v44, %v367_v45  ;;  %v227_v50 = vld [vmem:[#allocation5 + $0x240] sm:$0xff]  ;;  %2527 = vmatprep.subr.bf16.mxu0 %v7393_v48  ;;  %v7520_v55 = vcombine.low %v363_v44, %v367_v45  ;;  %v180_v44 = vld [vmem:[#allocation5 + $0xc8] sm:$0xff] }
  0x9a   :  { %v231_v51 = vld [vmem:[#allocation5 + $0x260] sm:$0xff]  ;;  %2528 = vmatpush2.bf16.msra.mxu0 %v7392_v54  ;;  %v184_v45 = vld [vmem:[#allocation5 + $0xe8] sm:$0xff] }
  0x9b   :  { %v355_v52 = vld [vmem:[#allocation5 + $0x640] sm:$0xff]  ;;  %v7385_v56 = vcombine.high %v227_v50, %v231_v51  ;;  %2568 = vmatprep.subr.bf16.mxu1 %v7521_v49  ;;  %v7384_v0 = vcombine.low %v227_v50, %v231_v51  ;;  %v7339_v49 = vcombine.high %v180_v44, %v184_v45 }
  0x9c   :  { %v359_v53 = vld [vmem:[#allocation5 + $0x660] sm:$0xff]  ;;  %2569 = vmatpush2.bf16.msra.mxu1 %v7520_v55  ;;  %v7338_v55 = vcombine.low %v180_v44, %v184_v45 }
  0x9d   :  { %v7513_v57 = vcombine.high %v355_v52, %v359_v53  ;;  %v219_v60 = vld [vmem:[#allocation5 + $0x200] sm:$0xff]  ;;  %2529 = vmatprep.subr.bf16.mxu0 %v7385_v56  ;;  %v7512_v1 = vcombine.low %v355_v52, %v359_v53  ;;  %v172_v52 = vld [vmem:[#allocation5 + $0x88] sm:$0xff] }
  0x9e   :  { %v223_v61 = vld [vmem:[#allocation5 + $0x220] sm:$0xff]  ;;  %2530 = vmatpush2.bf16.msra.mxu0 %v7384_v0  ;;  %v176_v53 = vld [vmem:[#allocation5 + $0xa8] sm:$0xff] }
  0x9f   :  { %v347_v62 = vld [vmem:[#allocation5 + $0x600] sm:$0xff]  ;;  %v7377_v2 = vcombine.high %v219_v60, %v223_v61  ;;  %2570 = vmatprep.subr.bf16.mxu1 %v7513_v57  ;;  %v7376_v8 = vcombine.low %v219_v60, %v223_v61  ;;  %v7331_v57 = vcombine.high %v172_v52, %v176_v53 }
  0xa0   :  { %v351_v63 = vld [vmem:[#allocation5 + $0x620] sm:$0xff]  ;;  %2571 = vmatpush2.bf16.msra.mxu1 %v7512_v1  ;;  %v7330_v1 = vcombine.low %v172_v52, %v176_v53 }
  0xa1   :  { %v7505_v3 = vcombine.high %v347_v62, %v351_v63  ;;  %v467_v4 = vld [vmem:[#allocation5 + $0x9c0] sm:$0xff]  ;;  %2531 = vmatprep.subr.bf16.mxu0 %v7377_v2  ;;  %v7504_v10 = vcombine.low %v347_v62, %v351_v63  ;;  %v164_v62 = vld [vmem:[#allocation5 + $0x48] sm:$0xff] }
  0xa2   :  { %v471_v5 = vld [vmem:[#allocation5 + $0x9e0] sm:$0xff]  ;;  %2532 = vmatpush2.bf16.msra.mxu0 %v7376_v8  ;;  %v168_v63 = vld [vmem:[#allocation5 + $0x68] sm:$0xff] }
  0xa3   :  { %v145_v11 = vld [vmem:[#allocation2 + $0x10] sm:$0xff]  ;;  %v7625_v12 = vcombine.high %v467_v4, %v471_v5  ;;  %2572 = vmatprep.subr.bf16.mxu1 %v7505_v3  ;;  %v7624_v21 = vcombine.low %v467_v4, %v471_v5  ;;  %v7323_v3 = vcombine.high %v164_v62, %v168_v63  ;;  %v7322_v9 = vcombine.low %v164_v62, %v168_v63 }
  0xa4   :  { %v459_v14 = vld [vmem:[#allocation5 + $0x980] sm:$0xff]  ;;  %v8558_v20 = vpack.c.bf16 %v145_v11, %v145_v11  ;;  %2573 = vmatpush2.bf16.msra.mxu1 %v7504_v10  ;;  %v7315_v11 = vcombine.high %v156_v6, %v160_v7 }
  0xa5   :  { %v463_v15 = vld [vmem:[#allocation5 + $0x9a0] sm:$0xff]  ;;  %2583 = vmatprep.subr.bf16.mxu0 %v7625_v12  ;;  %2624 = vmatprep.subr.bf16.mxu1 %v7371_v13 }
  0xa6   :  { %v7617_v23 = vcombine.high %v459_v14, %v463_v15  ;;  %v451_v25 = vld [vmem:[#allocation5 + $0x940] sm:$0xff]  ;;  %2534 = vmatmul.mubr.bf16.vlgmr.msra.gmra.mxu0 %v8556_v16  ;;  %v7616_v30 = vcombine.low %v459_v14, %v463_v15  ;;  %v276_v14 = vld [vmem:[#allocation5 + $0x3c8] sm:$0xff] }
  0xa7   :  { %v455_v26 = vld [vmem:[#allocation5 + $0x960] sm:$0xff]  ;;  %2575 = vmatmul.mubr.bf16.vlgmr.msra.gmra.mxu1 %v8558_v20  ;;  %2584 = vmatpush1.bf16.msra.mxu0 %v7624_v21  ;;  %v280_v15 = vld [vmem:[#allocation5 + $0x3e8] sm:$0xff] }
  0xa8   :  { %2625 = vmatpush1.bf16.msra.mxu1 %v7370_v22  ;;  %2585 = vmatprep.subr.bf16.mxu0 %v7617_v23  ;;  %v7609_v32 = vcombine.high %v451_v25, %v455_v26  ;;  %v443_v34 = vld [vmem:[#allocation5 + $0x900] sm:$0xff]  ;;  %v7608_v38 = vcombine.low %v451_v25, %v455_v26  ;;  %v7435_v21 = vcombine.high %v276_v14, %v280_v15  ;;  %v272_v25 = vld [vmem:[#allocation5 + $0x3a8] sm:$0xff] }
  0xa9   :  { %2626 = vmatprep.subr.bf16.mxu1 %v7363_v24  ;;  %v447_v35 = vld [vmem:[#allocation5 + $0x920] sm:$0xff]  ;;  %2615 = vmatprep.mubr.bf16.mxu0 %v8560_v27  ;;  %v268_v24 = vld [vmem:[#allocation5 + $0x388] sm:$0xff]  ;;  %v7434_v28 = vcombine.low %v276_v14, %v280_v15 }
  0xaa   :  { %2656 = vmatprep.mubr.bf16.mxu1 %v8550_v58  ;;  %v7601_v40 = vcombine.high %v443_v34, %v447_v35  ;;  %v435_v42 = vld [vmem:[#allocation5 + $0x8c0] sm:$0xff]  ;;  %v7600_v46 = vcombine.low %v443_v34, %v447_v35  ;;  %v264_v34 = vld [vmem:[#allocation5 + $0x368] sm:$0xff]  ;;  %v7426_v36 = vcombine.low %v268_v24, %v272_v25 }
  0xab   :  { %2586 = vmatpush1.bf16.msra.mxu0 %v7616_v30  ;;  %v439_v43 = vld [vmem:[#allocation5 + $0x8e0] sm:$0xff]  ;;  %v7427_v30 = vcombine.high %v268_v24, %v272_v25  ;;  %v147_v24 = vld [vmem:[#allocation2 + $0x20] sm:$0xff] }
  0xac   :  { %2627 = vmatpush1.bf16.msra.mxu1 %v7362_v31  ;;  %2587 = vmatprep.subr.bf16.mxu0 %v7609_v32  ;;  %v7593_v48 = vcombine.high %v435_v42, %v439_v43  ;;  %v427_v50 = vld [vmem:[#allocation5 + $0x880] sm:$0xff]  ;;  %v7592_v54 = vcombine.low %v435_v42, %v439_v43  ;;  %v256_v42 = vld [vmem:[#allocation5 + $0x328] sm:$0xff] }
  0xad   :  { %2628 = vmatprep.subr.bf16.mxu1 %v7355_v33  ;;  %v431_v51 = vld [vmem:[#allocation5 + $0x8a0] sm:$0xff]  ;;  %v260_v33 = vld [vmem:[#allocation5 + $0x348] sm:$0xff] }
  0xae   :  { %v7585_v56 = vcombine.high %v427_v50, %v431_v51  ;;  %v419_v60 = vld [vmem:[#allocation5 + $0x840] sm:$0xff]  ;;  %v7584_v0 = vcombine.low %v427_v50, %v431_v51  ;;  %v7418_v44 = vcombine.low %v260_v33, %v264_v34  ;;  %v248_v50 = vld [vmem:[#allocation5 + $0x2e8] sm:$0xff] }
  0xaf   :  { %2588 = vmatpush1.bf16.msra.mxu0 %v7608_v38  ;;  %v423_v61 = vld [vmem:[#allocation5 + $0x860] sm:$0xff]  ;;  %v7419_v38 = vcombine.high %v260_v33, %v264_v34  ;;  %v464_v33 = vld [vmem:[#allocation5 + $0x9a8] sm:$0xff] }
  0xb0   :  { %2629 = vmatpush1.bf16.msra.mxu1 %v7354_v39  ;;  %2589 = vmatprep.subr.bf16.mxu0 %v7601_v40  ;;  %v7577_v2 = vcombine.high %v419_v60, %v423_v61  ;;  %v411_v4 = vld [vmem:[#allocation5 + $0x800] sm:$0xff]  ;;  %v7576_v8 = vcombine.low %v419_v60, %v423_v61  ;;  %v240_v60 = vld [vmem:[#allocation5 + $0x2a8] sm:$0xff] }
  0xb1   :  { %2630 = vmatprep.subr.bf16.mxu1 %v7347_v41  ;;  %v415_v5 = vld [vmem:[#allocation5 + $0x820] sm:$0xff]  ;;  %v252_v41 = vld [vmem:[#allocation5 + $0x308] sm:$0xff] }
  0xb2   :  { %v7569_v10 = vcombine.high %v411_v4, %v415_v5  ;;  %v531_v12 = vld [vmem:[#allocation5 + $0xbc0] sm:$0xff]  ;;  %v7568_v17 = vcombine.low %v411_v4, %v415_v5  ;;  %v7410_v52 = vcombine.low %v252_v41, %v256_v42  ;;  %v232_v4 = vld [vmem:[#allocation5 + $0x268] sm:$0xff] }
  0xb3   :  { %2590 = vmatpush1.bf16.msra.mxu0 %v7600_v46  ;;  %v535_v13 = vld [vmem:[#allocation5 + $0xbe0] sm:$0xff]  ;;  %v7411_v46 = vcombine.high %v252_v41, %v256_v42  ;;  %v456_v41 = vld [vmem:[#allocation5 + $0x968] sm:$0xff] }
  0xb4   :  { %2631 = vmatpush1.bf16.msra.mxu1 %v7346_v47  ;;  %2591 = vmatprep.subr.bf16.mxu0 %v7593_v48  ;;  %v7689_v19 = vcombine.high %v531_v12, %v535_v13  ;;  %v523_v22 = vld [vmem:[#allocation5 + $0xb80] sm:$0xff]  ;;  %v7688_v26 = vcombine.low %v531_v12, %v535_v13  ;;  %v224_v12 = vld [vmem:[#allocation5 + $0x228] sm:$0xff] }
  0xb5   :  { %2632 = vmatprep.subr.bf16.mxu1 %v7339_v49  ;;  %v527_v23 = vld [vmem:[#allocation5 + $0xba0] sm:$0xff]  ;;  %v244_v49 = vld [vmem:[#allocation5 + $0x2c8] sm:$0xff] }
  0xb6   :  { %v7681_v29 = vcombine.high %v523_v22, %v527_v23  ;;  %v515_v31 = vld [vmem:[#allocation5 + $0xb40] sm:$0xff]  ;;  %v7680_v35 = vcombine.low %v523_v22, %v527_v23  ;;  %v7402_v62 = vcombine.low %v244_v49, %v248_v50  ;;  %v472_v22 = vld [vmem:[#allocation5 + $0x9e8] sm:$0xff] }
  0xb7   :  { %2592 = vmatpush1.bf16.msra.mxu0 %v7592_v54  ;;  %v519_v32 = vld [vmem:[#allocation5 + $0xb60] sm:$0xff]  ;;  %v7403_v54 = vcombine.high %v244_v49, %v248_v50  ;;  %v448_v49 = vld [vmem:[#allocation5 + $0x928] sm:$0xff] }
  0xb8   :  { %2633 = vmatpush1.bf16.msra.mxu1 %v7338_v55  ;;  %2593 = vmatprep.subr.bf16.mxu0 %v7585_v56  ;;  %v7673_v37 = vcombine.high %v515_v31, %v519_v32  ;;  %v507_v39 = vld [vmem:[#allocation5 + $0xb00] sm:$0xff]  ;;  %v7672_v43 = vcombine.low %v515_v31, %v519_v32  ;;  %v8566_v31 = vpack.c.bf16 %v147_v24, %v147_v24  ;;  %v460_v32 = vld [vmem:[#allocation5 + $0x988] sm:$0xff] }
  0xb9   :  { %2634 = vmatprep.subr.bf16.mxu1 %v7331_v57  ;;  %v511_v40 = vld [vmem:[#allocation5 + $0xb20] sm:$0xff]  ;;  %v236_v57 = vld [vmem:[#allocation5 + $0x288] sm:$0xff] }
  0xba   :  { %v7665_v45 = vcombine.high %v507_v39, %v511_v40  ;;  %v499_v47 = vld [vmem:[#allocation5 + $0xac0] sm:$0xff]  ;;  %v7664_v51 = vcombine.low %v507_v39, %v511_v40  ;;  %v7394_v6 = vcombine.low %v236_v57, %v240_v60  ;;  %v328_v39 = vld [vmem:[#allocation5 + $0x568] sm:$0xff] }
  0xbb   :  { %2594 = vmatpush1.bf16.msra.mxu0 %v7584_v0  ;;  %v503_v48 = vld [vmem:[#allocation5 + $0xae0] sm:$0xff]  ;;  %v7395_v0 = vcombine.high %v236_v57, %v240_v60  ;;  %v452_v40 = vld [vmem:[#allocation5 + $0x948] sm:$0xff] }
  0xbc   :  { %2635 = vmatpush1.bf16.msra.mxu1 %v7330_v1  ;;  %2595 = vmatprep.subr.bf16.mxu0 %v7577_v2  ;;  %v7657_v53 = vcombine.high %v499_v47, %v503_v48  ;;  %v491_v55 = vld [vmem:[#allocation5 + $0xa80] sm:$0xff]  ;;  %v7656_v61 = vcombine.low %v499_v47, %v503_v48  ;;  %v320_v47 = vld [vmem:[#allocation5 + $0x528] sm:$0xff] }
  0xbd   :  { %2636 = vmatprep.subr.bf16.mxu1 %v7323_v3  ;;  %v495_v56 = vld [vmem:[#allocation5 + $0xaa0] sm:$0xff]  ;;  %v228_v3 = vld [vmem:[#allocation5 + $0x248] sm:$0xff] }
  0xbe   :  { %v7649_v63 = vcombine.high %v491_v55, %v495_v56  ;;  %v483_v1 = vld [vmem:[#allocation5 + $0xa40] sm:$0xff]  ;;  %v7648_v5 = vcombine.low %v491_v55, %v495_v56  ;;  %v7386_v14 = vcombine.low %v228_v3, %v232_v4  ;;  %v444_v48 = vld [vmem:[#allocation5 + $0x908] sm:$0xff] }
  0xbf   :  { %2596 = vmatpush1.bf16.msra.mxu0 %v7576_v8  ;;  %v487_v2 = vld [vmem:[#allocation5 + $0xa60] sm:$0xff]  ;;  %v7387_v8 = vcombine.high %v228_v3, %v232_v4  ;;  %v312_v55 = vld [vmem:[#allocation5 + $0x4e8] sm:$0xff] }
  0xc0   :  { %2637 = vmatpush1.bf16.msra.mxu1 %v7322_v9  ;;  %2597 = vmatprep.subr.bf16.mxu0 %v7569_v10  ;;  %v7641_v7 = vcombine.high %v483_v1, %v487_v2  ;;  %v475_v9 = vld [vmem:[#allocation5 + $0xa00] sm:$0xff]  ;;  %v7640_v13 = vcombine.low %v483_v1, %v487_v2  ;;  %v436_v56 = vld [vmem:[#allocation5 + $0x8c8] sm:$0xff] }
  0xc1   :  { %2638 = vmatprep.subr.bf16.mxu1 %v7315_v11  ;;  %v479_v10 = vld [vmem:[#allocation5 + $0xa20] sm:$0xff]  ;;  %v220_v11 = vld [vmem:[#allocation5 + $0x208] sm:$0xff] }
  0xc2   :  { %v7633_v15 = vcombine.high %v475_v9, %v479_v10  ;;  %v7632_v23 = vcombine.low %v475_v9, %v479_v10  ;;  %v7378_v25 = vcombine.low %v220_v11, %v224_v12  ;;  %v440_v57 = vld [vmem:[#allocation5 + $0x8e8] sm:$0xff] }
  0xc3   :  { %2598 = vmatpush1.bf16.msra.mxu0 %v7568_v17  ;;  %v7379_v17 = vcombine.high %v220_v11, %v224_v12  ;;  %v304_v1 = vld [vmem:[#allocation5 + $0x4a8] sm:$0xff] }
  0xc4   :  { %2639 = vmatpush1.bf16.msra.mxu1 %v7314_v18  ;;  %2599 = vmatprep.subr.bf16.mxu0 %v7689_v19  ;;  %v340_v18 = vld [vmem:[#allocation5 + $0x5c8] sm:$0xff] }
  0xc5   :  { %2640 = vmatprep.subr.bf16.mxu1 %v7435_v21  ;;  %v344_v19 = vld [vmem:[#allocation5 + $0x5e8] sm:$0xff] }
  0xc6   :  { %v468_v21 = vld [vmem:[#allocation5 + $0x9c8] sm:$0xff]  ;;  %v7498_v34 = vcombine.low %v340_v18, %v344_v19 }
  0xc7   :  { %2600 = vmatpush2.bf16.msra.mxu0 %v7688_v26  ;;  %v7499_v26 = vcombine.high %v340_v18, %v344_v19  ;;  %v428_v2 = vld [vmem:[#allocation5 + $0x888] sm:$0xff] }
  0xc8   :  { %2641 = vmatpush2.bf16.msra.mxu1 %v7434_v28  ;;  %2601 = vmatprep.subr.bf16.mxu0 %v7681_v29  ;;  %v7627_v28 = vcombine.high %v468_v21, %v472_v22  ;;  %v332_v29 = vld [vmem:[#allocation5 + $0x588] sm:$0xff] }
  0xc9   :  { %2642 = vmatprep.subr.bf16.mxu1 %v7427_v30  ;;  %v336_v30 = vld [vmem:[#allocation5 + $0x5a8] sm:$0xff] }
  0xca   :  { %v7490_v42 = vcombine.low %v332_v29, %v336_v30  ;;  %v432_v3 = vld [vmem:[#allocation5 + $0x8a8] sm:$0xff] }
  0xcb   :  { %2602 = vmatpush2.bf16.msra.mxu0 %v7680_v35  ;;  %v7626_v35 = vcombine.low %v468_v21, %v472_v22  ;;  %v296_v9 = vld [vmem:[#allocation5 + $0x468] sm:$0xff] }
  0xcc   :  { %2643 = vmatpush2.bf16.msra.mxu1 %v7426_v36  ;;  %2603 = vmatprep.subr.bf16.mxu0 %v7673_v37  ;;  %v7491_v36 = vcombine.high %v332_v29, %v336_v30  ;;  %v7619_v37 = vcombine.high %v460_v32, %v464_v33  ;;  %v420_v10 = vld [vmem:[#allocation5 + $0x848] sm:$0xff] }
  0xcd   :  { %2644 = vmatprep.subr.bf16.mxu1 %v7419_v38  ;;  %v324_v38 = vld [vmem:[#allocation5 + $0x548] sm:$0xff] }
  0xce   :  { %v7482_v50 = vcombine.low %v324_v38, %v328_v39  ;;  %v424_v11 = vld [vmem:[#allocation5 + $0x868] sm:$0xff] }
  0xcf   :  { %2604 = vmatpush2.bf16.msra.mxu0 %v7672_v43  ;;  %v7618_v43 = vcombine.low %v460_v32, %v464_v33  ;;  %v288_v18 = vld [vmem:[#allocation5 + $0x428] sm:$0xff] }
  0xd0   :  { %2645 = vmatpush2.bf16.msra.mxu1 %v7418_v44  ;;  %2605 = vmatprep.subr.bf16.mxu0 %v7665_v45  ;;  %v7483_v44 = vcombine.high %v324_v38, %v328_v39  ;;  %v7611_v45 = vcombine.high %v452_v40, %v456_v41  ;;  %v412_v19 = vld [vmem:[#allocation5 + $0x808] sm:$0xff] }
  0xd1   :  { %2646 = vmatprep.subr.bf16.mxu1 %v7411_v46  ;;  %v316_v46 = vld [vmem:[#allocation5 + $0x508] sm:$0xff] }
  0xd2   :  { %v7474_v60 = vcombine.low %v316_v46, %v320_v47  ;;  %v416_v21 = vld [vmem:[#allocation5 + $0x828] sm:$0xff] }
  0xd3   :  { %2606 = vmatpush2.bf16.msra.mxu0 %v7664_v51  ;;  %v7610_v51 = vcombine.low %v452_v40, %v456_v41  ;;  %v532_v29 = vld [vmem:[#allocation5 + $0xbc8] sm:$0xff]  ;;  %v7570_v33 = vcombine.low %v412_v19, %v416_v21 }
  0xd4   :  { %2647 = vmatpush2.bf16.msra.mxu1 %v7410_v52  ;;  %2607 = vmatprep.subr.bf16.mxu0 %v7657_v53  ;;  %v7475_v52 = vcombine.high %v316_v46, %v320_v47  ;;  %v7603_v53 = vcombine.high %v444_v48, %v448_v49  ;;  %v536_v30 = vld [vmem:[#allocation5 + $0xbe8] sm:$0xff] }
  0xd5   :  { %2648 = vmatprep.subr.bf16.mxu1 %v7403_v54  ;;  %v308_v54 = vld [vmem:[#allocation5 + $0x4c8] sm:$0xff]  ;;  %v7690_v41 = vcombine.low %v532_v29, %v536_v30 }
  0xd6   :  { %v7466_v4 = vcombine.low %v308_v54, %v312_v55  ;;  %v524_v38 = vld [vmem:[#allocation5 + $0xb88] sm:$0xff] }
  0xd7   :  { %2608 = vmatpush2.bf16.msra.mxu0 %v7656_v61  ;;  %v7602_v61 = vcombine.low %v444_v48, %v448_v49  ;;  %v528_v39 = vld [vmem:[#allocation5 + $0xba8] sm:$0xff] }
  0xd8   :  { %2649 = vmatpush2.bf16.msra.mxu1 %v7402_v62  ;;  %2609 = vmatprep.subr.bf16.mxu0 %v7649_v63  ;;  %v7467_v62 = vcombine.high %v308_v54, %v312_v55  ;;  %v7595_v63 = vcombine.high %v436_v56, %v440_v57  ;;  %v516_v46 = vld [vmem:[#allocation5 + $0xb48] sm:$0xff]  ;;  %v7682_v49 = vcombine.low %v524_v38, %v528_v39 }
  0xd9   :  { %2650 = vmatprep.subr.bf16.mxu1 %v7395_v0  ;;  %v300_v0 = vld [vmem:[#allocation5 + $0x488] sm:$0xff] }
  0xda   :  { %v7458_v12 = vcombine.low %v300_v0, %v304_v1  ;;  %v520_v47 = vld [vmem:[#allocation5 + $0xb68] sm:$0xff] }
  0xdb   :  { %2610 = vmatpush2.bf16.msra.mxu0 %v7648_v5  ;;  %v7594_v5 = vcombine.low %v436_v56, %v440_v57  ;;  %v508_v54 = vld [vmem:[#allocation5 + $0xb08] sm:$0xff]  ;;  %v7674_v57 = vcombine.low %v516_v46, %v520_v47 }
  0xdc   :  { %2651 = vmatpush2.bf16.msra.mxu1 %v7394_v6  ;;  %2611 = vmatprep.subr.bf16.mxu0 %v7641_v7  ;;  %v7459_v6 = vcombine.high %v300_v0, %v304_v1  ;;  %v7587_v7 = vcombine.high %v428_v2, %v432_v3  ;;  %v512_v55 = vld [vmem:[#allocation5 + $0xb28] sm:$0xff] }
  0xdd   :  { %2652 = vmatprep.subr.bf16.mxu1 %v7387_v8  ;;  %v292_v8 = vld [vmem:[#allocation5 + $0x448] sm:$0xff] }
  0xde   :  { %v7450_v22 = vcombine.low %v292_v8, %v296_v9  ;;  %v500_v0 = vld [vmem:[#allocation5 + $0xac8] sm:$0xff] }
  0xdf   :  { %2612 = vmatpush2.bf16.msra.mxu0 %v7640_v13  ;;  %v7586_v13 = vcombine.low %v428_v2, %v432_v3  ;;  %v504_v1 = vld [vmem:[#allocation5 + $0xae8] sm:$0xff]  ;;  %v7666_v3 = vcombine.low %v508_v54, %v512_v55 }
  0xe0   :  { %2653 = vmatpush2.bf16.msra.mxu1 %v7386_v14  ;;  %2613 = vmatprep.subr.bf16.mxu0 %v7633_v15  ;;  %v7451_v14 = vcombine.high %v292_v8, %v296_v9  ;;  %v7579_v15 = vcombine.high %v420_v10, %v424_v11  ;;  %v492_v8 = vld [vmem:[#allocation5 + $0xa88] sm:$0xff] }
  0xe1   :  { %2654 = vmatprep.subr.bf16.mxu1 %v7379_v17  ;;  %v284_v17 = vld [vmem:[#allocation5 + $0x408] sm:$0xff] }
  0xe2   :  { %v7443_v24 = vcombine.high %v284_v17, %v288_v18  ;;  %v7442_v32 = vcombine.low %v284_v17, %v288_v18  ;;  %v496_v9 = vld [vmem:[#allocation5 + $0xaa8] sm:$0xff] }
  0xe3   :  { %2614 = vmatpush2.bf16.msra.mxu0 %v7632_v23  ;;  %v7578_v23 = vcombine.low %v420_v10, %v424_v11  ;;  %v7658_v11 = vcombine.low %v500_v0, %v504_v1  ;;  %v484_v17 = vld [vmem:[#allocation5 + $0xa48] sm:$0xff] }
  0xe4   :  { %2655 = vmatpush2.bf16.msra.mxu1 %v7378_v25  ;;  %2665 = vmatprep.subr.bf16.mxu0 %v7499_v26  ;;  %v7571_v25 = vcombine.high %v412_v19, %v416_v21  ;;  %v404_v26 = vld [vmem:[#allocation5 + $0x7c8] sm:$0xff]  ;;  %v7650_v21 = vcombine.low %v492_v8, %v496_v9 }
  0xe5   :  { %2706 = vmatprep.subr.bf16.mxu1 %v7627_v28  ;;  %v408_v28 = vld [vmem:[#allocation5 + $0x7e8] sm:$0xff] }
  0xe6   :  { %2616 = vmatmul.mubr.bf16.vlgmr.msra.gmra.mxu0 %v8566_v31  ;;  %v7562_v40 = vcombine.low %v404_v26, %v408_v28  ;;  %v488_v18 = vld [vmem:[#allocation5 + $0xa68] sm:$0xff] }
  0xe7   :  { %2657 = vmatmul.mubr.bf16.vlgmr.msra.gmra.mxu1 %v8556_v16  ;;  %2666 = vmatpush1.bf16.msra.mxu0 %v7498_v34  ;;  %v7563_v34 = vcombine.high %v404_v26, %v408_v28  ;;  %v476_v26 = vld [vmem:[#allocation5 + $0xa08] sm:$0xff] }
  0xe8   :  { %2707 = vmatpush1.bf16.msra.mxu1 %v7626_v35  ;;  %2667 = vmatprep.subr.bf16.mxu0 %v7491_v36  ;;  %v7691_v35 = vcombine.high %v532_v29, %v536_v30  ;;  %v396_v36 = vld [vmem:[#allocation5 + $0x788] sm:$0xff]  ;;  %v7642_v30 = vcombine.low %v484_v17, %v488_v18 }
  0xe9   :  { %2708 = vmatprep.subr.bf16.mxu1 %v7619_v37  ;;  %2697 = vmatprep.mubr.bf16.mxu0 %v8552_v59  ;;  %v400_v37 = vld [vmem:[#allocation5 + $0x7a8] sm:$0xff] }
  0xea   :  { %2738 = vmatprep.mubr.bf16.mxu1 %v8560_v27  ;;  %v7554_v48 = vcombine.low %v396_v36, %v400_v37  ;;  %v480_v28 = vld [vmem:[#allocation5 + $0xa28] sm:$0xff] }
  0xeb   :  { %2668 = vmatpush1.bf16.msra.mxu0 %v7490_v42  ;;  %v7555_v42 = vcombine.high %v396_v36, %v400_v37  ;;  %v341_v36 = vld [vmem:[#allocation5 + $0x5d0] sm:$0xff] }
  0xec   :  { %2709 = vmatpush1.bf16.msra.mxu1 %v7618_v43  ;;  %2669 = vmatprep.subr.bf16.mxu0 %v7483_v44  ;;  %v7683_v43 = vcombine.high %v524_v38, %v528_v39  ;;  %v388_v44 = vld [vmem:[#allocation5 + $0x748] sm:$0xff]  ;;  %v345_v37 = vld [vmem:[#allocation5 + $0x5f0] sm:$0xff]  ;;  %v7634_v39 = vcombine.low %v476_v26, %v480_v28 }
  0xed   :  { %2710 = vmatprep.subr.bf16.mxu1 %v7611_v45  ;;  %v392_v45 = vld [vmem:[#allocation5 + $0x768] sm:$0xff] }
  0xee   :  { %v7546_v56 = vcombine.low %v388_v44, %v392_v45 }
  0xef   :  { %2670 = vmatpush1.bf16.msra.mxu0 %v7482_v50  ;;  %v7547_v50 = vcombine.high %v388_v44, %v392_v45  ;;  %v333_v44 = vld [vmem:[#allocation5 + $0x590] sm:$0xff] }
  0xf0   :  { %2711 = vmatpush1.bf16.msra.mxu1 %v7610_v51  ;;  %2671 = vmatprep.subr.bf16.mxu0 %v7475_v52  ;;  %v7675_v51 = vcombine.high %v516_v46, %v520_v47  ;;  %v380_v52 = vld [vmem:[#allocation5 + $0x708] sm:$0xff]  ;;  %v337_v45 = vld [vmem:[#allocation5 + $0x5b0] sm:$0xff]  ;;  %v7500_v47 = vcombine.low %v341_v36, %v345_v37 }
  0xf1   :  { %2712 = vmatprep.subr.bf16.mxu1 %v7603_v53  ;;  %v384_v53 = vld [vmem:[#allocation5 + $0x728] sm:$0xff] }
  0xf2   :  { %v7538_v2 = vcombine.low %v380_v52, %v384_v53 }
  0xf3   :  { %2672 = vmatpush1.bf16.msra.mxu0 %v7474_v60  ;;  %v7539_v60 = vcombine.high %v380_v52, %v384_v53  ;;  %v325_v52 = vld [vmem:[#allocation5 + $0x550] sm:$0xff] }
  0xf4   :  { %2713 = vmatpush1.bf16.msra.mxu1 %v7602_v61  ;;  %2673 = vmatprep.subr.bf16.mxu0 %v7467_v62  ;;  %v7667_v61 = vcombine.high %v508_v54, %v512_v55  ;;  %v372_v62 = vld [vmem:[#allocation5 + $0x6c8] sm:$0xff]  ;;  %v329_v53 = vld [vmem:[#allocation5 + $0x570] sm:$0xff]  ;;  %v7492_v55 = vcombine.low %v333_v44, %v337_v45 }
  0xf5   :  { %2714 = vmatprep.subr.bf16.mxu1 %v7595_v63  ;;  %v376_v63 = vld [vmem:[#allocation5 + $0x6e8] sm:$0xff] }
  0xf6   :  { %v7530_v10 = vcombine.low %v372_v62, %v376_v63 }
  0xf7   :  { %2674 = vmatpush1.bf16.msra.mxu0 %v7466_v4  ;;  %v7531_v4 = vcombine.high %v372_v62, %v376_v63  ;;  %v317_v62 = vld [vmem:[#allocation5 + $0x510] sm:$0xff] }
  0xf8   :  { %2715 = vmatpush1.bf16.msra.mxu1 %v7594_v5  ;;  %2675 = vmatprep.subr.bf16.mxu0 %v7459_v6  ;;  %v7659_v5 = vcombine.high %v500_v0, %v504_v1  ;;  %v364_v6 = vld [vmem:[#allocation5 + $0x688] sm:$0xff]  ;;  %v321_v63 = vld [vmem:[#allocation5 + $0x530] sm:$0xff]  ;;  %v7484_v1 = vcombine.low %v325_v52, %v329_v53 }
  0xf9   :  { %2716 = vmatprep.subr.bf16.mxu1 %v7587_v7  ;;  %v368_v7 = vld [vmem:[#allocation5 + $0x6a8] sm:$0xff] }
  0xfa   :  { %v7522_v19 = vcombine.low %v364_v6, %v368_v7 }
  0xfb   :  { %2676 = vmatpush1.bf16.msra.mxu0 %v7458_v12  ;;  %v7523_v12 = vcombine.high %v364_v6, %v368_v7  ;;  %v309_v6 = vld [vmem:[#allocation5 + $0x4d0] sm:$0xff] }
  0xfc   :  { %2717 = vmatpush1.bf16.msra.mxu1 %v7586_v13  ;;  %2677 = vmatprep.subr.bf16.mxu0 %v7451_v14  ;;  %v7651_v13 = vcombine.high %v492_v8, %v496_v9  ;;  %v356_v14 = vld [vmem:[#allocation5 + $0x648] sm:$0xff]  ;;  %v313_v7 = vld [vmem:[#allocation5 + $0x4f0] sm:$0xff]  ;;  %v7476_v9 = vcombine.low %v317_v62, %v321_v63 }
  0xfd   :  { %2718 = vmatprep.subr.bf16.mxu1 %v7579_v15  ;;  %v360_v15 = vld [vmem:[#allocation5 + $0x668] sm:$0xff] }
  0xfe   :  { %v7514_v29 = vcombine.low %v356_v14, %v360_v15 }
  0xff   :  { %2678 = vmatpush1.bf16.msra.mxu0 %v7450_v22  ;;  %v7515_v22 = vcombine.high %v356_v14, %v360_v15  ;;  %v301_v14 = vld [vmem:[#allocation5 + $0x490] sm:$0xff] }
 0x100   :  { %2719 = vmatpush1.bf16.msra.mxu1 %v7578_v23  ;;  %2679 = vmatprep.subr.bf16.mxu0 %v7443_v24  ;;  %v7643_v23 = vcombine.high %v484_v17, %v488_v18  ;;  %v348_v24 = vld [vmem:[#allocation5 + $0x608] sm:$0xff]  ;;  %v305_v15 = vld [vmem:[#allocation5 + $0x4b0] sm:$0xff]  ;;  %v7468_v18 = vcombine.low %v309_v6, %v313_v7 }
 0x101   :  { %2720 = vmatprep.subr.bf16.mxu1 %v7571_v25  ;;  %v352_v25 = vld [vmem:[#allocation5 + $0x628] sm:$0xff] }
 0x102   :  { %v7506_v38 = vcombine.low %v348_v24, %v352_v25 }
 0x103   :  { %2680 = vmatpush1.bf16.msra.mxu0 %v7442_v32  ;;  %v7507_v32 = vcombine.high %v348_v24, %v352_v25  ;;  %v293_v24 = vld [vmem:[#allocation5 + $0x450] sm:$0xff] }
 0x104   :  { %2721 = vmatpush1.bf16.msra.mxu1 %v7570_v33  ;;  %2681 = vmatprep.subr.bf16.mxu0 %v7563_v34  ;;  %v7635_v33 = vcombine.high %v476_v26, %v480_v28  ;;  %v213_v34 = vld [vmem:[#allocation5 + $0x1d0] sm:$0xff]  ;;  %v7460_v28 = vcombine.low %v301_v14, %v305_v15 }
 0x105   :  { %2722 = vmatprep.subr.bf16.mxu1 %v7691_v35  ;;  %v217_v35 = vld [vmem:[#allocation5 + $0x1f0] sm:$0xff] }
 0x106   :  { %v7372_v46 = vcombine.low %v213_v34, %v217_v35  ;;  %v297_v25 = vld [vmem:[#allocation5 + $0x470] sm:$0xff] }
 0x107   :  { %2682 = vmatpush2.bf16.msra.mxu0 %v7562_v40  ;;  %v7373_v40 = vcombine.high %v213_v34, %v217_v35  ;;  %v285_v34 = vld [vmem:[#allocation5 + $0x410] sm:$0xff] }
 0x108   :  { %2723 = vmatpush2.bf16.msra.mxu1 %v7690_v41  ;;  %2683 = vmatprep.subr.bf16.mxu0 %v7555_v42  ;;  %v7501_v41 = vcombine.high %v341_v36, %v345_v37  ;;  %v205_v42 = vld [vmem:[#allocation5 + $0x190] sm:$0xff]  ;;  %v7452_v37 = vcombine.low %v293_v24, %v297_v25 }
 0x109   :  { %2724 = vmatprep.subr.bf16.mxu1 %v7683_v43  ;;  %v209_v43 = vld [vmem:[#allocation5 + $0x1b0] sm:$0xff] }
 0x10a   :  { %v7364_v54 = vcombine.low %v205_v42, %v209_v43  ;;  %v289_v35 = vld [vmem:[#allocation5 + $0x430] sm:$0xff] }
 0x10b   :  { %2684 = vmatpush2.bf16.msra.mxu0 %v7554_v48  ;;  %v7365_v48 = vcombine.high %v205_v42, %v209_v43  ;;  %v405_v42 = vld [vmem:[#allocation5 + $0x7d0] sm:$0xff] }
 0x10c   :  { %2725 = vmatpush2.bf16.msra.mxu1 %v7682_v49  ;;  %2685 = vmatprep.subr.bf16.mxu0 %v7547_v50  ;;  %v7493_v49 = vcombine.high %v333_v44, %v337_v45  ;;  %v197_v50 = vld [vmem:[#allocation5 + $0x150] sm:$0xff]  ;;  %v7444_v45 = vcombine.low %v285_v34, %v289_v35 }
 0x10d   :  { %2726 = vmatprep.subr.bf16.mxu1 %v7675_v51  ;;  %v201_v51 = vld [vmem:[#allocation5 + $0x170] sm:$0xff] }
 0x10e   :  { %v7356_v0 = vcombine.low %v197_v50, %v201_v51  ;;  %v409_v43 = vld [vmem:[#allocation5 + $0x7f0] sm:$0xff] }
 0x10f   :  { %2686 = vmatpush2.bf16.msra.mxu0 %v7546_v56  ;;  %v7357_v56 = vcombine.high %v197_v50, %v201_v51  ;;  %v397_v50 = vld [vmem:[#allocation5 + $0x790] sm:$0xff] }
 0x110   :  { %2727 = vmatpush2.bf16.msra.mxu1 %v7674_v57  ;;  %2687 = vmatprep.subr.bf16.mxu0 %v7539_v60  ;;  %v7485_v57 = vcombine.high %v325_v52, %v329_v53  ;;  %v189_v60 = vld [vmem:[#allocation5 + $0x110] sm:$0xff]  ;;  %v7564_v53 = vcombine.low %v405_v42, %v409_v43 }
 0x111   :  { %2728 = vmatprep.subr.bf16.mxu1 %v7667_v61  ;;  %v193_v61 = vld [vmem:[#allocation5 + $0x130] sm:$0xff] }
 0x112   :  { %v7348_v8 = vcombine.low %v189_v60, %v193_v61  ;;  %v401_v51 = vld [vmem:[#allocation5 + $0x7b0] sm:$0xff] }
 0x113   :  { %2688 = vmatpush2.bf16.msra.mxu0 %v7538_v2  ;;  %v7349_v2 = vcombine.high %v189_v60, %v193_v61  ;;  %v389_v60 = vld [vmem:[#allocation5 + $0x750] sm:$0xff] }
 0x114   :  { %2729 = vmatpush2.bf16.msra.mxu1 %v7666_v3  ;;  %2689 = vmatprep.subr.bf16.mxu0 %v7531_v4  ;;  %v7477_v3 = vcombine.high %v317_v62, %v321_v63  ;;  %v181_v4 = vld [vmem:[#allocation5 + $0xd0] sm:$0xff]  ;;  %v7556_v63 = vcombine.low %v397_v50, %v401_v51 }
 0x115   :  { %2730 = vmatprep.subr.bf16.mxu1 %v7659_v5  ;;  %v185_v5 = vld [vmem:[#allocation5 + $0xf0] sm:$0xff] }
 0x116   :  { %v7340_v17 = vcombine.low %v181_v4, %v185_v5  ;;  %v393_v61 = vld [vmem:[#allocation5 + $0x770] sm:$0xff] }
 0x117   :  { %2690 = vmatpush2.bf16.msra.mxu0 %v7530_v10  ;;  %v7341_v10 = vcombine.high %v181_v4, %v185_v5  ;;  %v381_v4 = vld [vmem:[#allocation5 + $0x710] sm:$0xff] }
 0x118   :  { %2731 = vmatpush2.bf16.msra.mxu1 %v7658_v11  ;;  %2691 = vmatprep.subr.bf16.mxu0 %v7523_v12  ;;  %v7469_v11 = vcombine.high %v309_v6, %v313_v7  ;;  %v173_v12 = vld [vmem:[#allocation5 + $0x90] sm:$0xff]  ;;  %v7548_v7 = vcombine.low %v389_v60, %v393_v61 }
 0x119   :  { %2732 = vmatprep.subr.bf16.mxu1 %v7651_v13  ;;  %v177_v13 = vld [vmem:[#allocation5 + $0xb0] sm:$0xff] }
 0x11a   :  { %v7332_v26 = vcombine.low %v173_v12, %v177_v13  ;;  %v385_v5 = vld [vmem:[#allocation5 + $0x730] sm:$0xff] }
 0x11b   :  { %2692 = vmatpush2.bf16.msra.mxu0 %v7522_v19  ;;  %v7333_v19 = vcombine.high %v173_v12, %v177_v13  ;;  %v373_v12 = vld [vmem:[#allocation5 + $0x6d0] sm:$0xff] }
 0x11c   :  { %2733 = vmatpush2.bf16.msra.mxu1 %v7650_v21  ;;  %2693 = vmatprep.subr.bf16.mxu0 %v7515_v22  ;;  %v7461_v21 = vcombine.high %v301_v14, %v305_v15  ;;  %v165_v22 = vld [vmem:[#allocation5 + $0x50] sm:$0xff]  ;;  %v7540_v15 = vcombine.low %v381_v4, %v385_v5 }
 0x11d   :  { %2734 = vmatprep.subr.bf16.mxu1 %v7643_v23  ;;  %v169_v23 = vld [vmem:[#allocation5 + $0x70] sm:$0xff] }
 0x11e   :  { %v7324_v36 = vcombine.low %v165_v22, %v169_v23  ;;  %v377_v13 = vld [vmem:[#allocation5 + $0x6f0] sm:$0xff] }
 0x11f   :  { %2694 = vmatpush2.bf16.msra.mxu0 %v7514_v29  ;;  %v7325_v29 = vcombine.high %v165_v22, %v169_v23  ;;  %v365_v22 = vld [vmem:[#allocation5 + $0x690] sm:$0xff] }
 0x120   :  { %2735 = vmatpush2.bf16.msra.mxu1 %v7642_v30  ;;  %2695 = vmatprep.subr.bf16.mxu0 %v7507_v32  ;;  %v7453_v30 = vcombine.high %v293_v24, %v297_v25  ;;  %v157_v32 = vld [vmem:[#allocation5 + $0x10] sm:$0xff]  ;;  %v7532_v25 = vcombine.low %v373_v12, %v377_v13 }
 0x121   :  { %2736 = vmatprep.subr.bf16.mxu1 %v7635_v33  ;;  %v161_v33 = vld [vmem:[#allocation5 + $0x30] sm:$0xff] }
 0x122   :  { %v7316_v44 = vcombine.low %v157_v32, %v161_v33  ;;  %v369_v23 = vld [vmem:[#allocation5 + $0x6b0] sm:$0xff] }
 0x123   :  { %2696 = vmatpush2.bf16.msra.mxu0 %v7506_v38  ;;  %v7317_v38 = vcombine.high %v157_v32, %v161_v33  ;;  %v357_v32 = vld [vmem:[#allocation5 + $0x650] sm:$0xff] }
 0x124   :  { %2737 = vmatpush2.bf16.msra.mxu1 %v7634_v39  ;;  %2747 = vmatprep.subr.bf16.mxu0 %v7373_v40  ;;  %v7445_v39 = vcombine.high %v285_v34, %v289_v35  ;;  %v277_v40 = vld [vmem:[#allocation5 + $0x3d0] sm:$0xff]  ;;  %v541_v35 = vlaneseq }
 0x125   :  { %2788 = vmatprep.subr.bf16.mxu1 %v7501_v41  ;;  %v281_v41 = vld [vmem:[#allocation5 + $0x3f0] sm:$0xff] }
 0x126   :  { %2698 = vmatmul.mubr.bf16.vlgmr.msra.gmra.mxu0 %v8558_v20  ;;  %v7436_v52 = vcombine.low %v277_v40, %v281_v41  ;;  %v361_v33 = vld [vmem:[#allocation5 + $0x670] sm:$0xff] }
 0x127   :  { %2739 = vmatmul.mubr.bf16.vlgmr.msra.gmra.mxu1 %v8566_v31  ;;  %2748 = vmatpush1.bf16.msra.mxu0 %v7372_v46  ;;  %v7437_v46 = vcombine.high %v277_v40, %v281_v41  ;;  %v225_v40 = vld [vmem:[#allocation5 + $0x230] sm:$0xff] }
 0x128   :  { %2789 = vmatpush1.bf16.msra.mxu1 %v7500_v47  ;;  %2749 = vmatprep.subr.bf16.mxu0 %v7365_v48  ;;  %v7565_v47 = vcombine.high %v405_v42, %v409_v43  ;;  %v269_v48 = vld [vmem:[#allocation5 + $0x390] sm:$0xff] }
 0x129   :  { %2790 = vmatprep.subr.bf16.mxu1 %v7493_v49  ;;  %2779 = vmatprep.mubr.bf16.mxu0 %v8550_v58  ;;  %v273_v49 = vld [vmem:[#allocation5 + $0x3b0] sm:$0xff] }
 0x12a   :  { %2820 = vmatprep.mubr.bf16.mxu1 %v8552_v59  ;;  %v7428_v62 = vcombine.low %v269_v48, %v273_v49  ;;  %v349_v41 = vld [vmem:[#allocation5 + $0x610] sm:$0xff] }
 0x12b   :  { %2750 = vmatpush1.bf16.msra.mxu0 %v7364_v54  ;;  %v7429_v54 = vcombine.high %v269_v48, %v273_v49  ;;  %v353_v42 = vld [vmem:[#allocation5 + $0x630] sm:$0xff] }
 0x12c   :  { %2791 = vmatpush1.bf16.msra.mxu1 %v7492_v55  ;;  %2751 = vmatprep.subr.bf16.mxu0 %v7357_v56  ;;  %v7557_v55 = vcombine.high %v397_v50, %v401_v51  ;;  %v261_v56 = vld [vmem:[#allocation5 + $0x350] sm:$0xff]  ;;  %v214_v50 = vld [vmem:[#allocation5 + $0x1d8] sm:$0xff] }
 0x12d   :  { %2792 = vmatprep.subr.bf16.mxu1 %v7485_v57  ;;  %v265_v57 = vld [vmem:[#allocation5 + $0x370] sm:$0xff]  ;;  %v218_v51 = vld [vmem:[#allocation5 + $0x1f8] sm:$0xff] }
 0x12e   :  { %v7420_v6 = vcombine.low %v261_v56, %v265_v57  ;;  %v469_v48 = vld [vmem:[#allocation5 + $0x9d0] sm:$0xff] }
 0x12f   :  { %2752 = vmatpush1.bf16.msra.mxu0 %v7356_v0  ;;  %v7421_v0 = vcombine.high %v261_v56, %v265_v57  ;;  %v473_v49 = vld [vmem:[#allocation5 + $0x9f0] sm:$0xff]  ;;  %v7375_v57 = vcombine.high %v214_v50, %v218_v51 }
 0x130   :  { %2793 = vmatpush1.bf16.msra.mxu1 %v7484_v1  ;;  %2753 = vmatprep.subr.bf16.mxu0 %v7349_v2  ;;  %v7549_v1 = vcombine.high %v389_v60, %v393_v61  ;;  %v253_v2 = vld [vmem:[#allocation5 + $0x310] sm:$0xff]  ;;  %v7629_v56 = vcombine.high %v469_v48, %v473_v49 }
 0x131   :  { %2794 = vmatprep.subr.bf16.mxu1 %v7477_v3  ;;  %v257_v3 = vld [vmem:[#allocation5 + $0x330] sm:$0xff] }
 0x132   :  { %v7412_v14 = vcombine.low %v253_v2, %v257_v3  ;;  %v461_v61 = vld [vmem:[#allocation5 + $0x990] sm:$0xff] }
 0x133   :  { %2754 = vmatpush1.bf16.msra.mxu0 %v7348_v8  ;;  %v7413_v8 = vcombine.high %v253_v2, %v257_v3  ;;  %v7628_v2 = vcombine.low %v469_v48, %v473_v49  ;;  %v7374_v3 = vcombine.low %v214_v50, %v218_v51  ;;  %v433_v48 = vld [vmem:[#allocation5 + $0x8b0] sm:$0xff]  ;;  %v174_v49 = vld [vmem:[#allocation5 + $0x98] sm:$0xff] }
 0x134   :  { %2795 = vmatpush1.bf16.msra.mxu1 %v7476_v9  ;;  %2755 = vmatprep.subr.bf16.mxu0 %v7341_v10  ;;  %v7541_v9 = vcombine.high %v381_v4, %v385_v5  ;;  %v245_v10 = vld [vmem:[#allocation5 + $0x2d0] sm:$0xff]  ;;  %v178_v50 = vld [vmem:[#allocation5 + $0xb8] sm:$0xff] }
 0x135   :  { %2796 = vmatprep.subr.bf16.mxu1 %v7469_v11  ;;  %v249_v11 = vld [vmem:[#allocation5 + $0x2f0] sm:$0xff] }
 0x136   :  { %v7404_v24 = vcombine.low %v245_v10, %v249_v11 }
 0x137   :  { %2756 = vmatpush1.bf16.msra.mxu0 %v7340_v17  ;;  %v7405_v17 = vcombine.high %v245_v10, %v249_v11  ;;  %v198_v10 = vld [vmem:[#allocation5 + $0x158] sm:$0xff] }
 0x138   :  { %2797 = vmatpush1.bf16.msra.mxu1 %v7468_v18  ;;  %2757 = vmatprep.subr.bf16.mxu0 %v7333_v19  ;;  %v7533_v18 = vcombine.high %v373_v12, %v377_v13  ;;  %v237_v19 = vld [vmem:[#allocation5 + $0x290] sm:$0xff]  ;;  %v202_v11 = vld [vmem:[#allocation5 + $0x178] sm:$0xff] }
 0x139   :  { %2798 = vmatprep.subr.bf16.mxu1 %v7461_v21  ;;  %v241_v21 = vld [vmem:[#allocation5 + $0x2b0] sm:$0xff] }
 0x13a   :  { %v7396_v34 = vcombine.low %v237_v19, %v241_v21 }
 0x13b   :  { %2758 = vmatpush1.bf16.msra.mxu0 %v7332_v26  ;;  %v7397_v26 = vcombine.high %v237_v19, %v241_v21 }
 0x13c   :  { %2799 = vmatpush1.bf16.msra.mxu1 %v7460_v28  ;;  %2759 = vmatprep.subr.bf16.mxu0 %v7325_v29  ;;  %v7525_v28 = vcombine.high %v365_v22, %v369_v23  ;;  %v229_v29 = vld [vmem:[#allocation5 + $0x250] sm:$0xff] }
 0x13d   :  { %2800 = vmatprep.subr.bf16.mxu1 %v7453_v30  ;;  %v233_v30 = vld [vmem:[#allocation5 + $0x270] sm:$0xff] }
 0x13e   :  { %v7388_v43 = vcombine.low %v229_v29, %v233_v30 }
 0x13f   :  { %2760 = vmatpush1.bf16.msra.mxu0 %v7324_v36  ;;  %v7524_v36 = vcombine.low %v365_v22, %v369_v23  ;;  %v7359_v23 = vcombine.high %v198_v10, %v202_v11 }
 0x140   :  { %2801 = vmatpush1.bf16.msra.mxu1 %v7452_v37  ;;  %2761 = vmatprep.subr.bf16.mxu0 %v7317_v38  ;;  %v7389_v37 = vcombine.high %v229_v29, %v233_v30  ;;  %v7517_v38 = vcombine.high %v357_v32, %v361_v33  ;;  %v194_v29 = vld [vmem:[#allocation5 + $0x138] sm:$0xff] }
 0x141   :  { %2802 = vmatprep.subr.bf16.mxu1 %v7445_v39  ;;  %v221_v39 = vld [vmem:[#allocation5 + $0x210] sm:$0xff] }
 0x143   :  { %2762 = vmatpush1.bf16.msra.mxu0 %v7316_v44  ;;  %v8576_v44 = vshrl.u32 %v541_v35, 7  ;;  %v7358_v35 = vcombine.low %v198_v10, %v202_v11 }
 0x144   :  { %2803 = vmatpush1.bf16.msra.mxu1 %v7444_v45  ;;  %2763 = vmatprep.subr.bf16.mxu0 %v7437_v46  ;;  %v7516_v45 = vcombine.low %v357_v32, %v361_v33  ;;  %v7381_v46 = vcombine.high %v221_v39, %v225_v40 }
 0x145   :  { %2804 = vmatprep.subr.bf16.mxu1 %v7565_v47  ;;  %v7509_v47 = vcombine.high %v349_v41, %v353_v42  ;;  %v8584_v60 = vsub.s32 1, %v8576_v44 }
 0x147   :  { %2764 = vmatpush2.bf16.msra.mxu0 %v7436_v52  ;;  %v7380_v52 = vcombine.low %v221_v39, %v225_v40  ;;  %v437_v39 = vld [vmem:[#allocation5 + $0x8d0] sm:$0xff] }
 0x148   :  { %2805 = vmatpush2.bf16.msra.mxu1 %v7564_v53  ;;  %2765 = vmatprep.subr.bf16.mxu0 %v7429_v54  ;;  %v8579_v53 = vsub.s32 0, %v8576_v44  ;;  %v7508_v54 = vcombine.low %v349_v41, %v353_v42  ;;  %v441_v40 = vld [vmem:[#allocation5 + $0x8f0] sm:$0xff]  ;;  %v182_v41 = vld [vmem:[#allocation5 + $0xd8] sm:$0xff] }
 0x149   :  { %2806 = vmatprep.subr.bf16.mxu1 %v7557_v55  ;;  %v8581_v55 = vld [vmem:[#allocation7] sm:$0xff]  ;;  %v186_v42 = vld [vmem:[#allocation5 + $0xf8] sm:$0xff]  ;;  %v7596_v51 = vcombine.low %v437_v39, %v441_v40 }
 0x14a   :  { %v548_v5 = vrot.slane %v8581_v55, %v8584_v60 }
 0x14b   :  { %2766 = vmatpush2.bf16.msra.mxu0 %v7428_v62  ;;  %v465_v62 = vld [vmem:[#allocation5 + $0x9b0] sm:$0xff] }
 0x14c   :  { %2807 = vmatpush2.bf16.msra.mxu1 %v7556_v63  ;;  %2767 = vmatprep.subr.bf16.mxu0 %v7421_v0  ;;  %v206_v63 = vld [vmem:[#allocation5 + $0x198] sm:$0xff]  ;;  %v7621_v4 = vcombine.high %v461_v61, %v465_v62 }
 0x14d   :  { %2808 = vmatprep.subr.bf16.mxu1 %v7549_v1  ;;  %v210_v0 = vld [vmem:[#allocation5 + $0x1b8] sm:$0xff]  ;;  %v544_v1 = vrot.slane %v8581_v55, %v8579_v53 }
 0x14f   :  { %2768 = vmatpush2.bf16.msra.mxu0 %v7420_v6  ;;  %v7367_v6 = vcombine.high %v206_v63, %v210_v0 }
 0x150   :  { %2809 = vmatpush2.bf16.msra.mxu1 %v7548_v7  ;;  %2769 = vmatprep.subr.bf16.mxu0 %v7413_v8  ;;  %v453_v7 = vld [vmem:[#allocation5 + $0x950] sm:$0xff] }
 0x151   :  { %2810 = vmatprep.subr.bf16.mxu1 %v7541_v9  ;;  %v457_v8 = vld [vmem:[#allocation5 + $0x970] sm:$0xff] }
 0x152   :  { %v7612_v33 = vcombine.low %v453_v7, %v457_v8 }
 0x153   :  { %2770 = vmatpush2.bf16.msra.mxu0 %v7412_v14  ;;  %v7620_v14 = vcombine.low %v461_v61, %v465_v62  ;;  %v425_v61 = vld [vmem:[#allocation5 + $0x870] sm:$0xff]  ;;  %v166_v62 = vld [vmem:[#allocation5 + $0x58] sm:$0xff] }
 0x154   :  { %2811 = vmatpush2.bf16.msra.mxu1 %v7540_v15  ;;  %2771 = vmatprep.subr.bf16.mxu0 %v7405_v17  ;;  %v7366_v17 = vcombine.low %v206_v63, %v210_v0  ;;  %v170_v63 = vld [vmem:[#allocation5 + $0x78] sm:$0xff] }
 0x155   :  { %2812 = vmatprep.subr.bf16.mxu1 %v7533_v18  ;;  %v7613_v18 = vcombine.high %v453_v7, %v457_v8  ;;  %v162_v7 = vld [vmem:[#allocation5 + $0x38] sm:$0xff] }
 0x157   :  { %2772 = vmatpush2.bf16.msra.mxu0 %v7404_v24  ;;  %v445_v24 = vld [vmem:[#allocation5 + $0x910] sm:$0xff] }
 0x158   :  { %2813 = vmatpush2.bf16.msra.mxu1 %v7532_v25  ;;  %2773 = vmatprep.subr.bf16.mxu0 %v7397_v26  ;;  %v449_v25 = vld [vmem:[#allocation5 + $0x930] sm:$0xff] }
 0x159   :  { %2814 = vmatprep.subr.bf16.mxu1 %v7525_v28  ;;  %v190_v28 = vld [vmem:[#allocation5 + $0x118] sm:$0xff] }
 0x15b   :  { %2774 = vmatpush2.bf16.msra.mxu0 %v7396_v34 }
 0x15c   :  { %2815 = vmatpush2.bf16.msra.mxu1 %v7524_v36  ;;  %2775 = vmatprep.subr.bf16.mxu0 %v7389_v37  ;;  %v7605_v36 = vcombine.high %v445_v24, %v449_v25 }
 0x15d   :  { %2816 = vmatprep.subr.bf16.mxu1 %v7517_v38  ;;  %v7351_v38 = vcombine.high %v190_v28, %v194_v29 }
 0x15f   :  { %2776 = vmatpush2.bf16.msra.mxu0 %v7388_v43  ;;  %v7604_v43 = vcombine.low %v445_v24, %v449_v25  ;;  %v529_v24 = vld [vmem:[#allocation5 + $0xbb0] sm:$0xff]  ;;  %v270_v25 = vld [vmem:[#allocation5 + $0x398] sm:$0xff] }
 0x160   :  { %2817 = vmatpush2.bf16.msra.mxu1 %v7516_v45  ;;  %2777 = vmatprep.subr.bf16.mxu0 %v7381_v46  ;;  %v7597_v45 = vcombine.high %v437_v39, %v441_v40  ;;  %v7343_v46 = vcombine.high %v182_v41, %v186_v42 }
 0x161   :  { %2818 = vmatprep.subr.bf16.mxu1 %v7509_v47  ;;  %v429_v47 = vld [vmem:[#allocation5 + $0x890] sm:$0xff] }
 0x162   :  { %v7588_v0 = vcombine.low %v429_v47, %v433_v48 }
 0x163   :  { %2778 = vmatpush2.bf16.msra.mxu0 %v7380_v52  ;;  %v7342_v52 = vcombine.low %v182_v41, %v186_v42  ;;  %v509_v42 = vld [vmem:[#allocation5 + $0xb10] sm:$0xff] }
 0x164   :  { %2819 = vmatpush2.bf16.msra.mxu1 %v7508_v54  ;;  %2829 = vmatprep.subr.bf16.mxu0 %v7629_v56  ;;  %v7589_v54 = vcombine.high %v429_v47, %v433_v48  ;;  %v7335_v56 = vcombine.high %v174_v49, %v178_v50 }
 0x165   :  { %2870 = vmatprep.subr.bf16.mxu1 %v7375_v57  ;;  %v421_v57 = vld [vmem:[#allocation5 + $0x850] sm:$0xff] }
 0x166   :  { %v2535_v9 = vpop.f32.mrf.mxu0  ;;  %2780 = vmatmul.mubr.bf16.vlgmr.msra.gmra.mxu0 %v8556_v16  ;;  %v7580_v8 = vcombine.low %v421_v57, %v425_v61 }
 0x167   :  { %v2536_v12 = vadd.f32 %v2535_v9, %v544_v1  ;;  %v2576_v13 = vpop.f32.mrf.mxu1  ;;  %2821 = vmatmul.mubr.bf16.vlgmr.msra.gmra.mxu1 %v8558_v20  ;;  %2830 = vmatpush1.bf16.msra.mxu0 %v7628_v2  ;;  %v7334_v1 = vcombine.low %v174_v49, %v178_v50  ;;  %v7581_v2 = vcombine.high %v421_v57, %v425_v61  ;;  %v501_v50 = vld [vmem:[#allocation5 + $0xad0] sm:$0xff] }
 0x168   :  { %2871 = vmatpush1.bf16.msra.mxu1 %v7374_v3  ;;  %v2537_v15 = vpop.f32.mrf.mxu0  ;;  %2831 = vmatprep.subr.bf16.mxu0 %v7621_v4  ;;  %v7327_v3 = vcombine.high %v166_v62, %v170_v63  ;;  %v413_v4 = vld [vmem:[#allocation5 + $0x810] sm:$0xff]  ;;  %v7326_v9 = vcombine.low %v166_v62, %v170_v63 }
 0x169   :  { %v8592_v19 = vadd.f32 %v2576_v13, %v2536_v12  ;;  %v2538_v21 = vadd.f32 %v2537_v15, %v548_v5  ;;  %v2578_v22 = vpop.f32.mrf.mxu1  ;;  %2872 = vmatprep.subr.bf16.mxu1 %v7367_v6  ;;  %2861 = vmatprep.mubr.bf16.mxu0 %v8560_v27  ;;  %v417_v5 = vld [vmem:[#allocation5 + $0x830] sm:$0xff]  ;;  %v158_v6 = vld [vmem:[#allocation5 + $0x18] sm:$0xff] }
 0x16a   :  { %v2539_v26 = vpop.f32.mrf.mxu0  ;;  %2902 = vmatprep.mubr.bf16.mxu1 %v8550_v58  ;;  %v7350_v58 = vcombine.low %v190_v28, %v194_v29  ;;  %v7573_v10 = vcombine.high %v413_v4, %v417_v5  ;;  %v7319_v11 = vcombine.high %v158_v6, %v162_v7  ;;  %v533_v12 = vld [vmem:[#allocation5 + $0xbd0] sm:$0xff]  ;;  %v282_v15 = vld [vmem:[#allocation5 + $0x3f8] sm:$0xff] }
 0x16b   :  { %v8596_v30 = vadd.f32 %v2578_v22, %v2538_v21  ;;  %v2580_v32 = vpop.f32.mrf.mxu1  ;;  %2832 = vmatpush1.bf16.msra.mxu0 %v7620_v14  ;;  %v537_v13 = vld [vmem:[#allocation5 + $0xbf0] sm:$0xff]  ;;  %v278_v14 = vld [vmem:[#allocation5 + $0x3d8] sm:$0xff] }
 0x16c   :  { %2873 = vmatpush1.bf16.msra.mxu1 %v7366_v17  ;;  %v2540_v34 = vpop.f32.mrf.mxu0  ;;  %2833 = vmatprep.subr.bf16.mxu0 %v7613_v18  ;;  %v7572_v17 = vcombine.low %v413_v4, %v417_v5  ;;  %v7318_v18 = vcombine.low %v158_v6, %v162_v7  ;;  %v7693_v21 = vcombine.high %v533_v12, %v537_v13  ;;  %v274_v26 = vld [vmem:[#allocation5 + $0x3b8] sm:$0xff]  ;;  %v493_v63 = vld [vmem:[#allocation5 + $0xa90] sm:$0xff] }
 0x16d   :  { %v2581_v37 = vpop.f32.mrf.mxu1  ;;  %2874 = vmatprep.subr.bf16.mxu1 %v7359_v23  ;;  %v7439_v22 = vcombine.high %v278_v14, %v282_v15  ;;  %v525_v23 = vld [vmem:[#allocation5 + $0xb90] sm:$0xff]  ;;  %v7692_v28 = vcombine.low %v533_v12, %v537_v13  ;;  %v7438_v29 = vcombine.low %v278_v14, %v282_v15  ;;  %v7430_v39 = vcombine.low %v270_v25, %v274_v26 }
 0x16e   :  { %v7685_v32 = vcombine.high %v525_v23, %v529_v24  ;;  %v517_v34 = vld [vmem:[#allocation5 + $0xb50] sm:$0xff]  ;;  %v266_v37 = vld [vmem:[#allocation5 + $0x378] sm:$0xff] }
 0x16f   :  { %2834 = vmatpush1.bf16.msra.mxu0 %v7612_v33  ;;  %v7431_v33 = vcombine.high %v270_v25, %v274_v26  ;;  %v485_v7 = vld [vmem:[#allocation5 + $0xa50] sm:$0xff]  ;;  %v342_v26 = vld [vmem:[#allocation5 + $0x5d8] sm:$0xff] }
 0x170   :  { %2875 = vmatpush1.bf16.msra.mxu1 %v7358_v35  ;;  %2835 = vmatprep.subr.bf16.mxu0 %v7605_v36  ;;  %v521_v35 = vld [vmem:[#allocation5 + $0xb70] sm:$0xff]  ;;  %v262_v36 = vld [vmem:[#allocation5 + $0x358] sm:$0xff] }
 0x171   :  { %2876 = vmatprep.subr.bf16.mxu1 %v7351_v38  ;;  %v7684_v38 = vcombine.low %v525_v23, %v529_v24  ;;  %v7677_v40 = vcombine.high %v517_v34, %v521_v35  ;;  %v7423_v41 = vcombine.high %v262_v36, %v266_v37  ;;  %v7422_v47 = vcombine.low %v262_v36, %v266_v37  ;;  %v477_v15 = vld [vmem:[#allocation5 + $0xa10] sm:$0xff]  ;;  %v334_v37 = vld [vmem:[#allocation5 + $0x598] sm:$0xff] }
 0x173   :  { %2836 = vmatpush1.bf16.msra.mxu0 %v7604_v43  ;;  %v513_v43 = vld [vmem:[#allocation5 + $0xb30] sm:$0xff] }
 0x174   :  { %2877 = vmatpush1.bf16.msra.mxu1 %v7350_v58  ;;  %2837 = vmatprep.subr.bf16.mxu0 %v7597_v45  ;;  %v254_v58 = vld [vmem:[#allocation5 + $0x318] sm:$0xff]  ;;  %v7669_v48 = vcombine.high %v509_v42, %v513_v43 }
 0x175   :  { %2878 = vmatprep.subr.bf16.mxu1 %v7343_v46  ;;  %v258_v45 = vld [vmem:[#allocation5 + $0x338] sm:$0xff]  ;;  %v7676_v46 = vcombine.low %v517_v34, %v521_v35 }
 0x176   :  { %v7415_v49 = vcombine.high %v254_v58, %v258_v45  ;;  %v7414_v57 = vcombine.low %v254_v58, %v258_v45  ;;  %v326_v45 = vld [vmem:[#allocation5 + $0x558] sm:$0xff] }
 0x177   :  { %2838 = vmatpush1.bf16.msra.mxu0 %v7596_v51  ;;  %v505_v51 = vld [vmem:[#allocation5 + $0xaf0] sm:$0xff] }
 0x178   :  { %2879 = vmatpush1.bf16.msra.mxu1 %v7342_v52  ;;  %2839 = vmatprep.subr.bf16.mxu0 %v7589_v54  ;;  %v246_v52 = vld [vmem:[#allocation5 + $0x2d8] sm:$0xff]  ;;  %v7661_v61 = vcombine.high %v501_v50, %v505_v51 }
 0x179   :  { %2880 = vmatprep.subr.bf16.mxu1 %v7335_v56  ;;  %v250_v54 = vld [vmem:[#allocation5 + $0x2f8] sm:$0xff]  ;;  %v7668_v56 = vcombine.low %v509_v42, %v513_v43 }
 0x17a   :  { %v7407_v62 = vcombine.high %v246_v52, %v250_v54  ;;  %v7406_v4 = vcombine.low %v246_v52, %v250_v54 }
 0x17b   :  { %2840 = vmatpush1.bf16.msra.mxu0 %v7588_v0  ;;  %v497_v0 = vld [vmem:[#allocation5 + $0xab0] sm:$0xff] }
 0x17c   :  { %2881 = vmatpush1.bf16.msra.mxu1 %v7334_v1  ;;  %2841 = vmatprep.subr.bf16.mxu0 %v7581_v2  ;;  %v238_v1 = vld [vmem:[#allocation5 + $0x298] sm:$0xff]  ;;  %v7653_v5 = vcombine.high %v493_v63, %v497_v0 }
 0x17d   :  { %2882 = vmatprep.subr.bf16.mxu1 %v7327_v3  ;;  %v242_v2 = vld [vmem:[#allocation5 + $0x2b8] sm:$0xff]  ;;  %v7660_v3 = vcombine.low %v501_v50, %v505_v51 }
 0x17e   :  { %v7399_v6 = vcombine.high %v238_v1, %v242_v2  ;;  %v7398_v12 = vcombine.low %v238_v1, %v242_v2  ;;  %v450_v2 = vld [vmem:[#allocation5 + $0x938] sm:$0xff] }
 0x17f   :  { %2842 = vmatpush1.bf16.msra.mxu0 %v7580_v8  ;;  %v489_v8 = vld [vmem:[#allocation5 + $0xa70] sm:$0xff] }
 0x180   :  { %2883 = vmatpush1.bf16.msra.mxu1 %v7326_v9  ;;  %2843 = vmatprep.subr.bf16.mxu0 %v7573_v10  ;;  %v230_v9 = vld [vmem:[#allocation5 + $0x258] sm:$0xff]  ;;  %v7645_v13 = vcombine.high %v485_v7, %v489_v8 }
 0x181   :  { %2884 = vmatprep.subr.bf16.mxu1 %v7319_v11  ;;  %v234_v10 = vld [vmem:[#allocation5 + $0x278] sm:$0xff]  ;;  %v7652_v11 = vcombine.low %v493_v63, %v497_v0 }
 0x182   :  { %v7391_v14 = vcombine.high %v230_v9, %v234_v10  ;;  %v7390_v23 = vcombine.low %v230_v9, %v234_v10  ;;  %v322_v0 = vld [vmem:[#allocation5 + $0x538] sm:$0xff] }
 0x183   :  { %2844 = vmatpush1.bf16.msra.mxu0 %v7572_v17  ;;  %v481_v17 = vld [vmem:[#allocation5 + $0xa30] sm:$0xff]  ;;  %v310_v10 = vld [vmem:[#allocation5 + $0x4d8] sm:$0xff] }
 0x184   :  { %2885 = vmatpush1.bf16.msra.mxu1 %v7318_v18  ;;  %2845 = vmatprep.subr.bf16.mxu0 %v7693_v21  ;;  %v222_v18 = vld [vmem:[#allocation5 + $0x218] sm:$0xff]  ;;  %v7637_v24 = vcombine.high %v477_v15, %v481_v17 }
 0x185   :  { %2886 = vmatprep.subr.bf16.mxu1 %v7439_v22  ;;  %v226_v21 = vld [vmem:[#allocation5 + $0x238] sm:$0xff]  ;;  %v7644_v22 = vcombine.low %v485_v7, %v489_v8 }
 0x186   :  { %v7383_v25 = vcombine.high %v222_v18, %v226_v21  ;;  %v7382_v34 = vcombine.low %v222_v18, %v226_v21  ;;  %v302_v21 = vld [vmem:[#allocation5 + $0x498] sm:$0xff] }
 0x187   :  { %2846 = vmatpush2.bf16.msra.mxu0 %v7692_v28  ;;  %v346_v28 = vld [vmem:[#allocation5 + $0x5f8] sm:$0xff] }
 0x188   :  { %2887 = vmatpush2.bf16.msra.mxu1 %v7438_v29  ;;  %2847 = vmatprep.subr.bf16.mxu0 %v7685_v32  ;;  %v470_v29 = vld [vmem:[#allocation5 + $0x9d8] sm:$0xff]  ;;  %v7503_v35 = vcombine.high %v342_v26, %v346_v28 }
 0x189   :  { %2888 = vmatprep.subr.bf16.mxu1 %v7431_v33  ;;  %v474_v32 = vld [vmem:[#allocation5 + $0x9f8] sm:$0xff]  ;;  %v7636_v33 = vcombine.low %v477_v15, %v481_v17 }
 0x18a   :  { %v7631_v36 = vcombine.high %v470_v29, %v474_v32  ;;  %v7630_v42 = vcombine.low %v470_v29, %v474_v32 }
 0x18b   :  { %2848 = vmatpush2.bf16.msra.mxu0 %v7684_v38  ;;  %v338_v38 = vld [vmem:[#allocation5 + $0x5b8] sm:$0xff] }
 0x18c   :  { %2889 = vmatpush2.bf16.msra.mxu1 %v7430_v39  ;;  %2849 = vmatprep.subr.bf16.mxu0 %v7677_v40  ;;  %v462_v39 = vld [vmem:[#allocation5 + $0x998] sm:$0xff]  ;;  %v7495_v43 = vcombine.high %v334_v37, %v338_v38  ;;  %v7494_v52 = vcombine.low %v334_v37, %v338_v38 }
 0x18d   :  { %2890 = vmatprep.subr.bf16.mxu1 %v7423_v41  ;;  %v466_v40 = vld [vmem:[#allocation5 + $0x9b8] sm:$0xff]  ;;  %v7502_v41 = vcombine.low %v342_v26, %v346_v28 }
 0x18e   :  { %v7623_v58 = vcombine.high %v462_v39, %v466_v40 }
 0x18f   :  { %2850 = vmatpush2.bf16.msra.mxu0 %v7676_v46  ;;  %v330_v46 = vld [vmem:[#allocation5 + $0x578] sm:$0xff] }
 0x190   :  { %2891 = vmatpush2.bf16.msra.mxu1 %v7422_v47  ;;  %2851 = vmatprep.subr.bf16.mxu0 %v7669_v48  ;;  %v454_v48 = vld [vmem:[#allocation5 + $0x958] sm:$0xff] }
 0x191   :  { %2892 = vmatprep.subr.bf16.mxu1 %v7415_v49  ;;  %v458_v49 = vld [vmem:[#allocation5 + $0x978] sm:$0xff] }
 0x192   :  { %v7615_v63 = vcombine.high %v454_v48, %v458_v49 }
 0x193   :  { %2852 = vmatpush2.bf16.msra.mxu0 %v7668_v56  ;;  %v7622_v56 = vcombine.low %v462_v39, %v466_v40 }
 0x194   :  { %2893 = vmatpush2.bf16.msra.mxu1 %v7414_v57  ;;  %2853 = vmatprep.subr.bf16.mxu0 %v7661_v61  ;;  %v7487_v57 = vcombine.high %v326_v45, %v330_v46 }
 0x195   :  { %2894 = vmatprep.subr.bf16.mxu1 %v7407_v62 }
 0x197   :  { %2854 = vmatpush2.bf16.msra.mxu0 %v7660_v3 }
 0x198   :  { %2895 = vmatpush2.bf16.msra.mxu1 %v7406_v4  ;;  %2855 = vmatprep.subr.bf16.mxu0 %v7653_v5  ;;  %v7486_v4 = vcombine.low %v326_v45, %v330_v46  ;;  %v418_v45 = vld [vmem:[#allocation5 + $0x838] sm:$0xff] }
 0x199   :  { %2896 = vmatprep.subr.bf16.mxu1 %v7399_v6  ;;  %v7614_v6 = vcombine.low %v454_v48, %v458_v49 }
 0x19b   :  { %2856 = vmatpush2.bf16.msra.mxu0 %v7652_v11 }
 0x19c   :  { %2897 = vmatpush2.bf16.msra.mxu1 %v7398_v12  ;;  %2857 = vmatprep.subr.bf16.mxu0 %v7645_v13  ;;  %v438_v12 = vld [vmem:[#allocation5 + $0x8d8] sm:$0xff] }
 0x19d   :  { %2898 = vmatprep.subr.bf16.mxu1 %v7391_v14  ;;  %v442_v13 = vld [vmem:[#allocation5 + $0x8f8] sm:$0xff] }
 0x19e   :  { %v7599_v18 = vcombine.high %v438_v12, %v442_v13  ;;  %v7598_v28 = vcombine.low %v438_v12, %v442_v13  ;;  %v390_v13 = vld [vmem:[#allocation5 + $0x758] sm:$0xff] }
 0x19f   :  { %2858 = vmatpush2.bf16.msra.mxu0 %v7644_v22  ;;  %v306_v22 = vld [vmem:[#allocation5 + $0x4b8] sm:$0xff] }
 0x1a0   :  { %2899 = vmatpush2.bf16.msra.mxu1 %v7390_v23  ;;  %2859 = vmatprep.subr.bf16.mxu0 %v7637_v24  ;;  %v430_v24 = vld [vmem:[#allocation5 + $0x898] sm:$0xff]  ;;  %v7463_v29 = vcombine.high %v302_v21, %v306_v22  ;;  %v7462_v38 = vcombine.low %v302_v21, %v306_v22 }
 0x1a1   :  { %2900 = vmatprep.subr.bf16.mxu1 %v7383_v25  ;;  %v434_v25 = vld [vmem:[#allocation5 + $0x8b8] sm:$0xff] }
 0x1a2   :  { %v7591_v32 = vcombine.high %v430_v24, %v434_v25  ;;  %v7590_v39 = vcombine.low %v430_v24, %v434_v25 }
 0x1a3   :  { %2860 = vmatpush2.bf16.msra.mxu0 %v7636_v33  ;;  %v294_v33 = vld [vmem:[#allocation5 + $0x458] sm:$0xff] }
 0x1a4   :  { %2901 = vmatpush2.bf16.msra.mxu1 %v7382_v34  ;;  %2911 = vmatprep.subr.bf16.mxu0 %v7503_v35  ;;  %v298_v34 = vld [vmem:[#allocation5 + $0x478] sm:$0xff] }
 0x1a5   :  { %2952 = vmatprep.subr.bf16.mxu1 %v7631_v36  ;;  %v422_v35 = vld [vmem:[#allocation5 + $0x858] sm:$0xff]  ;;  %v7455_v40 = vcombine.high %v294_v33, %v298_v34 }
 0x1a6   :  { %v2617_v47 = vpop.f32.mrf.mxu0  ;;  %2862 = vmatmul.mubr.bf16.vlgmr.msra.gmra.mxu0 %v8566_v31  ;;  %v426_v36 = vld [vmem:[#allocation5 + $0x878] sm:$0xff] }
 0x1a7   :  { %v8600_v50 = vadd.f32 %v2617_v47, %v8592_v19  ;;  %v8602_v51 = vpop.f32.mrf.mxu1  ;;  %2903 = vmatmul.mubr.bf16.vlgmr.msra.gmra.mxu1 %v8556_v16  ;;  %2912 = vmatpush1.bf16.msra.mxu0 %v7502_v41  ;;  %v318_v19 = vld [vmem:[#allocation5 + $0x518] sm:$0xff]  ;;  %v7583_v41 = vcombine.high %v422_v35, %v426_v36  ;;  %v7454_v47 = vcombine.low %v294_v33, %v298_v34 }
 0x1a8   :  { %2953 = vmatpush1.bf16.msra.mxu1 %v7630_v42  ;;  %v2619_v54 = vpop.f32.mrf.mxu0  ;;  %2913 = vmatprep.subr.bf16.mxu0 %v7495_v43  ;;  %v446_v16 = vld [vmem:[#allocation5 + $0x918] sm:$0xff]  ;;  %v7479_v7 = vcombine.high %v318_v19, %v322_v0  ;;  %v7582_v48 = vcombine.low %v422_v35, %v426_v36 }
 0x1a9   :  { %v8606_v61 = vadd.f32 %v2619_v54, %v8596_v30  ;;  %v8608_v62 = vpop.f32.mrf.mxu1  ;;  %2954 = vmatprep.subr.bf16.mxu1 %v7623_v58  ;;  %2943 = vmatprep.mubr.bf16.mxu0 %v8552_v59  ;;  %v7607_v9 = vcombine.high %v446_v16, %v450_v2  ;;  %v314_v59 = vld [vmem:[#allocation5 + $0x4f8] sm:$0xff]  ;;  %v7606_v15 = vcombine.low %v446_v16, %v450_v2  ;;  %v3001_v24 = vmul.f32 0.70710677, %v8600_v50 }
 0x1aa   :  { %v2621_v1 = vpop.f32.mrf.mxu0  ;;  %2984 = vmatprep.mubr.bf16.mxu1 %v8560_v27  ;;  %v7478_v27 = vcombine.low %v318_v19, %v322_v0  ;;  %v7471_v17 = vcombine.high %v310_v10, %v314_v59  ;;  %v7470_v26 = vcombine.low %v310_v10, %v314_v59  ;;  %v286_v42 = vld [vmem:[#allocation5 + $0x418] sm:$0xff] }
 0x1ab   :  { %v2662_v3 = vpop.f32.mrf.mxu1  ;;  %2914 = vmatpush1.bf16.msra.mxu0 %v7494_v52  ;;  %v3002_v5 = vmul.f32 0.70710677, %v8606_v61  ;;  %v290_v43 = vld [vmem:[#allocation5 + $0x438] sm:$0xff] }
 0x1ac   :  { %2955 = vmatpush1.bf16.msra.mxu1 %v7622_v56  ;;  %v2622_v30 = vpop.f32.mrf.mxu0  ;;  %2915 = vmatprep.subr.bf16.mxu0 %v7487_v57  ;;  %v414_v58 = vld [vmem:[#allocation5 + $0x818] sm:$0xff]  ;;  %v7447_v49 = vcombine.high %v286_v42, %v290_v43  ;;  %v7446_v0 = vcombine.low %v286_v42, %v290_v43 }
 0x1ad   :  { %v2663_v8 = vpop.f32.mrf.mxu1  ;;  %2956 = vmatprep.subr.bf16.mxu1 %v7615_v63  ;;  %v3010_v11 = vand.u32 2147483647, %v3002_v5  ;;  %v7575_v52 = vcombine.high %v414_v58, %v418_v45  ;;  %v406_v54 = vld [vmem:[#allocation5 + $0x7d8] sm:$0xff]  ;;  %v7574_v1 = vcombine.low %v414_v58, %v418_v45 }
 0x1ae   :  { %v410_v56 = vld [vmem:[#allocation5 + $0x7f8] sm:$0xff] }
 0x1af   :  { %2916 = vmatpush1.bf16.msra.mxu0 %v7486_v4  ;;  %v3018_v14 = vmul.f32 0.3275911, %v3010_v11  ;;  %v3050_v37 = vpack.c.bf16 %v3010_v11, %v3010_v11  ;;  %v534_v57 = vld [vmem:[#allocation5 + $0xbd8] sm:$0xff]  ;;  %v7567_v16 = vcombine.high %v406_v54, %v410_v56 }
 0x1b0   :  { %2957 = vmatpush1.bf16.msra.mxu1 %v7614_v6  ;;  %2917 = vmatprep.subr.bf16.mxu0 %v7479_v7  ;;  %v538_v63 = vld [vmem:[#allocation5 + $0xbf8] sm:$0xff] }
 0x1b1   :  { %2958 = vmatprep.subr.bf16.mxu1 %v7607_v9  ;;  %v3026_v23 = vadd.f32 1.0, %v3018_v14  ;;  %v3130_v46 = vmul.bf16 %v3050_v37, %v3050_v37  ;;  %v7695_v3 = vcombine.high %v534_v57, %v538_v63  ;;  %v398_v4 = vld [vmem:[#allocation5 + $0x798] sm:$0xff]  ;;  %v7566_v9 = vcombine.low %v406_v54, %v410_v56 }
 0x1b2   :  { %v402_v5 = vld [vmem:[#allocation5 + $0x7b8] sm:$0xff]  ;;  %v7694_v59 = vcombine.low %v534_v57, %v538_v63 }
 0x1b3   :  { %2918 = vmatpush1.bf16.msra.mxu0 %v7478_v27  ;;  %8222 = vrcp.f32 %v3026_v23  ;;  %v3138_v19 = vsub.bf16 0, %v3130_v46  ;;  %v526_v6 = vld [vmem:[#allocation5 + $0xb98] sm:$0xff]  ;;  %v7559_v11 = vcombine.high %v398_v4, %v402_v5 }
 0x1b4   :  { %2959 = vmatpush1.bf16.msra.mxu1 %v7606_v15  ;;  %2919 = vmatprep.subr.bf16.mxu0 %v7471_v17  ;;  %v530_v7 = vld [vmem:[#allocation5 + $0xbb8] sm:$0xff] }
 0x1b5   :  { %2960 = vmatprep.subr.bf16.mxu1 %v7599_v18  ;;  %v3149_v8 = vmul.bf16 1069105081, %v3138_v19  ;;  %v7687_v12 = vcombine.high %v526_v6, %v530_v7  ;;  %v394_v27 = vld [vmem:[#allocation5 + $0x778] sm:$0xff]  ;;  %v7558_v18 = vcombine.low %v398_v4, %v402_v5  ;;  %v7686_v22 = vcombine.low %v526_v6, %v530_v7 }
 0x1b6   :  { %v518_v15 = vld [vmem:[#allocation5 + $0xb58] sm:$0xff]  ;;  %v7551_v23 = vcombine.high %v390_v13, %v394_v27  ;;  %v7550_v34 = vcombine.low %v390_v13, %v394_v27 }
 0x1b7   :  { %2920 = vmatpush1.bf16.msra.mxu0 %v7470_v26  ;;  %v522_v17 = vld [vmem:[#allocation5 + $0xb78] sm:$0xff]  ;;  %8224 = vpow.bf16 %v3149_v8 }
 0x1b8   :  { %2961 = vmatpush1.bf16.msra.mxu1 %v7598_v28  ;;  %2921 = vmatprep.subr.bf16.mxu0 %v7463_v29  ;;  %v7679_v25 = vcombine.high %v518_v15, %v522_v17  ;;  %v382_v26 = vld [vmem:[#allocation5 + $0x718] sm:$0xff]  ;;  %v7678_v36 = vcombine.low %v518_v15, %v522_v17  ;;  %v2994_v15 = vpack.c.bf16 %v8606_v61, %v8606_v61 }
 0x1b9   :  { %2962 = vmatprep.subr.bf16.mxu1 %v7591_v32  ;;  %v386_v28 = vld [vmem:[#allocation5 + $0x738] sm:$0xff] }
 0x1ba   :  { %v510_v32 = vld [vmem:[#allocation5 + $0xb18] sm:$0xff]  ;;  %v7543_v37 = vcombine.high %v382_v26, %v386_v28  ;;  %v7542_v45 = vcombine.low %v382_v26, %v386_v28  ;;  %v3289_v28 = vld [vmem:[#allocation8 + $0x1c0] sm:$0xff]  ;;  %vm3186_vm0 = vcmp.ge.bf16.partialorder %v2994_v15, 0 }
 0x1bb   :  { %2922 = vmatpush1.bf16.msra.mxu0 %v7462_v38  ;;  %v514_v33 = vld [vmem:[#allocation5 + $0xb38] sm:$0xff]  ;;  %v8619_v38 = vand.u32 2147483647, %v3001_v24 }
 0x1bc   :  { %2963 = vmatpush1.bf16.msra.mxu1 %v7590_v39  ;;  %2923 = vmatprep.subr.bf16.mxu0 %v7455_v40  ;;  %v7671_v39 = vcombine.high %v510_v32, %v514_v33  ;;  %v374_v40 = vld [vmem:[#allocation5 + $0x6d8] sm:$0xff] }
 0x1bd   :  { %2964 = vmatprep.subr.bf16.mxu1 %v7583_v41  ;;  %v378_v41 = vld [vmem:[#allocation5 + $0x6f8] sm:$0xff] }
 0x1be   :  { %v502_v43 = vld [vmem:[#allocation5 + $0xad8] sm:$0xff] }
 0x1bf   :  { %2924 = vmatpush1.bf16.msra.mxu0 %v7454_v47  ;;  %v506_v58 = vld [vmem:[#allocation5 + $0xaf8] sm:$0xff]  ;;  %v7670_v47 = vcombine.low %v510_v32, %v514_v33  ;;  %v3417_v32 = vld [vmem:[#allocation8 + $0x5c0] sm:$0xff] }
 0x1c0   :  { %2965 = vmatpush1.bf16.msra.mxu1 %v7582_v48  ;;  %2925 = vmatprep.subr.bf16.mxu0 %v7447_v49  ;;  %v8223_v2 = vpop.eup %8222  ;;  %v7535_v48 = vcombine.high %v374_v40, %v378_v41  ;;  %v3017_v49 = vmul.f32 0.3275911, %v8619_v38  ;;  %v366_v54 = vld [vmem:[#allocation5 + $0x698] sm:$0xff]  ;;  %v3421_v33 = vld [vmem:[#allocation8 + $0x5e0] sm:$0xff] }
 0x1c1   :  { %2966 = vmatprep.subr.bf16.mxu1 %v7575_v52  ;;  %v8613_v30 = vpack.c.bf16 %v8223_v2, %v8223_v2  ;;  %v7663_v52 = vcombine.high %v502_v43, %v506_v58  ;;  %v370_v56 = vld [vmem:[#allocation5 + $0x6b8] sm:$0xff] }
 0x1c2   :  { %v494_v63 = vld [vmem:[#allocation5 + $0xa98] sm:$0xff]  ;;  %v7527_v2 = vcombine.high %v366_v54, %v370_v56  ;;  %v3025_v4 = vadd.f32 1.0, %v3017_v49  ;;  %v3210_v49 = vmul.bf16 1056980736, %v2994_v15 }
 0x1c3   :  { %2926 = vmatpush1.bf16.msra.mxu0 %v7446_v0  ;;  %v3058_v10 = vmul.bf16 1065893768, %v8613_v30  ;;  %v498_v19 = vld [vmem:[#allocation5 + $0xab8] sm:$0xff]  ;;  %v7534_v0 = vcombine.low %v374_v40, %v378_v41  ;;  %v7881_v41 = vcombine.high %v3417_v32, %v3421_v33 }
 0x1c4   :  { %2967 = vmatpush1.bf16.msra.mxu1 %v7574_v1  ;;  %2927 = vmatprep.subr.bf16.mxu0 %v7567_v16  ;;  %v7662_v16 = vcombine.low %v502_v43, %v506_v58  ;;  %v7655_v5 = vcombine.high %v494_v63, %v498_v19  ;;  %v358_v6 = vld [vmem:[#allocation5 + $0x658] sm:$0xff]  ;;  %8226 = vrcp.f32 %v3025_v4  ;;  %v3285_v58 = vld [vmem:[#allocation8 + $0x1a0] sm:$0xff] }
 0x1c5   :  { %2968 = vmatprep.subr.bf16.mxu1 %v7695_v3  ;;  %v3066_v14 = vadd.bf16 3216687034, %v3058_v10  ;;  %v8225_v3 = vpop.eup %8224  ;;  %v362_v7 = vld [vmem:[#allocation5 + $0x678] sm:$0xff] }
 0x1c6   :  { %v490_v10 = vld [vmem:[#allocation5 + $0xa78] sm:$0xff] }
 0x1c7   :  { %2928 = vmatpush2.bf16.msra.mxu0 %v7566_v9  ;;  %v3074_v21 = vmul.bf16 %v3066_v14, %v8613_v30  ;;  %v486_v9 = vld [vmem:[#allocation5 + $0xa58] sm:$0xff] }
 0x1c8   :  { %2969 = vmatpush2.bf16.msra.mxu1 %v7694_v59  ;;  %2929 = vmatprep.subr.bf16.mxu0 %v7559_v11  ;;  %v7526_v59 = vcombine.low %v366_v54, %v370_v56  ;;  %v7647_v13 = vcombine.high %v486_v9, %v490_v10  ;;  %v350_v27 = vld [vmem:[#allocation5 + $0x618] sm:$0xff]  ;;  %v3273_v54 = vld [vmem:[#allocation8 + $0x140] sm:$0xff] }
 0x1c9   :  { %2970 = vmatprep.subr.bf16.mxu1 %v7687_v12  ;;  %v3082_v29 = vadd.bf16 1068908470, %v3074_v21  ;;  %v7654_v12 = vcombine.low %v494_v63, %v498_v19  ;;  %v354_v14 = vld [vmem:[#allocation5 + $0x638] sm:$0xff]  ;;  %v3277_v19 = vld [vmem:[#allocation8 + $0x160] sm:$0xff] }
 0x1ca   :  { %v478_v17 = vld [vmem:[#allocation5 + $0xa18] sm:$0xff]  ;;  %v7511_v24 = vcombine.high %v350_v27, %v354_v14 }
 0x1cb   :  { %2930 = vmatpush2.bf16.msra.mxu0 %v7558_v18  ;;  %v3090_v35 = vmul.bf16 %v3082_v29, %v8613_v30  ;;  %v482_v18 = vld [vmem:[#allocation5 + $0xa38] sm:$0xff]  ;;  %v3293_v29 = vld [vmem:[#allocation8 + $0x1e0] sm:$0xff] }
 0x1cc   :  { %2971 = vmatpush2.bf16.msra.mxu1 %v7686_v22  ;;  %2931 = vmatprep.subr.bf16.mxu0 %v7551_v23  ;;  %v7518_v22 = vcombine.low %v358_v6, %v362_v7  ;;  %v7646_v23 = vcombine.low %v486_v9, %v490_v10  ;;  %v7639_v26 = vcombine.high %v478_v17, %v482_v18 }
 0x1cd   :  { %2972 = vmatprep.subr.bf16.mxu1 %v7679_v25  ;;  %v3098_v42 = vadd.bf16 3197288082, %v3090_v35  ;;  %v8627_v25 = vsub.s32 2, %v8576_v44  ;;  %v8630_v35 = vsub.s32 3, %v8576_v44 }
 0x1cf   :  { %2932 = vmatpush2.bf16.msra.mxu0 %v7550_v34  ;;  %v3106_v46 = vmul.bf16 %v3098_v42, %v8613_v30  ;;  %v552_v40 = vrot.slane %v8581_v55, %v8627_v25  ;;  %v3281_v42 = vld [vmem:[#allocation8 + $0x180] sm:$0xff] }
 0x1d0   :  { %2973 = vmatpush2.bf16.msra.mxu1 %v7678_v36  ;;  %2933 = vmatprep.subr.bf16.mxu0 %v7543_v37  ;;  %v7510_v36 = vcombine.low %v350_v27, %v354_v14  ;;  %v7638_v37 = vcombine.low %v478_v17, %v482_v18  ;;  %v7736_v17 = vcombine.low %v3273_v54, %v3277_v19 }
 0x1d1   :  { %2974 = vmatprep.subr.bf16.mxu1 %v7671_v39  ;;  %v3114_v57 = vadd.bf16 1048723074, %v3106_v46  ;;  %v7753_v39 = vcombine.high %v3289_v28, %v3293_v29  ;;  %v3413_v46 = vld [vmem:[#allocation8 + $0x5a0] sm:$0xff]  ;;  %v2659_v56 = vadd.f32 %v8602_v51, %v552_v40  ;;  %v7744_v51 = vcombine.low %v3281_v42, %v3285_v58 }
 0x1d3   :  { %2934 = vmatpush2.bf16.msra.mxu0 %v7542_v45  ;;  %v3122_v1 = vmul.bf16 %v3114_v57, %v8613_v30  ;;  %v7519_v30 = vcombine.high %v358_v6, %v362_v7  ;;  %v3409_v45 = vld [vmem:[#allocation8 + $0x580] sm:$0xff]  ;;  %v7745_v57 = vcombine.high %v3281_v42, %v3285_v58 }
 0x1d4   :  { %2975 = vmatpush2.bf16.msra.mxu1 %v7670_v47  ;;  %2935 = vmatprep.subr.bf16.mxu0 %v7535_v48  ;;  %v556_v47 = vrot.slane %v8581_v55, %v8630_v35  ;;  %v7752_v48 = vcombine.low %v3289_v28, %v3293_v29  ;;  %v7873_v63 = vcombine.high %v3409_v45, %v3413_v46  ;;  %v3257_v29 = vld [vmem:[#allocation8 + $0xc0] sm:$0xff] }
 0x1d5   :  { %2976 = vmatprep.subr.bf16.mxu1 %v7663_v52  ;;  %v3170_v8 = vmul.bf16 %v8225_v3, %v3122_v1  ;;  %v7880_v52 = vcombine.low %v3417_v32, %v3421_v33  ;;  %v3405_v1 = vld [vmem:[#allocation8 + $0x560] sm:$0xff]  ;;  %v7872_v7 = vcombine.low %v3409_v45, %v3413_v46 }
 0x1d6   :  { %v2661_v3 = vadd.f32 %v8608_v62, %v556_v47  ;;  %v3265_v62 = vld [vmem:[#allocation8 + $0x100] sm:$0xff] }
 0x1d7   :  { %2936 = vmatpush2.bf16.msra.mxu0 %v7534_v0  ;;  %v3178_v11 = vsub.bf16 1065369472, %v3170_v8  ;;  %v3401_v0 = vld [vmem:[#allocation8 + $0x540] sm:$0xff]  ;;  %v7737_v8 = vcombine.high %v3273_v54, %v3277_v19 }
 0x1d8   :  { %2977 = vmatpush2.bf16.msra.mxu1 %v7662_v16  ;;  %2937 = vmatprep.subr.bf16.mxu0 %v7527_v2  ;;  %v8227_v16 = vpop.eup %8226  ;;  %v7865_v9 = vcombine.high %v3401_v0, %v3405_v1  ;;  %v3261_v32 = vld [vmem:[#allocation8 + $0xe0] sm:$0xff] }
 0x1d9   :  { %2978 = vmatprep.subr.bf16.mxu1 %v7655_v5  ;;  %v3194_v21 = vsub.bf16 0, %v3178_v11  ;;  %v8643_v10 = vpack.c.bf16 %v8227_v16, %v8227_v16  ;;  %v7721_v42 = vcombine.high %v3257_v29, %v3261_v32  ;;  %v3249_v46 = vld [vmem:[#allocation8 + $0x80] sm:$0xff] }
 0x1da   :  { %v3253_v47 = vld [vmem:[#allocation8 + $0xa0] sm:$0xff] }
 0x1db   :  { %2938 = vmatpush2.bf16.msra.mxu0 %v7526_v59  ;;  %v3202_v34 = vsel %vm3186_vm0, %v3178_v11, %v3194_v21  ;;  %v7864_v21 = vcombine.low %v3401_v0, %v3405_v1  ;;  %v3381_v54 = vld [vmem:[#allocation8 + $0x4a0] sm:$0xff]  ;;  %v7713_v19 = vcombine.high %v3249_v46, %v3253_v47 }
 0x1dc   :  { %2979 = vmatpush2.bf16.msra.mxu1 %v7654_v12  ;;  %2939 = vmatprep.subr.bf16.mxu0 %v7519_v30  ;;  %v3218_v43 = vadd.bf16 1065369472, %v3202_v34  ;;  %v3269_v12 = vld [vmem:[#allocation8 + $0x120] sm:$0xff] }
 0x1dd   :  { %2980 = vmatprep.subr.bf16.mxu1 %v7647_v13  ;;  %v3393_v30 = vld [vmem:[#allocation8 + $0x500] sm:$0xff] }
 0x1de   :  { %v8638_v55 = vmul.bf16 %v3218_v43, %v3210_v49  ;;  %v3397_v13 = vld [vmem:[#allocation8 + $0x520] sm:$0xff] }
 0x1df   :  { %2940 = vmatpush2.bf16.msra.mxu0 %v7518_v22  ;;  %v7729_v22 = vcombine.high %v3265_v62, %v3269_v12  ;;  %v7857_v28 = vcombine.high %v3393_v30, %v3397_v13  ;;  %v3385_v34 = vld [vmem:[#allocation8 + $0x4c0] sm:$0xff] }
 0x1e0   :  { %2981 = vmatpush2.bf16.msra.mxu1 %v7646_v23  ;;  %2941 = vmatprep.subr.bf16.mxu0 %v7511_v24  ;;  %v3057_v23 = vmul.bf16 1065893768, %v8643_v10  ;;  %v3241_v16 = vld [vmem:[#allocation8 + $0x40] sm:$0xff] }
 0x1e1   :  { %2982 = vmatprep.subr.bf16.mxu1 %v7639_v26 }
 0x1e2   :  { %v3065_v43 = vadd.bf16 3216687034, %v3057_v23  ;;  %v3353_v23 = vld [vmem:[#allocation8 + $0x3c0] sm:$0xff] }
 0x1e3   :  { %2942 = vmatpush2.bf16.msra.mxu0 %v7510_v36  ;;  %v3389_v36 = vld [vmem:[#allocation8 + $0x4e0] sm:$0xff] }
 0x1e4   :  { %2983 = vmatpush2.bf16.msra.mxu1 %v7638_v37  ;;  %6347 = vmatprep.subr.bf16.mxu0 %v7753_v39  ;;  %v7728_v39 = vcombine.low %v3265_v62, %v3269_v12  ;;  %v7849_v45 = vcombine.high %v3385_v34, %v3389_v36  ;;  %v3073_v0 = vmul.bf16 %v3065_v43, %v8643_v10  ;;  %v3237_v62 = vld [vmem:[#allocation8 + $0x20] sm:$0xff] }
 0x1e5   :  { %6388 = vmatprep.subr.bf16.mxu1 %v7881_v41  ;;  %v7856_v41 = vcombine.low %v3393_v30, %v3397_v13  ;;  %v3361_v30 = vld [vmem:[#allocation8 + $0x400] sm:$0xff] }
 0x1e6   :  { %v2699_v2 = vpop.f32.mrf.mxu0  ;;  %2944 = vmatmul.mubr.bf16.vlgmr.msra.gmra.mxu0 %v8558_v20  ;;  %v3365_v13 = vld [vmem:[#allocation8 + $0x420] sm:$0xff] }
 0x1e7   :  { %v2700_v4 = vadd.f32 %v2699_v2, %v2659_v56  ;;  %v2740_v5 = vpop.f32.mrf.mxu1  ;;  %2985 = vmatmul.mubr.bf16.vlgmr.msra.gmra.mxu1 %v8566_v31  ;;  %6348 = vmatpush1.bf16.msra.mxu0 %v7752_v48  ;;  %v3049_v48 = vpack.c.bf16 %v8619_v38, %v8619_v38  ;;  %v7720_v56 = vcombine.low %v3257_v29, %v3261_v32  ;;  %v3245_v2 = vld [vmem:[#allocation8 + $0x60] sm:$0xff] }
 0x1e8   :  { %6379 = vmatprep.mubr.bf16.mxu0 %v8638_v55  ;;  %6389 = vmatpush1.bf16.msra.mxu1 %v7880_v52  ;;  %v2701_v6 = vpop.f32.mrf.mxu0  ;;  %v3377_v52 = vld [vmem:[#allocation8 + $0x480] sm:$0xff] }
 0x1e9   :  { %v8645_v20 = vadd.f32 %v2740_v5, %v2700_v4  ;;  %v2702_v59 = vadd.f32 %v2701_v6, %v2661_v3  ;;  %v2742_v11 = vpop.f32.mrf.mxu1  ;;  %6349 = vmatprep.subr.bf16.mxu0 %v7745_v57  ;;  %6390 = vmatprep.subr.bf16.mxu1 %v7873_v63  ;;  %v7848_v63 = vcombine.low %v3385_v34, %v3389_v36  ;;  %v3369_v38 = vld [vmem:[#allocation8 + $0x440] sm:$0xff] }
 0x1ea   :  { %v2703_v31 = vpop.f32.mrf.mxu0  ;;  %v7841_v1 = vcombine.high %v3377_v52, %v3381_v54  ;;  %v3129_v3 = vmul.bf16 %v3049_v48, %v3049_v48  ;;  %v3373_v5 = vld [vmem:[#allocation8 + $0x460] sm:$0xff]  ;;  %v7840_v6 = vcombine.low %v3377_v52, %v3381_v54  ;;  %v7824_v36 = vcombine.low %v3361_v30, %v3365_v13 }
 0x1eb   :  { %v3003_v27 = vmul.f32 0.70710677, %v8645_v20  ;;  %v8648_v14 = vadd.f32 %v2742_v11, %v2702_v59  ;;  %v2744_v15 = vpop.f32.mrf.mxu1  ;;  %6350 = vmatpush1.bf16.msra.mxu0 %v7744_v51  ;;  %v7712_v51 = vcombine.low %v3249_v46, %v3253_v47  ;;  %v7833_v59 = vcombine.high %v3369_v38, %v3373_v5  ;;  %v3233_v11 = vld [vmem:[#allocation8] sm:$0xff] }
 0x1ec   :  { %6391 = vmatpush1.bf16.msra.mxu1 %v7872_v7  ;;  %v2704_v18 = vpop.f32.mrf.mxu0  ;;  %6351 = vmatprep.subr.bf16.mxu0 %v7737_v8  ;;  %v7705_v7 = vcombine.high %v3241_v16, %v3245_v2  ;;  %v3081_v8 = vadd.bf16 1068908470, %v3073_v0  ;;  %v3137_v12 = vsub.bf16 0, %v3129_v3  ;;  %v7832_v15 = vcombine.low %v3369_v38, %v3373_v5  ;;  %v3481_v29 = vld [vmem:[#allocation8 + $0x7c0] sm:$0xff] }
 0x1ed   :  { %v3011_v24 = vand.u32 2147483647, %v3003_v27  ;;  %v2745_v26 = vpop.f32.mrf.mxu1  ;;  %6392 = vmatprep.subr.bf16.mxu1 %v7865_v9  ;;  %v3004_v33 = vmul.f32 0.70710677, %v8648_v14  ;;  %v7704_v27 = vcombine.low %v3241_v16, %v3245_v2  ;;  %v3485_v32 = vld [vmem:[#allocation8 + $0x7e0] sm:$0xff] }
 0x1ee   :  { %v3089_v18 = vmul.bf16 %v3081_v8, %v8643_v10  ;;  %v3146_v26 = vmul.bf16 1069105081, %v3137_v12  ;;  %v3345_v43 = vld [vmem:[#allocation8 + $0x380] sm:$0xff] }
 0x1ef   :  { %v3019_v37 = vmul.f32 0.3275911, %v3011_v24  ;;  %6352 = vmatpush1.bf16.msra.mxu0 %v7736_v17  ;;  %v3012_v40 = vand.u32 2147483647, %v3004_v33  ;;  %v3051_v4 = vpack.c.bf16 %v3011_v24, %v3011_v24  ;;  %v7697_v17 = vcombine.high %v3233_v11, %v3237_v62  ;;  %v3357_v24 = vld [vmem:[#allocation8 + $0x3e0] sm:$0xff] }
 0x1f0   :  { %6393 = vmatpush1.bf16.msra.mxu1 %v7864_v21  ;;  %6353 = vmatprep.subr.bf16.mxu0 %v7729_v22  ;;  %v7825_v22 = vcombine.high %v3361_v30, %v3365_v13  ;;  %v7696_v33 = vcombine.low %v3233_v11, %v3237_v62  ;;  %v3473_v46 = vld [vmem:[#allocation8 + $0x780] sm:$0xff]  ;;  %v7816_v52 = vcombine.low %v3353_v23, %v3357_v24 }
 0x1f1   :  { %v3027_v58 = vadd.f32 1.0, %v3019_v37  ;;  %6394 = vmatprep.subr.bf16.mxu1 %v7857_v28  ;;  %v3020_v49 = vmul.f32 0.3275911, %v3012_v40  ;;  %v3052_v9 = vpack.c.bf16 %v3012_v40, %v3012_v40  ;;  %v3131_v31 = vmul.bf16 %v3051_v4, %v3051_v4  ;;  %v3477_v47 = vld [vmem:[#allocation8 + $0x7a0] sm:$0xff] }
 0x1f2   :  { %v7817_v37 = vcombine.high %v3353_v23, %v3357_v24  ;;  %v3337_v16 = vld [vmem:[#allocation8 + $0x340] sm:$0xff] }
 0x1f3   :  { %8228 = vrcp.f32 %v3027_v58  ;;  %6354 = vmatpush1.bf16.msra.mxu0 %v7728_v39  ;;  %v3028_v57 = vadd.f32 1.0, %v3020_v49  ;;  %v3132_v21 = vmul.bf16 %v3052_v9, %v3052_v9  ;;  %v3139_v28 = vsub.bf16 0, %v3131_v31  ;;  %v3349_v58 = vld [vmem:[#allocation8 + $0x3a0] sm:$0xff] }
 0x1f4   :  { %6395 = vmatpush1.bf16.msra.mxu1 %v7856_v41  ;;  %6355 = vmatprep.subr.bf16.mxu0 %v7721_v42  ;;  %v3097_v39 = vadd.bf16 3197288082, %v3089_v18  ;;  %v7945_v42 = vcombine.high %v3481_v29, %v3485_v32  ;;  %v3341_v2 = vld [vmem:[#allocation8 + $0x360] sm:$0xff] }
 0x1f5   :  { %6396 = vmatprep.subr.bf16.mxu1 %v7849_v45  ;;  %8230 = vrcp.f32 %v3028_v57  ;;  %v3140_v41 = vsub.bf16 0, %v3132_v21  ;;  %v3152_v45 = vmul.bf16 1069105081, %v3139_v28  ;;  %v7809_v57 = vcombine.high %v3345_v43, %v3349_v58  ;;  %v3465_v4 = vld [vmem:[#allocation8 + $0x740] sm:$0xff] }
 0x1f6   :  { %8232 = vpow.bf16 %v3146_v26  ;;  %v3469_v38 = vld [vmem:[#allocation8 + $0x760] sm:$0xff]  ;;  %v7801_v8 = vcombine.high %v3337_v16, %v3341_v2 }
 0x1f7   :  { %6356 = vmatpush1.bf16.msra.mxu0 %v7720_v56  ;;  %v7944_v56 = vcombine.low %v3481_v29, %v3485_v32  ;;  %v3155_v0 = vmul.bf16 1069105081, %v3140_v41  ;;  %8234 = vpow.bf16 %v3152_v45  ;;  %v7929_v11 = vcombine.high %v3465_v4, %v3469_v38  ;;  %v3329_v62 = vld [vmem:[#allocation8 + $0x300] sm:$0xff] }
 0x1f8   :  { %6397 = vmatpush1.bf16.msra.mxu1 %v7848_v63  ;;  %6357 = vmatprep.subr.bf16.mxu0 %v7713_v19  ;;  %v3105_v63 = vmul.bf16 %v3097_v39, %v8643_v10  ;;  %v3333_v12 = vld [vmem:[#allocation8 + $0x320] sm:$0xff]  ;;  %v7928_v18 = vcombine.low %v3465_v4, %v3469_v38 }
 0x1f9   :  { %6398 = vmatprep.subr.bf16.mxu1 %v7841_v1  ;;  %v7937_v1 = vcombine.high %v3473_v46, %v3477_v47  ;;  %8236 = vpow.bf16 %v3155_v0  ;;  %v3457_v30 = vld [vmem:[#allocation8 + $0x700] sm:$0xff]  ;;  %v7793_v21 = vcombine.high %v3329_v62, %v3333_v12 }
 0x1fa   :  { %v3113_v9 = vadd.bf16 1048723074, %v3105_v63  ;;  %v3461_v13 = vld [vmem:[#allocation8 + $0x720] sm:$0xff] }
 0x1fb   :  { %6358 = vmatpush1.bf16.msra.mxu0 %v7712_v51  ;;  %v7808_v51 = vcombine.low %v3345_v43, %v3349_v58  ;;  %v7921_v24 = vcombine.high %v3457_v30, %v3461_v13  ;;  %v3321_v26 = vld [vmem:[#allocation8 + $0x2c0] sm:$0xff]  ;;  %v7920_v41 = vcombine.low %v3457_v30, %v3461_v13 }
 0x1fc   :  { %6399 = vmatpush1.bf16.msra.mxu1 %v7840_v6  ;;  %6359 = vmatprep.subr.bf16.mxu0 %v7705_v7  ;;  %v7936_v7 = vcombine.low %v3473_v46, %v3477_v47  ;;  %v3325_v28 = vld [vmem:[#allocation8 + $0x2e0] sm:$0xff] }
 0x1fd   :  { %6400 = vmatprep.subr.bf16.mxu1 %v7833_v59  ;;  %v3449_v32 = vld [vmem:[#allocation8 + $0x6c0] sm:$0xff] }
 0x1fe   :  { %v3313_v45 = vld [vmem:[#allocation8 + $0x280] sm:$0xff] }
 0x1ff   :  { %6360 = vmatpush1.bf16.msra.mxu0 %v7704_v27  ;;  %v3317_v46 = vld [vmem:[#allocation8 + $0x2a0] sm:$0xff] }
 0x200   :  { %v8229_v34 = vpop.eup %8228  ;;  %6401 = vmatpush1.bf16.msra.mxu1 %v7832_v15  ;;  %6361 = vmatprep.subr.bf16.mxu0 %v7697_v17  ;;  %v7800_v15 = vcombine.low %v3337_v16, %v3341_v2  ;;  %v7777_v0 = vcombine.high %v3313_v45, %v3317_v46  ;;  %v3309_v4 = vld [vmem:[#allocation8 + $0x260] sm:$0xff] }
 0x201   :  { %v8656_v40 = vpack.c.bf16 %v8229_v34, %v8229_v34  ;;  %6402 = vmatprep.subr.bf16.mxu1 %v7825_v22  ;;  %v3121_v22 = vmul.bf16 %v3113_v9, %v8643_v10  ;;  %v2993_v9 = vpack.c.bf16 %v8600_v50, %v8600_v50  ;;  %v3297_v30 = vld [vmem:[#allocation8 + $0x200] sm:$0xff] }
 0x202   :  { %v8231_v48 = vpop.eup %8230  ;;  %v3301_v13 = vld [vmem:[#allocation8 + $0x220] sm:$0xff] }
 0x203   :  { %v3059_v49 = vmul.bf16 1065893768, %v8656_v40  ;;  %6362 = vmatpush1.bf16.msra.mxu0 %v7696_v33  ;;  %v8659_v54 = vpack.c.bf16 %v8231_v48, %v8231_v48  ;;  %v3453_v33 = vld [vmem:[#allocation8 + $0x6e0] sm:$0xff]  ;;  %vm3185_vm1 = vcmp.ge.bf16.partialorder %v2993_v9, 0 }
 0x204   :  { %6403 = vmatpush1.bf16.msra.mxu1 %v7824_v36  ;;  %6363 = vmatprep.subr.bf16.mxu0 %v7817_v37  ;;  %v7792_v36 = vcombine.low %v3329_v62, %v3333_v12  ;;  %v8233_v37 = vpop.eup %8232  ;;  %v7913_v58 = vcombine.high %v3449_v32, %v3453_v33  ;;  %v3441_v48 = vld [vmem:[#allocation8 + $0x680] sm:$0xff]  ;;  %v2995_v12 = vpack.c.bf16 %v8645_v20, %v8645_v20 }
 0x205   :  { %v3067_v19 = vadd.bf16 3216687034, %v3059_v49  ;;  %6404 = vmatprep.subr.bf16.mxu1 %v7945_v42  ;;  %v3060_v3 = vmul.bf16 1065893768, %v8659_v54  ;;  %v7785_v42 = vcombine.high %v3321_v26, %v3325_v28  ;;  %v3169_v10 = vmul.bf16 %v8233_v37, %v3121_v22  ;;  %v3445_v49 = vld [vmem:[#allocation8 + $0x6a0] sm:$0xff] }
 0x206   :  { %v7905_v2 = vcombine.high %v3441_v48, %v3445_v49  ;;  %vm3187_vm2 = vcmp.ge.bf16.partialorder %v2995_v12, 0  ;;  %v7760_v37 = vcombine.low %v3297_v30, %v3301_v13 }
 0x207   :  { %v3075_v5 = vmul.bf16 %v3067_v19, %v8656_v40  ;;  %6364 = vmatpush2.bf16.msra.mxu0 %v7816_v52  ;;  %v3068_v6 = vadd.bf16 3216687034, %v3060_v3  ;;  %v7912_v19 = vcombine.low %v3449_v32, %v3453_v33  ;;  %v3305_v3 = vld [vmem:[#allocation8 + $0x240] sm:$0xff] }
 0x208   :  { %6405 = vmatpush2.bf16.msra.mxu1 %v7944_v56  ;;  %6365 = vmatprep.subr.bf16.mxu0 %v7809_v57  ;;  %v7784_v56 = vcombine.low %v3321_v26, %v3325_v28  ;;  %v8235_v57 = vpop.eup %8234  ;;  %v3549_v32 = vld [vmem:[#allocation8 + $0x9e0] sm:$0xff] }
 0x209   :  { %v3083_v59 = vadd.bf16 1068908470, %v3075_v5  ;;  %6406 = vmatprep.subr.bf16.mxu1 %v7937_v1  ;;  %v3076_v31 = vmul.bf16 %v3068_v6, %v8659_v54  ;;  %v3177_v1 = vsub.bf16 1065369472, %v3169_v10  ;;  %v3433_v5 = vld [vmem:[#allocation8 + $0x640] sm:$0xff]  ;;  %v8237_v6 = vpop.eup %8236 }
 0x20b   :  { %v3091_v27 = vmul.bf16 %v3083_v59, %v8656_v40  ;;  %6366 = vmatpush2.bf16.msra.mxu0 %v7808_v51  ;;  %v3084_v17 = vadd.bf16 1068908470, %v3076_v31  ;;  %v3437_v51 = vld [vmem:[#allocation8 + $0x660] sm:$0xff]  ;;  %v3193_v62 = vsub.bf16 0, %v3177_v1 }
 0x20c   :  { %6407 = vmatpush2.bf16.msra.mxu1 %v7936_v7  ;;  %6367 = vmatprep.subr.bf16.mxu0 %v7801_v8  ;;  %v7776_v7 = vcombine.low %v3313_v45, %v3317_v46  ;;  %v7904_v8 = vcombine.low %v3441_v48, %v3445_v49  ;;  %v7897_v31 = vcombine.high %v3433_v5, %v3437_v51  ;;  %v3673_v48 = vld [vmem:[#allocation8 + $0xdc0] sm:$0xff] }
 0x20d   :  { %v3099_v23 = vadd.bf16 3197288082, %v3091_v27  ;;  %6408 = vmatprep.subr.bf16.mxu1 %v7929_v11  ;;  %v3092_v29 = vmul.bf16 %v3084_v17, %v8659_v54  ;;  %v7769_v11 = vcombine.high %v3305_v3, %v3309_v4  ;;  %v3425_v17 = vld [vmem:[#allocation8 + $0x600] sm:$0xff]  ;;  %v3201_v26 = vsel %vm3185_vm1, %v3177_v1, %v3193_v62 }
 0x20e   :  { %v3217_v10 = vadd.bf16 1065369472, %v3201_v26  ;;  %v3677_v49 = vld [vmem:[#allocation8 + $0xde0] sm:$0xff] }
 0x20f   :  { %v3107_v34 = vmul.bf16 %v3099_v23, %v8656_v40  ;;  %6368 = vmatpush2.bf16.msra.mxu0 %v7800_v15  ;;  %v3100_v39 = vadd.bf16 3197288082, %v3092_v29  ;;  %v7896_v23 = vcombine.low %v3433_v5, %v3437_v51  ;;  %v3545_v29 = vld [vmem:[#allocation8 + $0x9c0] sm:$0xff] }
 0x210   :  { %6409 = vmatpush2.bf16.msra.mxu1 %v7928_v18  ;;  %6369 = vmatprep.subr.bf16.mxu0 %v7793_v21  ;;  %v3429_v18 = vld [vmem:[#allocation8 + $0x620] sm:$0xff]  ;;  %v7768_v21 = vcombine.low %v3305_v3, %v3309_v4  ;;  %v8136_v3 = vcombine.low %v3673_v48, %v3677_v49 }
 0x211   :  { %v3115_v43 = vadd.bf16 1048723074, %v3107_v34  ;;  %6410 = vmatprep.subr.bf16.mxu1 %v7921_v24  ;;  %v3108_v47 = vmul.bf16 %v3100_v39, %v8659_v54  ;;  %v7761_v24 = vcombine.high %v3297_v30, %v3301_v13  ;;  %v7889_v28 = vcombine.high %v3425_v17, %v3429_v18  ;;  %v3665_v5 = vld [vmem:[#allocation8 + $0xd80] sm:$0xff] }
 0x212   :  { %v3669_v51 = vld [vmem:[#allocation8 + $0xda0] sm:$0xff] }
 0x213   :  { %v3123_v52 = vmul.bf16 %v3115_v43, %v8656_v40  ;;  %6370 = vmatpush2.bf16.msra.mxu0 %v7792_v36  ;;  %v3116_v63 = vadd.bf16 1048723074, %v3108_v47  ;;  %v8009_v43 = vcombine.high %v3545_v29, %v3549_v32  ;;  %v3541_v47 = vld [vmem:[#allocation8 + $0x9a0] sm:$0xff] }
 0x214   :  { %6411 = vmatpush2.bf16.msra.mxu1 %v7920_v41  ;;  %6371 = vmatprep.subr.bf16.mxu0 %v7785_v42  ;;  %v8679_v41 = vsub.s32 4, %v8576_v44  ;;  %v7888_v42 = vcombine.low %v3425_v17, %v3429_v18  ;;  %v3521_v62 = vld [vmem:[#allocation8 + $0x900] sm:$0xff] }
 0x215   :  { %v3171_v16 = vmul.bf16 %v8235_v57, %v3123_v52  ;;  %6412 = vmatprep.subr.bf16.mxu1 %v7913_v58  ;;  %v3124_v38 = vmul.bf16 %v3116_v63, %v8659_v54  ;;  %v2996_v54 = vpack.c.bf16 %v8648_v14, %v8648_v14  ;;  %v3537_v58 = vld [vmem:[#allocation8 + $0x980] sm:$0xff]  ;;  %v3209_v52 = vmul.bf16 1056980736, %v2993_v9  ;;  %v8684_v63 = vld [vmem:[#allocation7] sm:$0xff] }
 0x216   :  { %v3211_v57 = vmul.bf16 1056980736, %v2995_v12  ;;  %v8000_v9 = vcombine.low %v3537_v58, %v3541_v47  ;;  %v8128_v12 = vcombine.low %v3665_v5, %v3669_v51  ;;  %v3525_v30 = vld [vmem:[#allocation8 + $0x920] sm:$0xff] }
 0x217   :  { %v3179_v40 = vsub.bf16 1065369472, %v3171_v16  ;;  %6372 = vmatpush2.bf16.msra.mxu0 %v7784_v56  ;;  %v3172_v59 = vmul.bf16 %v8237_v6, %v3124_v38  ;;  %vm3188_vm3 = vcmp.ge.bf16.partialorder %v2996_v54, 0  ;;  %v3212_v36 = vmul.bf16 1056980736, %v2996_v54  ;;  %v3533_v38 = vld [vmem:[#allocation8 + $0x960] sm:$0xff] }
 0x218   :  { %6413 = vmatpush2.bf16.msra.mxu1 %v7912_v19  ;;  %6373 = vmatprep.subr.bf16.mxu0 %v7777_v0  ;;  %v8137_v56 = vcombine.high %v3673_v48, %v3677_v49  ;;  %v560_v19 = vrot.slane %v8684_v63, %v8679_v41  ;;  %v8008_v0 = vcombine.low %v3545_v29, %v3549_v32  ;;  %v3657_v13 = vld [vmem:[#allocation8 + $0xd40] sm:$0xff] }
 0x219   :  { %6414 = vmatprep.subr.bf16.mxu1 %v7905_v2  ;;  %v3195_v27 = vsub.bf16 0, %v3179_v40  ;;  %v3180_v15 = vsub.bf16 1065369472, %v3172_v59  ;;  %v8688_v1 = vmul.bf16 %v3217_v10, %v3209_v52  ;;  %v8001_v16 = vcombine.high %v3537_v58, %v3541_v47  ;;  %v3529_v2 = vld [vmem:[#allocation8 + $0x940] sm:$0xff] }
 0x21a   :  { %v3517_v29 = vld [vmem:[#allocation8 + $0x8e0] sm:$0xff] }
 0x21b   :  { %6374 = vmatpush2.bf16.msra.mxu0 %v7776_v7  ;;  %v3196_v22 = vsub.bf16 0, %v3180_v15  ;;  %v3203_v33 = vsel %vm3187_vm2, %v3179_v40, %v3195_v27  ;;  %v8129_v40 = vcombine.high %v3665_v5, %v3669_v51  ;;  %v3661_v27 = vld [vmem:[#allocation8 + $0xd60] sm:$0xff] }
 0x21c   :  { %6415 = vmatpush2.bf16.msra.mxu1 %v7904_v8  ;;  %6375 = vmatprep.subr.bf16.mxu0 %v7769_v11  ;;  %v3219_v46 = vadd.bf16 1065369472, %v3203_v33  ;;  %v7993_v11 = vcombine.high %v3529_v2, %v3533_v38  ;;  %v8121_v17 = vcombine.high %v3657_v13, %v3661_v27  ;;  %v8120_v26 = vcombine.low %v3657_v13, %v3661_v27  ;;  %v3649_v32 = vld [vmem:[#allocation8 + $0xd00] sm:$0xff] }
 0x21d   :  { %6416 = vmatprep.subr.bf16.mxu1 %v7897_v31  ;;  %v3204_v34 = vsel %vm3188_vm3, %v3180_v15, %v3196_v22  ;;  %v3653_v33 = vld [vmem:[#allocation8 + $0xd20] sm:$0xff] }
 0x21e   :  { %v3220_v39 = vadd.bf16 1065369472, %v3204_v34  ;;  %v8690_v4 = vmul.bf16 %v3219_v46, %v3211_v57  ;;  %v8113_v34 = vcombine.high %v3649_v32, %v3653_v33  ;;  %v3509_v10 = vld [vmem:[#allocation8 + $0x8a0] sm:$0xff] }
 0x21f   :  { %6376 = vmatpush2.bf16.msra.mxu0 %v7768_v21  ;;  %v7992_v21 = vcombine.low %v3529_v2, %v3533_v38  ;;  %v3645_v58 = vld [vmem:[#allocation8 + $0xce0] sm:$0xff] }
 0x220   :  { %6417 = vmatpush2.bf16.msra.mxu1 %v7896_v23  ;;  %6377 = vmatprep.subr.bf16.mxu0 %v7761_v24  ;;  %v8681_v45 = vmul.bf16 %v3220_v39, %v3212_v36  ;;  %v7985_v23 = vcombine.high %v3521_v62, %v3525_v30  ;;  %v3513_v24 = vld [vmem:[#allocation8 + $0x8c0] sm:$0xff]  ;;  %v7984_v36 = vcombine.low %v3521_v62, %v3525_v30 }
 0x221   :  { %6418 = vmatprep.subr.bf16.mxu1 %v7889_v28  ;;  %v3505_v39 = vld [vmem:[#allocation8 + $0x880] sm:$0xff]  ;;  %v7976_v47 = vcombine.low %v3513_v24, %v3517_v29 }
 0x222   :  { %6420 = vmatprep.mubr.bf16.mxu1 %v8681_v45  ;;  %v7969_v48 = vcombine.high %v3505_v39, %v3509_v10  ;;  %v3497_v49 = vld [vmem:[#allocation8 + $0x840] sm:$0xff] }
 0x223   :  { %6378 = vmatpush2.bf16.msra.mxu0 %v7760_v37  ;;  %v7977_v37 = vcombine.high %v3513_v24, %v3517_v29  ;;  %v3633_v57 = vld [vmem:[#allocation8 + $0xc80] sm:$0xff] }
 0x224   :  { %6419 = vmatpush2.bf16.msra.mxu1 %v7888_v42  ;;  %6429 = vmatprep.subr.bf16.mxu0 %v8009_v43  ;;  %v8112_v42 = vcombine.low %v3649_v32, %v3653_v33  ;;  %v3641_v43 = vld [vmem:[#allocation8 + $0xcc0] sm:$0xff] }
 0x225   :  { %6470 = vmatprep.subr.bf16.mxu1 %v8137_v56  ;;  %v8105_v46 = vcombine.high %v3641_v43, %v3645_v58  ;;  %v8104_v52 = vcombine.low %v3641_v43, %v3645_v58  ;;  %v3501_v56 = vld [vmem:[#allocation8 + $0x860] sm:$0xff] }
 0x226   :  { %v2781_v6 = vpop.f32.mrf.mxu0  ;;  %6380 = vmatmul.mubr.bf16.vlgmr.msra.gmra.mxu0 %v8688_v1  ;;  %v7961_v2 = vcombine.high %v3497_v49, %v3501_v56  ;;  %v3493_v5 = vld [vmem:[#allocation8 + $0x820] sm:$0xff] }
 0x227   :  { %v2782_v7 = vadd.f32 %v2781_v6, %v560_v19  ;;  %v2822_v8 = vpop.f32.mrf.mxu1  ;;  %6421 = vmatmul.mubr.bf16.vlgmr.msra.gmra.mxu1 %v8690_v4  ;;  %6430 = vmatpush1.bf16.msra.mxu0 %v8008_v0  ;;  %v3637_v19 = vld [vmem:[#allocation8 + $0xca0] sm:$0xff] }
 0x228   :  { %v8694_v59 = vpop.f32.mrf.mxu0  ;;  %6431 = vmatprep.subr.bf16.mxu0 %v8001_v16  ;;  %6471 = vmatpush1.bf16.msra.mxu1 %v8136_v3  ;;  %v8097_v0 = vcombine.high %v3633_v57, %v3637_v19  ;;  %v7968_v16 = vcombine.low %v3505_v39, %v3509_v10  ;;  %v3489_v3 = vld [vmem:[#allocation8 + $0x800] sm:$0xff]  ;;  %v8096_v38 = vcombine.low %v3633_v57, %v3637_v19 }
 0x229   :  { %v8696_v54 = vadd.f32 %v2822_v8, %v2782_v7  ;;  %v8698_v31 = vpop.f32.mrf.mxu1  ;;  %6472 = vmatprep.subr.bf16.mxu1 %v8129_v40  ;;  %v3625_v51 = vld [vmem:[#allocation8 + $0xc40] sm:$0xff]  ;;  %v7960_v7 = vcombine.low %v3497_v49, %v3501_v56  ;;  %v7953_v8 = vcombine.high %v3489_v3, %v3493_v5  ;;  %v7952_v27 = vcombine.low %v3489_v3, %v3493_v5 }
 0x22a   :  { %v2785_v15 = vpop.f32.mrf.mxu0  ;;  %v3629_v6 = vld [vmem:[#allocation8 + $0xc60] sm:$0xff] }
 0x22b   :  { %v2826_v18 = vpop.f32.mrf.mxu1  ;;  %6432 = vmatpush1.bf16.msra.mxu0 %v8000_v9  ;;  %v8089_v40 = vcombine.high %v3625_v51, %v3629_v6  ;;  %v3609_v9 = vld [vmem:[#allocation8 + $0xbc0] sm:$0xff] }
 0x22c   :  { %v2786_v22 = vpop.f32.mrf.mxu0  ;;  %6433 = vmatprep.subr.bf16.mxu0 %v7993_v11  ;;  %6473 = vmatpush1.bf16.msra.mxu1 %v8128_v12  ;;  %v8088_v11 = vcombine.low %v3625_v51, %v3629_v6  ;;  %v3613_v62 = vld [vmem:[#allocation8 + $0xbe0] sm:$0xff] }
 0x22d   :  { %v2827_v28 = vpop.f32.mrf.mxu1  ;;  %6474 = vmatprep.subr.bf16.mxu1 %v8121_v17  ;;  %v3617_v12 = vld [vmem:[#allocation8 + $0xc00] sm:$0xff]  ;;  %v8073_v15 = vcombine.high %v3609_v9, %v3613_v62 }
 0x22e   :  { %v3621_v30 = vld [vmem:[#allocation8 + $0xc20] sm:$0xff] }
 0x22f   :  { %6434 = vmatpush1.bf16.msra.mxu0 %v7992_v21  ;;  %v8081_v13 = vcombine.high %v3617_v12, %v3621_v30  ;;  %v3601_v17 = vld [vmem:[#allocation8 + $0xb80] sm:$0xff]  ;;  %v8080_v18 = vcombine.low %v3617_v12, %v3621_v30 }
 0x230   :  { %6435 = vmatprep.subr.bf16.mxu0 %v7985_v23  ;;  %6475 = vmatpush1.bf16.msra.mxu1 %v8120_v26  ;;  %v3605_v21 = vld [vmem:[#allocation8 + $0xba0] sm:$0xff]  ;;  %v8072_v26 = vcombine.low %v3609_v9, %v3613_v62 }
 0x231   :  { %6476 = vmatprep.subr.bf16.mxu1 %v8113_v34  ;;  %v3737_v22 = vld [vmem:[#allocation8 + $0xfc0] sm:$0xff]  ;;  %v8065_v28 = vcombine.high %v3601_v17, %v3605_v21  ;;  %v8064_v39 = vcombine.low %v3601_v17, %v3605_v21 }
 0x232   :  { %v3741_v23 = vld [vmem:[#allocation8 + $0xfe0] sm:$0xff] }
 0x233   :  { %6436 = vmatpush1.bf16.msra.mxu0 %v7984_v36  ;;  %v8201_v24 = vcombine.high %v3737_v22, %v3741_v23  ;;  %v3593_v29 = vld [vmem:[#allocation8 + $0xb40] sm:$0xff]  ;;  %v8200_v32 = vcombine.low %v3737_v22, %v3741_v23 }
 0x234   :  { %6437 = vmatprep.subr.bf16.mxu0 %v7977_v37  ;;  %6477 = vmatpush1.bf16.msra.mxu1 %v8112_v42  ;;  %v3597_v33 = vld [vmem:[#allocation8 + $0xb60] sm:$0xff] }
 0x235   :  { %6478 = vmatprep.subr.bf16.mxu1 %v8105_v46  ;;  %v3729_v34 = vld [vmem:[#allocation8 + $0xf80] sm:$0xff]  ;;  %v8057_v42 = vcombine.high %v3593_v29, %v3597_v33  ;;  %v8056_v49 = vcombine.low %v3593_v29, %v3597_v33  ;;  %v8701_v29 = vsub.s32 5, %v8576_v44 }
 0x236   :  { %v3733_v36 = vld [vmem:[#allocation8 + $0xfa0] sm:$0xff] }
 0x237   :  { %6438 = vmatpush1.bf16.msra.mxu0 %v7976_v47  ;;  %v8193_v37 = vcombine.high %v3729_v34, %v3733_v36  ;;  %v3585_v10 = vld [vmem:[#allocation8 + $0xb00] sm:$0xff]  ;;  %v8192_v43 = vcombine.low %v3729_v34, %v3733_v36  ;;  %v8703_v34 = vld [vmem:[#allocation8 + $0x1c8] sm:$0xff] }
 0x238   :  { %6439 = vmatprep.subr.bf16.mxu0 %v7969_v48  ;;  %6479 = vmatpush1.bf16.msra.mxu1 %v8104_v52  ;;  %v3589_v58 = vld [vmem:[#allocation8 + $0xb20] sm:$0xff] }
 0x239   :  { %6480 = vmatprep.subr.bf16.mxu1 %v8097_v0  ;;  %v3721_v46 = vld [vmem:[#allocation8 + $0xf40] sm:$0xff]  ;;  %v8049_v52 = vcombine.high %v3585_v10, %v3589_v58  ;;  %v8048_v3 = vcombine.low %v3585_v10, %v3589_v58 }
 0x23a   :  { %v3725_v47 = vld [vmem:[#allocation8 + $0xf60] sm:$0xff] }
 0x23b   :  { %6440 = vmatpush1.bf16.msra.mxu0 %v7968_v16  ;;  %v8185_v48 = vcombine.high %v3721_v46, %v3725_v47  ;;  %v3577_v56 = vld [vmem:[#allocation8 + $0xac0] sm:$0xff]  ;;  %v8184_v57 = vcombine.low %v3721_v46, %v3725_v47 }
 0x23c   :  { %6441 = vmatprep.subr.bf16.mxu0 %v7961_v2  ;;  %6481 = vmatpush1.bf16.msra.mxu1 %v8096_v38  ;;  %v3581_v19 = vld [vmem:[#allocation8 + $0xae0] sm:$0xff] }
 0x23d   :  { %6482 = vmatprep.subr.bf16.mxu1 %v8089_v40  ;;  %v3713_v0 = vld [vmem:[#allocation8 + $0xf00] sm:$0xff]  ;;  %v8041_v38 = vcombine.high %v3577_v56, %v3581_v19  ;;  %v8040_v9 = vcombine.low %v3577_v56, %v3581_v19 }
 0x23e   :  { %v3717_v16 = vld [vmem:[#allocation8 + $0xf20] sm:$0xff] }
 0x23f   :  { %6442 = vmatpush1.bf16.msra.mxu0 %v7960_v7  ;;  %v8177_v2 = vcombine.high %v3713_v0, %v3717_v16  ;;  %v3569_v5 = vld [vmem:[#allocation8 + $0xa80] sm:$0xff]  ;;  %v8176_v51 = vcombine.low %v3713_v0, %v3717_v16 }
 0x240   :  { %6443 = vmatprep.subr.bf16.mxu0 %v7953_v8  ;;  %6483 = vmatpush1.bf16.msra.mxu1 %v8088_v11  ;;  %v3573_v6 = vld [vmem:[#allocation8 + $0xaa0] sm:$0xff] }
 0x241   :  { %6484 = vmatprep.subr.bf16.mxu1 %v8081_v13  ;;  %v3705_v40 = vld [vmem:[#allocation8 + $0xec0] sm:$0xff]  ;;  %v8033_v11 = vcombine.high %v3569_v5, %v3573_v6  ;;  %v8032_v17 = vcombine.low %v3569_v5, %v3573_v6 }
 0x242   :  { %v3709_v7 = vld [vmem:[#allocation8 + $0xee0] sm:$0xff] }
 0x243   :  { %6444 = vmatpush1.bf16.msra.mxu0 %v7952_v27  ;;  %v8169_v8 = vcombine.high %v3705_v40, %v3709_v7  ;;  %v3561_v62 = vld [vmem:[#allocation8 + $0xa40] sm:$0xff]  ;;  %v8168_v12 = vcombine.low %v3705_v40, %v3709_v7 }
 0x244   :  { %6445 = vmatprep.subr.bf16.mxu0 %v8073_v15  ;;  %6485 = vmatpush1.bf16.msra.mxu1 %v8080_v18  ;;  %v3565_v30 = vld [vmem:[#allocation8 + $0xa60] sm:$0xff] }
 0x245   :  { %6486 = vmatprep.subr.bf16.mxu1 %v8201_v24  ;;  %v3697_v13 = vld [vmem:[#allocation8 + $0xe80] sm:$0xff]  ;;  %v8025_v18 = vcombine.high %v3561_v62, %v3565_v30 }
 0x246   :  { %v3701_v27 = vld [vmem:[#allocation8 + $0xea0] sm:$0xff] }
 0x247   :  { %6446 = vmatpush2.bf16.msra.mxu0 %v8072_v26  ;;  %v8161_v15 = vcombine.high %v3697_v13, %v3701_v27  ;;  %v3553_v21 = vld [vmem:[#allocation8 + $0xa00] sm:$0xff]  ;;  %v8160_v22 = vcombine.low %v3697_v13, %v3701_v27 }
 0x248   :  { %6447 = vmatprep.subr.bf16.mxu0 %v8065_v28  ;;  %6487 = vmatpush2.bf16.msra.mxu1 %v8200_v32  ;;  %v3557_v23 = vld [vmem:[#allocation8 + $0xa20] sm:$0xff]  ;;  %v8024_v32 = vcombine.low %v3561_v62, %v3565_v30 }
 0x249   :  { %6488 = vmatprep.subr.bf16.mxu1 %v8193_v37  ;;  %v3689_v24 = vld [vmem:[#allocation8 + $0xe40] sm:$0xff]  ;;  %v8017_v33 = vcombine.high %v3553_v21, %v3557_v23  ;;  %v8705_v37 = vld [vmem:[#allocation8 + $0x1e8] sm:$0xff]  ;;  %v8016_v58 = vcombine.low %v3553_v21, %v3557_v23 }
 0x24a   :  { %v3693_v26 = vld [vmem:[#allocation8 + $0xe60] sm:$0xff]  ;;  %v7755_v46 = vcombine.high %v8703_v34, %v8705_v37 }
 0x24b   :  { %6448 = vmatpush2.bf16.msra.mxu0 %v8064_v39  ;;  %v8153_v28 = vcombine.high %v3689_v24, %v3693_v26  ;;  %v8152_v36 = vcombine.low %v3689_v24, %v3693_v26  ;;  %v3681_v39 = vld [vmem:[#allocation8 + $0xe00] sm:$0xff] }
 0x24c   :  { %6449 = vmatprep.subr.bf16.mxu0 %v8057_v42  ;;  %6489 = vmatpush2.bf16.msra.mxu1 %v8192_v43  ;;  %v3685_v42 = vld [vmem:[#allocation8 + $0xe20] sm:$0xff]  ;;  %v564_v43 = vrot.slane %v8684_v63, %v8701_v29 }
 0x24d   :  { %6490 = vmatprep.subr.bf16.mxu1 %v8185_v48  ;;  %v8145_v10 = vcombine.high %v3681_v39, %v3685_v42  ;;  %v8144_v47 = vcombine.low %v3681_v39, %v3685_v42  ;;  %v8711_v48 = vld [vmem:[#allocation8 + $0x5c8] sm:$0xff] }
 0x24e   :  { %v2784_v56 = vadd.f32 %v8694_v59, %v564_v43 }
 0x24f   :  { %6450 = vmatpush2.bf16.msra.mxu0 %v8056_v49  ;;  %v8713_v49 = vld [vmem:[#allocation8 + $0x5e8] sm:$0xff] }
 0x250   :  { %6451 = vmatprep.subr.bf16.mxu0 %v8049_v52  ;;  %6491 = vmatpush2.bf16.msra.mxu1 %v8184_v57  ;;  %v7883_v52 = vcombine.high %v8711_v48, %v8713_v49  ;;  %v7882_v57 = vcombine.low %v8711_v48, %v8713_v49  ;;  %v2825_v0 = vadd.f32 %v8698_v31, %v2784_v56  ;;  %v3514_v49 = vld [vmem:[#allocation8 + $0x8c8] sm:$0xff] }
 0x251   :  { %6492 = vmatprep.subr.bf16.mxu1 %v8177_v2 }
 0x253   :  { %6452 = vmatpush2.bf16.msra.mxu0 %v8048_v3 }
 0x254   :  { %6453 = vmatprep.subr.bf16.mxu0 %v8041_v38  ;;  %6493 = vmatpush2.bf16.msra.mxu1 %v8176_v51 }
 0x255   :  { %6494 = vmatprep.subr.bf16.mxu1 %v8169_v8 }
 0x257   :  { %6454 = vmatpush2.bf16.msra.mxu0 %v8040_v9 }
 0x258   :  { %6455 = vmatprep.subr.bf16.mxu0 %v8033_v11  ;;  %6495 = vmatpush2.bf16.msra.mxu1 %v8168_v12 }
 0x259   :  { %6496 = vmatprep.subr.bf16.mxu1 %v8161_v15 }
 0x25b   :  { %6456 = vmatpush2.bf16.msra.mxu0 %v8032_v17 }
 0x25c   :  { %6457 = vmatprep.subr.bf16.mxu0 %v8025_v18  ;;  %6497 = vmatpush2.bf16.msra.mxu1 %v8160_v22 }
 0x25d   :  { %6498 = vmatprep.subr.bf16.mxu1 %v8153_v28 }
 0x25f   :  { %6458 = vmatpush2.bf16.msra.mxu0 %v8024_v32 }
 0x260   :  { %6459 = vmatprep.subr.bf16.mxu0 %v8017_v33  ;;  %6499 = vmatpush2.bf16.msra.mxu1 %v8152_v36 }
 0x261   :  { %6500 = vmatprep.subr.bf16.mxu1 %v8145_v10 }
 0x263   :  { %6460 = vmatpush2.bf16.msra.mxu0 %v8016_v58 }
 0x264   :  { %6511 = vmatprep.subr.bf16.mxu0 %v7755_v46  ;;  %6501 = vmatpush2.bf16.msra.mxu1 %v8144_v47 }
 0x265   :  { %6552 = vmatprep.subr.bf16.mxu1 %v7883_v52 }
 0x266   :  { %v2863_v19 = vpop.f32.mrf.mxu0 }
 0x267   :  { %v8722_v16 = vadd.f32 %v2863_v19, %v8696_v54  ;;  %v8724_v2 = vpop.f32.mrf.mxu1 }
 0x268   :  { %v2865_v3 = vpop.f32.mrf.mxu0 }
 0x269   :  { %v3005_v38 = vmul.f32 0.70710677, %v8722_v16  ;;  %v8727_v5 = vadd.f32 %v2865_v3, %v2825_v0  ;;  %v8729_v59 = vpop.f32.mrf.mxu1 }
 0x26a   :  { %v2867_v51 = vpop.f32.mrf.mxu0 }
 0x26b   :  { %v3013_v6 = vand.u32 2147483647, %v3005_v38  ;;  %v2908_v40 = vpop.f32.mrf.mxu1  ;;  %v3006_v7 = vmul.f32 0.70710677, %v8727_v5 }
 0x26c   :  { %v2868_v8 = vpop.f32.mrf.mxu0 }
 0x26d   :  { %v3021_v9 = vmul.f32 0.3275911, %v3013_v6  ;;  %v2909_v31 = vpop.f32.mrf.mxu1  ;;  %v3014_v11 = vand.u32 2147483647, %v3006_v7  ;;  %v3053_v30 = vpack.c.bf16 %v3013_v6, %v3013_v6  ;;  %v2997_v7 = vpack.c.bf16 %v8722_v16, %v8722_v16 }
 0x26f   :  { %v3029_v54 = vadd.f32 1.0, %v3021_v9  ;;  %v3022_v62 = vmul.f32 0.3275911, %v3014_v11  ;;  %v3054_v13 = vpack.c.bf16 %v3014_v11, %v3014_v11  ;;  %v3133_v27 = vmul.bf16 %v3053_v30, %v3053_v30 }
 0x270   :  { %vm3189_vm4 = vcmp.ge.bf16.partialorder %v2997_v7, 0 }
 0x271   :  { %8238 = vrcp.f32 %v3029_v54  ;;  %v3030_v12 = vadd.f32 1.0, %v3022_v62  ;;  %v3134_v15 = vmul.bf16 %v3054_v13, %v3054_v13  ;;  %v3141_v17 = vsub.bf16 0, %v3133_v27 }
 0x272   :  { %v2998_v62 = vpack.c.bf16 %v8727_v5, %v8727_v5  ;;  %v8737_v27 = vsub.s32 6, %v8576_v44 }
 0x273   :  { %8240 = vrcp.f32 %v3030_v12  ;;  %v3142_v22 = vsub.bf16 0, %v3134_v15  ;;  %v3158_v23 = vmul.bf16 1069105081, %v3141_v17 }
 0x274   :  { %vm3190_vm5 = vcmp.ge.bf16.partialorder %v2998_v62, 0 }
 0x275   :  { %v3161_v33 = vmul.bf16 1069105081, %v3142_v22  ;;  %8242 = vpow.bf16 %v3158_v23  ;;  %v3282_v22 = vld [vmem:[#allocation8 + $0x188] sm:$0xff] }
 0x276   :  { %v3286_v23 = vld [vmem:[#allocation8 + $0x1a8] sm:$0xff] }
 0x277   :  { %8244 = vpow.bf16 %v3161_v33 }
 0x27e   :  { %v8239_v18 = vpop.eup %8238 }
 0x27f   :  { %v3045_v21 = vpack.c.bf16 %v8239_v18, %v8239_v18  ;;  %v3214_v18 = vmul.bf16 1056980736, %v2998_v62 }
 0x280   :  { %v8241_v24 = vpop.eup %8240 }
 0x281   :  { %v3061_v26 = vmul.bf16 1065893768, %v3045_v21  ;;  %v3046_v28 = vpack.c.bf16 %v8241_v24, %v8241_v24  ;;  %v3213_v24 = vmul.bf16 1056980736, %v2997_v7  ;;  %v3262_v7 = vld [vmem:[#allocation8 + $0xe8] sm:$0xff] }
 0x283   :  { %v3069_v32 = vadd.bf16 3216687034, %v3061_v26  ;;  %v3062_v36 = vmul.bf16 1065893768, %v3046_v28  ;;  %v8243_v51 = vpop.eup %8242  ;;  %v8740_v26 = vsub.s32 7, %v8576_v44 }
 0x285   :  { %v3077_v39 = vmul.bf16 %v3069_v32, %v3045_v21  ;;  %v3070_v42 = vadd.bf16 3216687034, %v3062_v36  ;;  %v8245_v9 = vpop.eup %8244  ;;  %v7754_v32 = vcombine.low %v8703_v34, %v8705_v37  ;;  %v7747_v36 = vcombine.high %v3282_v22, %v3286_v23 }
 0x286   :  { %v572_v44 = vrot.slane %v8684_v63, %v8740_v26 }
 0x287   :  { %v3085_v10 = vadd.bf16 1068908470, %v3077_v39  ;;  %v3078_v43 = vmul.bf16 %v3070_v42, %v3046_v28  ;;  %v568_v39 = vrot.slane %v8684_v63, %v8737_v27  ;;  %v3274_v42 = vld [vmem:[#allocation8 + $0x148] sm:$0xff] }
 0x289   :  { %v3093_v58 = vmul.bf16 %v3085_v10, %v3045_v21  ;;  %v3086_v46 = vadd.bf16 1068908470, %v3078_v43  ;;  %v3278_v10 = vld [vmem:[#allocation8 + $0x168] sm:$0xff]  ;;  %v7746_v43 = vcombine.low %v3282_v22, %v3286_v23  ;;  %v2905_v37 = vadd.f32 %v8724_v2, %v568_v39 }
 0x28a   :  { %v7739_v34 = vcombine.high %v3274_v42, %v3278_v10 }
 0x28b   :  { %v3101_v47 = vadd.bf16 3197288082, %v3093_v58  ;;  %v3094_v52 = vmul.bf16 %v3086_v46, %v3046_v28  ;;  %v3266_v58 = vld [vmem:[#allocation8 + $0x108] sm:$0xff] }
 0x28c   :  { %v3270_v46 = vld [vmem:[#allocation8 + $0x128] sm:$0xff] }
 0x28d   :  { %v3109_v56 = vmul.bf16 %v3101_v47, %v3045_v21  ;;  %v3102_v19 = vadd.bf16 3197288082, %v3094_v52  ;;  %v2907_v52 = vadd.f32 %v8729_v59, %v572_v44  ;;  %v7731_v63 = vcombine.high %v3266_v58, %v3270_v46  ;;  %v3234_v44 = vld [vmem:[#allocation8 + $0x8] sm:$0xff] }
 0x28f   :  { %v3117_v0 = vadd.bf16 1048723074, %v3109_v56  ;;  %v3110_v3 = vmul.bf16 %v3102_v19, %v3046_v28 }
 0x291   :  { %v3125_v38 = vmul.bf16 %v3117_v0, %v3045_v21  ;;  %v3118_v6 = vadd.bf16 1048723074, %v3110_v3  ;;  %v7738_v0 = vcombine.low %v3274_v42, %v3278_v10 }
 0x293   :  { %v3173_v40 = vmul.bf16 %v8243_v51, %v3125_v38  ;;  %v3126_v8 = vmul.bf16 %v3118_v6, %v3046_v28 }
 0x295   :  { %v3181_v31 = vsub.bf16 1065369472, %v3173_v40  ;;  %v3174_v11 = vmul.bf16 %v8245_v9, %v3126_v8  ;;  %v3258_v40 = vld [vmem:[#allocation8 + $0xc8] sm:$0xff] }
 0x297   :  { %v3197_v54 = vsub.bf16 0, %v3181_v31  ;;  %v3182_v12 = vsub.bf16 1065369472, %v3174_v11 }
 0x299   :  { %v3205_v30 = vsel %vm3189_vm4, %v3181_v31, %v3197_v54  ;;  %v3198_v13 = vsub.bf16 0, %v3182_v12  ;;  %v7730_v31 = vcombine.low %v3266_v58, %v3270_v46  ;;  %v7723_v54 = vcombine.high %v3258_v40, %v3262_v7 }
 0x29a   :  { %v3221_v17 = vadd.bf16 1065369472, %v3205_v30  ;;  %v3250_v30 = vld [vmem:[#allocation8 + $0x88] sm:$0xff] }
 0x29b   :  { %v3206_v15 = vsel %vm3190_vm5, %v3182_v12, %v3198_v13  ;;  %v3254_v13 = vld [vmem:[#allocation8 + $0xa8] sm:$0xff] }
 0x29c   :  { %v3222_v21 = vadd.bf16 1065369472, %v3206_v15  ;;  %v8746_v33 = vmul.bf16 %v3221_v17, %v3213_v24  ;;  %v7715_v22 = vcombine.high %v3250_v30, %v3254_v13  ;;  %v3242_v24 = vld [vmem:[#allocation8 + $0x48] sm:$0xff]  ;;  %v7714_v39 = vcombine.low %v3250_v30, %v3254_v13 }
 0x29e   :  { %v8742_v28 = vmul.bf16 %v3222_v21, %v3214_v18  ;;  %v7722_v18 = vcombine.low %v3258_v40, %v3262_v7 }
 0x2a0   :  { %6461 = vmatprep.mubr.bf16.mxu0 %v8742_v28 }
 0x2a1   :  { %6462 = vmatmul.mubr.bf16.vlgmr.msra.gmra.mxu0 %v8746_v33 }
 0x2a2   :  { %6512 = vmatpush1.bf16.msra.mxu0 %v7754_v32  ;;  %6543 = vmatprep.mubr.bf16.mxu0 %v8638_v55  ;;  %v3246_v32 = vld [vmem:[#allocation8 + $0x68] sm:$0xff] }
 0x2a3   :  { %6513 = vmatprep.subr.bf16.mxu0 %v7747_v36  ;;  %v7707_v10 = vcombine.high %v3242_v24, %v3246_v32 }
 0x2a6   :  { %v2945_v47 = vpop.f32.mrf.mxu0  ;;  %6514 = vmatpush1.bf16.msra.mxu0 %v7746_v43  ;;  %v3238_v43 = vld [vmem:[#allocation8 + $0x28] sm:$0xff] }
 0x2a7   :  { %v2946_v56 = vadd.f32 %v2945_v47, %v2905_v37  ;;  %v2986_v19 = vpop.f32.mrf.mxu1  ;;  %6515 = vmatprep.subr.bf16.mxu0 %v7739_v34  ;;  %v7706_v37 = vcombine.low %v3242_v24, %v3246_v32  ;;  %v7699_v58 = vcombine.high %v3234_v44, %v3238_v43  ;;  %v3354_v47 = vld [vmem:[#allocation8 + $0x3c8] sm:$0xff] }
 0x2a8   :  { %v2947_v3 = vpop.f32.mrf.mxu0 }
 0x2a9   :  { %v8757_v38 = vadd.f32 %v2986_v19, %v2946_v56  ;;  %v2948_v51 = vadd.f32 %v2947_v3, %v2907_v52  ;;  %v2988_v6 = vpop.f32.mrf.mxu1  ;;  %v3358_v52 = vld [vmem:[#allocation8 + $0x3e8] sm:$0xff]  ;;  %v7698_v19 = vcombine.low %v3234_v44, %v3238_v43 }
 0x2aa   :  { %v2949_v8 = vpop.f32.mrf.mxu0  ;;  %6516 = vmatpush1.bf16.msra.mxu0 %v7738_v0  ;;  %v7819_v0 = vcombine.high %v3354_v47, %v3358_v52  ;;  %v7818_v40 = vcombine.low %v3354_v47, %v3358_v52  ;;  %v3326_v44 = vld [vmem:[#allocation8 + $0x2e8] sm:$0xff] }
 0x2ab   :  { %v3007_v2 = vmul.f32 0.70710677, %v8757_v38  ;;  %v8760_v9 = vadd.f32 %v2988_v6, %v2948_v51  ;;  %v2990_v59 = vpop.f32.mrf.mxu1  ;;  %6517 = vmatprep.subr.bf16.mxu0 %v7731_v63  ;;  %v3346_v63 = vld [vmem:[#allocation8 + $0x388] sm:$0xff] }
 0x2ac   :  { %v2950_v11 = vpop.f32.mrf.mxu0  ;;  %v3350_v51 = vld [vmem:[#allocation8 + $0x3a8] sm:$0xff] }
 0x2ad   :  { %v3015_v62 = vand.u32 2147483647, %v3007_v2  ;;  %v2991_v12 = vpop.f32.mrf.mxu1  ;;  %v3008_v15 = vmul.f32 0.70710677, %v8760_v9  ;;  %v7811_v8 = vcombine.high %v3346_v63, %v3350_v51  ;;  %v3342_v11 = vld [vmem:[#allocation8 + $0x368] sm:$0xff]  ;;  %v7810_v30 = vcombine.low %v3346_v63, %v3350_v51 }
 0x2ae   :  { %6518 = vmatpush1.bf16.msra.mxu0 %v7730_v31  ;;  %v3338_v31 = vld [vmem:[#allocation8 + $0x348] sm:$0xff] }
 0x2af   :  { %v3023_v17 = vmul.f32 0.3275911, %v3015_v62  ;;  %v3016_v21 = vand.u32 2147483647, %v3008_v15  ;;  %6519 = vmatprep.subr.bf16.mxu0 %v7723_v54  ;;  %v3055_v34 = vpack.c.bf16 %v3015_v62, %v3015_v62  ;;  %v7803_v15 = vcombine.high %v3338_v31, %v3342_v11  ;;  %v3314_v52 = vld [vmem:[#allocation8 + $0x288] sm:$0xff] }
 0x2b0   :  { %v7802_v32 = vcombine.low %v3338_v31, %v3342_v11 }
 0x2b1   :  { %v3031_v23 = vadd.f32 1.0, %v3023_v17  ;;  %v3024_v36 = vmul.f32 0.3275911, %v3016_v21  ;;  %v3056_v46 = vpack.c.bf16 %v3016_v21, %v3016_v21  ;;  %v3135_v56 = vmul.bf16 %v3055_v34, %v3055_v34  ;;  %v3330_v21 = vld [vmem:[#allocation8 + $0x308] sm:$0xff] }
 0x2b2   :  { %6520 = vmatpush1.bf16.msra.mxu0 %v7722_v18 }
 0x2b3   :  { %8246 = vrcp.f32 %v3031_v23  ;;  %v3032_v42 = vadd.f32 1.0, %v3024_v36  ;;  %6521 = vmatprep.subr.bf16.mxu0 %v7715_v22  ;;  %v3136_v3 = vmul.bf16 %v3056_v46, %v3056_v46  ;;  %v3143_v6 = vsub.bf16 0, %v3135_v56  ;;  %v3334_v22 = vld [vmem:[#allocation8 + $0x328] sm:$0xff] }
 0x2b4   :  { %v3318_v56 = vld [vmem:[#allocation8 + $0x2a8] sm:$0xff] }
 0x2b5   :  { %8248 = vrcp.f32 %v3032_v42  ;;  %v3144_v59 = vsub.bf16 0, %v3136_v3  ;;  %v3164_v54 = vmul.bf16 1069105081, %v3143_v6  ;;  %v7779_v51 = vcombine.high %v3314_v52, %v3318_v56 }
 0x2b6   :  { %6522 = vmatpush1.bf16.msra.mxu0 %v7714_v39  ;;  %v7795_v39 = vcombine.high %v3330_v21, %v3334_v22  ;;  %v7778_v31 = vcombine.low %v3314_v52, %v3318_v56 }
 0x2b7   :  { %6523 = vmatprep.subr.bf16.mxu0 %v7707_v10  ;;  %v3167_v18 = vmul.bf16 1069105081, %v3144_v59  ;;  %8250 = vpow.bf16 %v3164_v54  ;;  %v3322_v10 = vld [vmem:[#allocation8 + $0x2c8] sm:$0xff] }
 0x2b8   :  { %v7787_v46 = vcombine.high %v3322_v10, %v3326_v44  ;;  %v7786_v3 = vcombine.low %v3322_v10, %v3326_v44 }
 0x2b9   :  { %8252 = vpow.bf16 %v3167_v18 }
 0x2ba   :  { %6524 = vmatpush1.bf16.msra.mxu0 %v7706_v37  ;;  %v7794_v37 = vcombine.low %v3330_v21, %v3334_v22  ;;  %v2999_v21 = vpack.c.bf16 %v8757_v38, %v8757_v38 }
 0x2bb   :  { %6525 = vmatprep.subr.bf16.mxu0 %v7699_v58 }
 0x2bc   :  { %vm3191_vm6 = vcmp.ge.bf16.partialorder %v2999_v21, 0 }
 0x2be   :  { %6526 = vmatpush1.bf16.msra.mxu0 %v7698_v19 }
 0x2bf   :  { %6527 = vmatprep.subr.bf16.mxu0 %v7819_v0 }
 0x2c0   :  { %v8247_v7 = vpop.eup %8246 }
 0x2c1   :  { %v3047_v2 = vpack.c.bf16 %v8247_v7, %v8247_v7  ;;  %v3310_v7 = vld [vmem:[#allocation8 + $0x268] sm:$0xff] }
 0x2c2   :  { %v8249_v62 = vpop.eup %8248  ;;  %6528 = vmatpush2.bf16.msra.mxu0 %v7818_v40  ;;  %v3306_v40 = vld [vmem:[#allocation8 + $0x248] sm:$0xff] }
 0x2c3   :  { %v3063_v12 = vmul.bf16 1065893768, %v3047_v2  ;;  %v3048_v13 = vpack.c.bf16 %v8249_v62, %v8249_v62  ;;  %6529 = vmatprep.subr.bf16.mxu0 %v7811_v8  ;;  %v7771_v62 = vcombine.high %v3306_v40, %v3310_v7 }
 0x2c5   :  { %v3071_v17 = vadd.bf16 3216687034, %v3063_v12  ;;  %v3064_v23 = vmul.bf16 1065893768, %v3048_v13  ;;  %v8251_v11 = vpop.eup %8250 }
 0x2c6   :  { %6530 = vmatpush2.bf16.msra.mxu0 %v7810_v30  ;;  %v3298_v30 = vld [vmem:[#allocation8 + $0x208] sm:$0xff] }
 0x2c7   :  { %v3079_v24 = vmul.bf16 %v3071_v17, %v3047_v2  ;;  %v3072_v36 = vadd.bf16 3216687034, %v3064_v23  ;;  %6531 = vmatprep.subr.bf16.mxu0 %v7803_v15  ;;  %v3302_v15 = vld [vmem:[#allocation8 + $0x228] sm:$0xff]  ;;  %v8253_v18 = vpop.eup %8252  ;;  %v7770_v23 = vcombine.low %v3306_v40, %v3310_v7 }
 0x2c8   :  { %v3530_v7 = vld [vmem:[#allocation8 + $0x948] sm:$0xff] }
 0x2c9   :  { %v3087_v42 = vadd.bf16 1068908470, %v3079_v24  ;;  %v3080_v43 = vmul.bf16 %v3072_v36, %v3048_v13  ;;  %v3000_v36 = vpack.c.bf16 %v8760_v9, %v8760_v9 }
 0x2ca   :  { %6532 = vmatpush2.bf16.msra.mxu0 %v7802_v32 }
 0x2cb   :  { %v3095_v34 = vmul.bf16 %v3087_v42, %v3047_v2  ;;  %v3088_v58 = vadd.bf16 1068908470, %v3080_v43  ;;  %6533 = vmatprep.subr.bf16.mxu0 %v7795_v39  ;;  %v3546_v39 = vld [vmem:[#allocation8 + $0x9c8] sm:$0xff]  ;;  %vm3192_vm7 = vcmp.ge.bf16.partialorder %v3000_v36, 0 }
 0x2cc   :  { %v3550_v42 = vld [vmem:[#allocation8 + $0x9e8] sm:$0xff] }
 0x2cd   :  { %v3103_v47 = vadd.bf16 3197288082, %v3095_v34  ;;  %v3096_v19 = vmul.bf16 %v3088_v58, %v3048_v13  ;;  %v8011_v34 = vcombine.high %v3546_v39, %v3550_v42  ;;  %v3542_v58 = vld [vmem:[#allocation8 + $0x9a8] sm:$0xff]  ;;  %v8010_v52 = vcombine.low %v3546_v39, %v3550_v42 }
 0x2ce   :  { %6534 = vmatpush2.bf16.msra.mxu0 %v7794_v37  ;;  %v3538_v37 = vld [vmem:[#allocation8 + $0x988] sm:$0xff] }
 0x2cf   :  { %v3111_v0 = vmul.bf16 %v3103_v47, %v3047_v2  ;;  %v3104_v63 = vadd.bf16 3197288082, %v3096_v19  ;;  %6535 = vmatprep.subr.bf16.mxu0 %v7787_v46  ;;  %v3216_v47 = vmul.bf16 1056980736, %v3000_v36  ;;  %v3394_v42 = vld [vmem:[#allocation8 + $0x508] sm:$0xff] }
 0x2d1   :  { %v3119_v6 = vadd.bf16 1048723074, %v3111_v0  ;;  %v3112_v8 = vmul.bf16 %v3104_v63, %v3048_v13  ;;  %v8003_v0 = vcombine.high %v3538_v37, %v3542_v58  ;;  %v3410_v63 = vld [vmem:[#allocation8 + $0x588] sm:$0xff] }
 0x2d2   :  { %6536 = vmatpush2.bf16.msra.mxu0 %v7786_v3  ;;  %v3745_v3 = vld [vmem:[#allocation10] sm:$0xff] }
 0x2d3   :  { %v3127_v59 = vmul.bf16 %v3119_v6, %v3047_v2  ;;  %v3120_v54 = vadd.bf16 1048723074, %v3112_v8  ;;  %6537 = vmatprep.subr.bf16.mxu0 %v7779_v51  ;;  %v7763_v2 = vcombine.high %v3298_v30, %v3302_v15  ;;  %v3414_v51 = vld [vmem:[#allocation8 + $0x5a8] sm:$0xff]  ;;  %v3215_v6 = vmul.bf16 1056980736, %v2999_v21 }
 0x2d4   :  { %v3534_v8 = vld [vmem:[#allocation8 + $0x968] sm:$0xff] }
 0x2d5   :  { %v3175_v12 = vmul.bf16 %v8251_v11, %v3127_v59  ;;  %v3128_v17 = vmul.bf16 %v3120_v54, %v3048_v13  ;;  %v7762_v13 = vcombine.low %v3298_v30, %v3302_v15  ;;  %v8002_v59 = vcombine.low %v3538_v37, %v3542_v58  ;;  %v3406_v30 = vld [vmem:[#allocation8 + $0x568] sm:$0xff] }
 0x2d6   :  { %6538 = vmatpush2.bf16.msra.mxu0 %v7778_v31  ;;  %v3750_v11 = vrot.slane %v3745_v3, %v8579_v53  ;;  %v7875_v54 = vcombine.high %v3410_v63, %v3414_v51  ;;  %v3754_v15 = vrot.slane %v3745_v3, %v8584_v60 }
 0x2d7   :  { %v3183_v22 = vsub.bf16 1065369472, %v3175_v12  ;;  %v3176_v24 = vmul.bf16 %v8253_v18, %v3128_v17  ;;  %6539 = vmatprep.subr.bf16.mxu0 %v7771_v62  ;;  %v7995_v62 = vcombine.high %v3530_v7, %v3534_v8  ;;  %v3402_v12 = vld [vmem:[#allocation8 + $0x548] sm:$0xff] }
 0x2d8   :  { %v3522_v17 = vld [vmem:[#allocation8 + $0x908] sm:$0xff] }
 0x2d9   :  { %v3199_v32 = vsub.bf16 0, %v3183_v22  ;;  %v3184_v10 = vsub.bf16 1065369472, %v3176_v24  ;;  %v3526_v18 = vld [vmem:[#allocation8 + $0x928] sm:$0xff] }
 0x2da   :  { %6540 = vmatpush2.bf16.msra.mxu0 %v7770_v23  ;;  %v7987_v39 = vcombine.high %v3522_v17, %v3526_v18 }
 0x2db   :  { %v3207_v44 = vsel %vm3191_vm6, %v3183_v22, %v3199_v32  ;;  %v3200_v43 = vsub.bf16 0, %v3184_v10  ;;  %6541 = vmatprep.subr.bf16.mxu0 %v7763_v2  ;;  %v7874_v22 = vcombine.low %v3410_v63, %v3414_v51  ;;  %v7994_v2 = vcombine.low %v3530_v7, %v3534_v8  ;;  %v3506_v63 = vld [vmem:[#allocation8 + $0x888] sm:$0xff] }
 0x2dc   :  { %v3223_v19 = vadd.bf16 1065369472, %v3207_v44  ;;  %v7867_v32 = vcombine.high %v3402_v12, %v3406_v30  ;;  %v3510_v51 = vld [vmem:[#allocation8 + $0x8a8] sm:$0xff] }
 0x2dd   :  { %v3208_v46 = vsel %vm3192_vm7, %v3184_v10, %v3200_v43  ;;  %v3398_v10 = vld [vmem:[#allocation8 + $0x528] sm:$0xff] }
 0x2de   :  { %6542 = vmatpush2.bf16.msra.mxu0 %v7762_v13  ;;  %v3224_v56 = vadd.bf16 1065369472, %v3208_v46  ;;  %v8771_v31 = vmul.bf16 %v3223_v19, %v3215_v6  ;;  %v7986_v46 = vcombine.low %v3522_v17, %v3526_v18  ;;  %v3386_v19 = vld [vmem:[#allocation8 + $0x4c8] sm:$0xff]  ;;  %v7858_v6 = vcombine.low %v3394_v42, %v3398_v10 }
 0x2df   :  { %6593 = vmatprep.subr.bf16.mxu0 %v8011_v34  ;;  %v7866_v34 = vcombine.low %v3402_v12, %v3406_v30  ;;  %v3502_v12 = vld [vmem:[#allocation8 + $0x868] sm:$0xff] }
 0x2e0   :  { %v8767_v40 = vmul.bf16 %v3224_v56, %v3216_v47  ;;  %v7859_v47 = vcombine.high %v3394_v42, %v3398_v10  ;;  %v3362_v42 = vld [vmem:[#allocation8 + $0x408] sm:$0xff] }
 0x2e1   :  { %6544 = vmatmul.mubr.bf16.vlgmr.msra.gmra.mxu0 %v8688_v1  ;;  %v3366_v10 = vld [vmem:[#allocation8 + $0x428] sm:$0xff] }
 0x2e2   :  { %6594 = vmatpush1.bf16.msra.mxu0 %v8010_v52  ;;  %6625 = vmatprep.mubr.bf16.mxu0 %v8742_v28 }
 0x2e3   :  { %6502 = vmatprep.mubr.bf16.mxu1 %v8767_v40  ;;  %6595 = vmatprep.subr.bf16.mxu0 %v8003_v0  ;;  %v3390_v0 = vld [vmem:[#allocation8 + $0x4e8] sm:$0xff] }
 0x2e4   :  { %6503 = vmatmul.mubr.bf16.vlgmr.msra.gmra.mxu1 %v8771_v31  ;;  %v7851_v8 = vcombine.high %v3386_v19, %v3390_v0  ;;  %v7850_v30 = vcombine.low %v3386_v19, %v3390_v0 }
 0x2e5   :  { %6553 = vmatpush1.bf16.msra.mxu1 %v7882_v57  ;;  %6584 = vmatprep.mubr.bf16.mxu1 %v8681_v45  ;;  %v3518_v57 = vld [vmem:[#allocation8 + $0x8e8] sm:$0xff] }
 0x2e6   :  { %v6381_v21 = vpop.f32.mrf.mxu0  ;;  %6596 = vmatpush1.bf16.msra.mxu0 %v8002_v59  ;;  %6554 = vmatprep.subr.bf16.mxu1 %v7875_v54  ;;  %v7979_v56 = vcombine.high %v3514_v49, %v3518_v57  ;;  %v7978_v7 = vcombine.low %v3514_v49, %v3518_v57  ;;  %v7971_v59 = vcombine.high %v3506_v63, %v3510_v51  ;;  %v3382_v54 = vld [vmem:[#allocation8 + $0x4a8] sm:$0xff] }
 0x2e7   :  { %v6382_v23 = vadd.f32 %v6381_v21, %v3750_v11  ;;  %v6422_v24 = vpop.f32.mrf.mxu1  ;;  %6597 = vmatprep.subr.bf16.mxu0 %v7995_v62  ;;  %v3378_v11 = vld [vmem:[#allocation8 + $0x488] sm:$0xff] }
 0x2e8   :  { %v6383_v36 = vpop.f32.mrf.mxu0  ;;  %v3498_v62 = vld [vmem:[#allocation8 + $0x848] sm:$0xff]  ;;  %v7843_v17 = vcombine.high %v3378_v11, %v3382_v54 }
 0x2e9   :  { %v8781_v13 = vadd.f32 %v6422_v24, %v6382_v23  ;;  %v6384_v44 = vadd.f32 %v6383_v36, %v3754_v15  ;;  %v6424_v48 = vpop.f32.mrf.mxu1  ;;  %6555 = vmatpush1.bf16.msra.mxu1 %v7874_v22  ;;  %v7970_v15 = vcombine.low %v3506_v63, %v3510_v51  ;;  %v7963_v18 = vcombine.high %v3498_v62, %v3502_v12  ;;  %v3370_v21 = vld [vmem:[#allocation8 + $0x448] sm:$0xff] }
 0x2ea   :  { %v6385_v43 = vpop.f32.mrf.mxu0  ;;  %6598 = vmatpush1.bf16.msra.mxu0 %v7994_v2  ;;  %6556 = vmatprep.subr.bf16.mxu1 %v7867_v32  ;;  %v3374_v22 = vld [vmem:[#allocation8 + $0x468] sm:$0xff]  ;;  %v7842_v2 = vcombine.low %v3378_v11, %v3382_v54  ;;  %v7962_v32 = vcombine.low %v3498_v62, %v3502_v12 }
 0x2eb   :  { %v8783_v37 = vadd.f32 %v6424_v48, %v6384_v44  ;;  %v6426_v58 = vpop.f32.mrf.mxu1  ;;  %6599 = vmatprep.subr.bf16.mxu0 %v7987_v39  ;;  %v3490_v23 = vld [vmem:[#allocation8 + $0x808] sm:$0xff]  ;;  %v7835_v36 = vcombine.high %v3370_v21, %v3374_v22  ;;  %v7834_v49 = vcombine.low %v3370_v21, %v3374_v22  ;;  %v7827_v43 = vcombine.high %v3362_v42, %v3366_v10 }
 0x2ec   :  { %v6386_v52 = vpop.f32.mrf.mxu0  ;;  %v3494_v24 = vld [vmem:[#allocation8 + $0x828] sm:$0xff] }
 0x2ed   :  { %v6427_v3 = vpop.f32.mrf.mxu1  ;;  %6557 = vmatpush1.bf16.msra.mxu1 %v7866_v34  ;;  %v7955_v39 = vcombine.high %v3490_v23, %v3494_v24  ;;  %v3610_v44 = vld [vmem:[#allocation8 + $0xbc8] sm:$0xff]  ;;  %v7954_v57 = vcombine.low %v3490_v23, %v3494_v24 }
 0x2ee   :  { %6600 = vmatpush1.bf16.msra.mxu0 %v7986_v46  ;;  %6558 = vmatprep.subr.bf16.mxu1 %v7859_v47  ;;  %v3614_v48 = vld [vmem:[#allocation8 + $0xbe8] sm:$0xff] }
 0x2ef   :  { %6601 = vmatprep.subr.bf16.mxu0 %v7979_v56  ;;  %v8075_v34 = vcombine.high %v3610_v44, %v3614_v48  ;;  %v3482_v58 = vld [vmem:[#allocation8 + $0x7c8] sm:$0xff]  ;;  %v7826_v56 = vcombine.low %v3362_v42, %v3366_v10  ;;  %v8074_v19 = vcombine.low %v3610_v44, %v3614_v48 }
 0x2f0   :  { %v3486_v46 = vld [vmem:[#allocation8 + $0x7e8] sm:$0xff] }
 0x2f1   :  { %6559 = vmatpush1.bf16.msra.mxu1 %v7858_v6  ;;  %v3602_v47 = vld [vmem:[#allocation8 + $0xb88] sm:$0xff]  ;;  %v7947_v0 = vcombine.high %v3482_v58, %v3486_v46 }
 0x2f2   :  { %6602 = vmatpush1.bf16.msra.mxu0 %v7978_v7  ;;  %6560 = vmatprep.subr.bf16.mxu1 %v7851_v8  ;;  %v3606_v52 = vld [vmem:[#allocation8 + $0xba8] sm:$0xff]  ;;  %v7946_v8 = vcombine.low %v3482_v58, %v3486_v46 }
 0x2f3   :  { %6603 = vmatprep.subr.bf16.mxu0 %v7971_v59  ;;  %v8067_v3 = vcombine.high %v3602_v47, %v3606_v52  ;;  %v3474_v63 = vld [vmem:[#allocation8 + $0x788] sm:$0xff]  ;;  %v8066_v59 = vcombine.low %v3602_v47, %v3606_v52 }
 0x2f4   :  { %v3478_v51 = vld [vmem:[#allocation8 + $0x7a8] sm:$0xff] }
 0x2f5   :  { %6561 = vmatpush1.bf16.msra.mxu1 %v7850_v30  ;;  %v3594_v6 = vld [vmem:[#allocation8 + $0xb48] sm:$0xff]  ;;  %v7939_v11 = vcombine.high %v3474_v63, %v3478_v51 }
 0x2f6   :  { %6604 = vmatpush1.bf16.msra.mxu0 %v7970_v15  ;;  %6562 = vmatprep.subr.bf16.mxu1 %v7843_v17  ;;  %v3598_v7 = vld [vmem:[#allocation8 + $0xb68] sm:$0xff]  ;;  %v7938_v17 = vcombine.low %v3474_v63, %v3478_v51 }
 0x2f7   :  { %6605 = vmatprep.subr.bf16.mxu0 %v7963_v18  ;;  %v8059_v54 = vcombine.high %v3594_v6, %v3598_v7  ;;  %v3466_v62 = vld [vmem:[#allocation8 + $0x748] sm:$0xff]  ;;  %v8058_v18 = vcombine.low %v3594_v6, %v3598_v7 }
 0x2f8   :  { %v3470_v12 = vld [vmem:[#allocation8 + $0x768] sm:$0xff] }
 0x2f9   :  { %6563 = vmatpush1.bf16.msra.mxu1 %v7842_v2  ;;  %v3586_v30 = vld [vmem:[#allocation8 + $0xb08] sm:$0xff]  ;;  %v7931_v21 = vcombine.high %v3466_v62, %v3470_v12 }
 0x2fa   :  { %6606 = vmatpush1.bf16.msra.mxu0 %v7962_v32  ;;  %6564 = vmatprep.subr.bf16.mxu1 %v7835_v36  ;;  %v3590_v15 = vld [vmem:[#allocation8 + $0xb28] sm:$0xff]  ;;  %v7930_v36 = vcombine.low %v3466_v62, %v3470_v12 }
 0x2fb   :  { %6607 = vmatprep.subr.bf16.mxu0 %v7955_v39  ;;  %v8051_v22 = vcombine.high %v3586_v30, %v3590_v15  ;;  %v3458_v23 = vld [vmem:[#allocation8 + $0x708] sm:$0xff]  ;;  %v8050_v39 = vcombine.low %v3586_v30, %v3590_v15 }
 0x2fc   :  { %v3462_v24 = vld [vmem:[#allocation8 + $0x728] sm:$0xff] }
 0x2fd   :  { %6565 = vmatpush1.bf16.msra.mxu1 %v7834_v49  ;;  %v3578_v2 = vld [vmem:[#allocation8 + $0xac8] sm:$0xff]  ;;  %v7923_v42 = vcombine.high %v3458_v23, %v3462_v24 }
 0x2fe   :  { %6608 = vmatpush1.bf16.msra.mxu0 %v7954_v57  ;;  %6566 = vmatprep.subr.bf16.mxu1 %v7827_v43  ;;  %v3582_v32 = vld [vmem:[#allocation8 + $0xae8] sm:$0xff]  ;;  %v7922_v43 = vcombine.low %v3458_v23, %v3462_v24 }
 0x2ff   :  { %6609 = vmatprep.subr.bf16.mxu0 %v8075_v34  ;;  %v8043_v10 = vcombine.high %v3578_v2, %v3582_v32  ;;  %v3450_v44 = vld [vmem:[#allocation8 + $0x6c8] sm:$0xff]  ;;  %v8042_v34 = vcombine.low %v3578_v2, %v3582_v32 }
 0x300   :  { %v3454_v48 = vld [vmem:[#allocation8 + $0x6e8] sm:$0xff] }
 0x301   :  { %6567 = vmatpush1.bf16.msra.mxu1 %v7826_v56  ;;  %v3570_v49 = vld [vmem:[#allocation8 + $0xa88] sm:$0xff]  ;;  %v7915_v58 = vcombine.high %v3450_v44, %v3454_v48 }
 0x302   :  { %6610 = vmatpush2.bf16.msra.mxu0 %v8074_v19  ;;  %6568 = vmatprep.subr.bf16.mxu1 %v7947_v0  ;;  %v3574_v57 = vld [vmem:[#allocation8 + $0xaa8] sm:$0xff]  ;;  %v7914_v0 = vcombine.low %v3450_v44, %v3454_v48 }
 0x303   :  { %6611 = vmatprep.subr.bf16.mxu0 %v8067_v3  ;;  %v8035_v46 = vcombine.high %v3570_v49, %v3574_v57  ;;  %v3442_v47 = vld [vmem:[#allocation8 + $0x688] sm:$0xff]  ;;  %v8034_v3 = vcombine.low %v3570_v49, %v3574_v57 }
 0x304   :  { %v3446_v52 = vld [vmem:[#allocation8 + $0x6a8] sm:$0xff] }
 0x305   :  { %6569 = vmatpush2.bf16.msra.mxu1 %v7946_v8  ;;  %v3562_v56 = vld [vmem:[#allocation8 + $0xa48] sm:$0xff]  ;;  %v7907_v63 = vcombine.high %v3442_v47, %v3446_v52 }
 0x306   :  { %6612 = vmatpush2.bf16.msra.mxu0 %v8066_v59  ;;  %6570 = vmatprep.subr.bf16.mxu1 %v7939_v11  ;;  %v3566_v19 = vld [vmem:[#allocation8 + $0xa68] sm:$0xff]  ;;  %v7906_v11 = vcombine.low %v3442_v47, %v3446_v52 }
 0x307   :  { %6613 = vmatprep.subr.bf16.mxu0 %v8059_v54  ;;  %v8027_v51 = vcombine.high %v3562_v56, %v3566_v19  ;;  %v3434_v6 = vld [vmem:[#allocation8 + $0x648] sm:$0xff]  ;;  %v8026_v54 = vcombine.low %v3562_v56, %v3566_v19 }
 0x308   :  { %v3438_v7 = vld [vmem:[#allocation8 + $0x668] sm:$0xff] }
 0x309   :  { %6571 = vmatpush2.bf16.msra.mxu1 %v7938_v17  ;;  %v3554_v8 = vld [vmem:[#allocation8 + $0xa08] sm:$0xff]  ;;  %v7899_v62 = vcombine.high %v3434_v6, %v3438_v7  ;;  %v3291_v17 = vld [vmem:[#allocation8 + $0x1d0] sm:$0xff] }
 0x30a   :  { %6614 = vmatpush2.bf16.msra.mxu0 %v8058_v18  ;;  %6572 = vmatprep.subr.bf16.mxu1 %v7931_v21  ;;  %v3558_v59 = vld [vmem:[#allocation8 + $0xa28] sm:$0xff]  ;;  %v3295_v18 = vld [vmem:[#allocation8 + $0x1f0] sm:$0xff]  ;;  %v7898_v21 = vcombine.low %v3434_v6, %v3438_v7 }
 0x30b   :  { %6615 = vmatprep.subr.bf16.mxu0 %v8051_v22  ;;  %v8019_v12 = vcombine.high %v3554_v8, %v3558_v59  ;;  %v3426_v30 = vld [vmem:[#allocation8 + $0x608] sm:$0xff]  ;;  %v8018_v22 = vcombine.low %v3554_v8, %v3558_v59  ;;  %v7757_v24 = vcombine.high %v3291_v17, %v3295_v18 }
 0x30c   :  { %v3430_v15 = vld [vmem:[#allocation8 + $0x628] sm:$0xff] }
 0x30d   :  { %6573 = vmatpush2.bf16.msra.mxu1 %v7930_v36  ;;  %v7891_v23 = vcombine.high %v3426_v30, %v3430_v15  ;;  %v3674_v2 = vld [vmem:[#allocation8 + $0xdc8] sm:$0xff]  ;;  %v3283_v36 = vld [vmem:[#allocation8 + $0x190] sm:$0xff] }
 0x30e   :  { %6616 = vmatpush2.bf16.msra.mxu0 %v8050_v39  ;;  %6574 = vmatprep.subr.bf16.mxu1 %v7923_v42  ;;  %v3678_v32 = vld [vmem:[#allocation8 + $0xde8] sm:$0xff]  ;;  %v3287_v39 = vld [vmem:[#allocation8 + $0x1b0] sm:$0xff]  ;;  %v7890_v42 = vcombine.low %v3426_v30, %v3430_v15 }
 0x30f   :  { %6617 = vmatprep.subr.bf16.mxu0 %v8043_v10  ;;  %v7756_v10 = vcombine.low %v3291_v17, %v3295_v18  ;;  %v8139_v44 = vcombine.high %v3674_v2, %v3678_v32  ;;  %v7749_v48 = vcombine.high %v3283_v36, %v3287_v39  ;;  %v3666_v49 = vld [vmem:[#allocation8 + $0xd88] sm:$0xff] }
 0x310   :  { %v3670_v57 = vld [vmem:[#allocation8 + $0xda8] sm:$0xff] }
 0x311   :  { %6575 = vmatpush2.bf16.msra.mxu1 %v7922_v43  ;;  %v3275_v43 = vld [vmem:[#allocation8 + $0x150] sm:$0xff]  ;;  %v8131_v47 = vcombine.high %v3666_v49, %v3670_v57  ;;  %v3658_v56 = vld [vmem:[#allocation8 + $0xd48] sm:$0xff] }
 0x312   :  { %6618 = vmatpush2.bf16.msra.mxu0 %v8042_v34  ;;  %6576 = vmatprep.subr.bf16.mxu1 %v7915_v58  ;;  %v3279_v34 = vld [vmem:[#allocation8 + $0x170] sm:$0xff]  ;;  %v8138_v58 = vcombine.low %v3674_v2, %v3678_v32  ;;  %v3662_v19 = vld [vmem:[#allocation8 + $0xd68] sm:$0xff] }
 0x313   :  { %6619 = vmatprep.subr.bf16.mxu0 %v8035_v46  ;;  %v7748_v46 = vcombine.low %v3283_v36, %v3287_v39  ;;  %v7741_v52 = vcombine.high %v3275_v43, %v3279_v34  ;;  %v8123_v6 = vcombine.high %v3658_v56, %v3662_v19  ;;  %v3650_v8 = vld [vmem:[#allocation8 + $0xd08] sm:$0xff] }
 0x314   :  { %v3654_v59 = vld [vmem:[#allocation8 + $0xd28] sm:$0xff] }
 0x315   :  { %6577 = vmatpush2.bf16.msra.mxu1 %v7914_v0  ;;  %v3267_v0 = vld [vmem:[#allocation8 + $0x110] sm:$0xff]  ;;  %v8115_v30 = vcombine.high %v3650_v8, %v3654_v59  ;;  %v3642_v17 = vld [vmem:[#allocation8 + $0xcc8] sm:$0xff] }
 0x316   :  { %6620 = vmatpush2.bf16.msra.mxu0 %v8034_v3  ;;  %6578 = vmatprep.subr.bf16.mxu1 %v7907_v63  ;;  %v3271_v3 = vld [vmem:[#allocation8 + $0x130] sm:$0xff]  ;;  %v8130_v63 = vcombine.low %v3666_v49, %v3670_v57  ;;  %v3646_v18 = vld [vmem:[#allocation8 + $0xce8] sm:$0xff] }
 0x317   :  { %6621 = vmatprep.subr.bf16.mxu0 %v8027_v51  ;;  %v7740_v51 = vcombine.low %v3275_v43, %v3279_v34  ;;  %v7733_v7 = vcombine.high %v3267_v0, %v3271_v3  ;;  %v8107_v2 = vcombine.high %v3642_v17, %v3646_v18  ;;  %v3634_v36 = vld [vmem:[#allocation8 + $0xc88] sm:$0xff] }
 0x318   :  { %v3638_v39 = vld [vmem:[#allocation8 + $0xca8] sm:$0xff] }
 0x319   :  { %6579 = vmatpush2.bf16.msra.mxu1 %v7906_v11  ;;  %v3259_v11 = vld [vmem:[#allocation8 + $0xd0] sm:$0xff]  ;;  %v8099_v49 = vcombine.high %v3634_v36, %v3638_v39  ;;  %v3626_v43 = vld [vmem:[#allocation8 + $0xc48] sm:$0xff] }
 0x31a   :  { %6622 = vmatpush2.bf16.msra.mxu0 %v8026_v54  ;;  %6580 = vmatprep.subr.bf16.mxu1 %v7899_v62  ;;  %v3263_v54 = vld [vmem:[#allocation8 + $0xf0] sm:$0xff]  ;;  %v8122_v62 = vcombine.low %v3658_v56, %v3662_v19  ;;  %v3630_v34 = vld [vmem:[#allocation8 + $0xc68] sm:$0xff] }
 0x31b   :  { %6623 = vmatprep.subr.bf16.mxu0 %v8019_v12  ;;  %v7732_v12 = vcombine.low %v3267_v0, %v3271_v3  ;;  %v7725_v15 = vcombine.high %v3259_v11, %v3263_v54  ;;  %v8091_v56 = vcombine.high %v3626_v43, %v3630_v34  ;;  %v3618_v0 = vld [vmem:[#allocation8 + $0xc08] sm:$0xff] }
 0x31c   :  { %v3622_v3 = vld [vmem:[#allocation8 + $0xc28] sm:$0xff] }
 0x31d   :  { %6581 = vmatpush2.bf16.msra.mxu1 %v7898_v21  ;;  %v3251_v21 = vld [vmem:[#allocation8 + $0x90] sm:$0xff] }
 0x31e   :  { %6624 = vmatpush2.bf16.msra.mxu0 %v8018_v22  ;;  %6582 = vmatprep.subr.bf16.mxu1 %v7891_v23  ;;  %v3255_v22 = vld [vmem:[#allocation8 + $0xb0] sm:$0xff]  ;;  %v8114_v23 = vcombine.low %v3650_v8, %v3654_v59  ;;  %v8083_v8 = vcombine.high %v3618_v0, %v3622_v3 }
 0x31f   :  { %6675 = vmatprep.subr.bf16.mxu0 %v7757_v24  ;;  %v7724_v24 = vcombine.low %v3259_v11, %v3263_v54  ;;  %v7717_v32 = vcombine.high %v3251_v21, %v3255_v22  ;;  %v3738_v11 = vld [vmem:[#allocation8 + $0xfc8] sm:$0xff] }
 0x320   :  { %v3742_v54 = vld [vmem:[#allocation8 + $0xfe8] sm:$0xff] }
 0x321   :  { %6583 = vmatpush2.bf16.msra.mxu1 %v7890_v42  ;;  %6626 = vmatmul.mubr.bf16.vlgmr.msra.gmra.mxu0 %v8746_v33  ;;  %v3243_v42 = vld [vmem:[#allocation8 + $0x50] sm:$0xff] }
 0x322   :  { %6676 = vmatpush1.bf16.msra.mxu0 %v7756_v10  ;;  %6707 = vmatprep.mubr.bf16.mxu0 %v8638_v55  ;;  %v3247_v10 = vld [vmem:[#allocation8 + $0x70] sm:$0xff] }
 0x323   :  { %6634 = vmatprep.subr.bf16.mxu1 %v8139_v44  ;;  %6677 = vmatprep.subr.bf16.mxu0 %v7749_v48  ;;  %v8106_v44 = vcombine.low %v3642_v17, %v3646_v18  ;;  %v7716_v48 = vcombine.low %v3251_v21, %v3255_v22  ;;  %v7709_v57 = vcombine.high %v3243_v42, %v3247_v10  ;;  %v3730_v21 = vld [vmem:[#allocation8 + $0xf88] sm:$0xff] }
 0x324   :  { %6585 = vmatmul.mubr.bf16.vlgmr.msra.gmra.mxu1 %v8690_v4  ;;  %v8203_v17 = vcombine.high %v3738_v11, %v3742_v54  ;;  %v3734_v22 = vld [vmem:[#allocation8 + $0xfa8] sm:$0xff] }
 0x325   :  { %6635 = vmatpush1.bf16.msra.mxu1 %v8138_v58  ;;  %6666 = vmatprep.mubr.bf16.mxu1 %v8767_v40  ;;  %v3235_v58 = vld [vmem:[#allocation8 + $0x10] sm:$0xff] }
 0x326   :  { %6678 = vmatpush1.bf16.msra.mxu0 %v7748_v46  ;;  %6636 = vmatprep.subr.bf16.mxu1 %v8131_v47  ;;  %v3239_v46 = vld [vmem:[#allocation8 + $0x30] sm:$0xff]  ;;  %v8098_v47 = vcombine.low %v3634_v36, %v3638_v39  ;;  %v8195_v36 = vcombine.high %v3730_v21, %v3734_v22 }
 0x327   :  { %6679 = vmatprep.subr.bf16.mxu0 %v7741_v52  ;;  %v7708_v52 = vcombine.low %v3243_v42, %v3247_v10  ;;  %v7701_v19 = vcombine.high %v3235_v58, %v3239_v46  ;;  %v3722_v42 = vld [vmem:[#allocation8 + $0xf48] sm:$0xff] }
 0x328   :  { %v3726_v10 = vld [vmem:[#allocation8 + $0xf68] sm:$0xff] }
 0x329   :  { %6637 = vmatpush1.bf16.msra.mxu1 %v8130_v63  ;;  %v3355_v63 = vld [vmem:[#allocation8 + $0x3d0] sm:$0xff] }
 0x32a   :  { %6680 = vmatpush1.bf16.msra.mxu0 %v7740_v51  ;;  %6638 = vmatprep.subr.bf16.mxu1 %v8123_v6  ;;  %v3359_v51 = vld [vmem:[#allocation8 + $0x3f0] sm:$0xff]  ;;  %v8090_v6 = vcombine.low %v3626_v43, %v3630_v34  ;;  %v8187_v43 = vcombine.high %v3722_v42, %v3726_v10 }
 0x32b   :  { %6681 = vmatprep.subr.bf16.mxu0 %v7733_v7  ;;  %v7700_v7 = vcombine.low %v3235_v58, %v3239_v46  ;;  %v7821_v59 = vcombine.high %v3355_v63, %v3359_v51  ;;  %v3714_v58 = vld [vmem:[#allocation8 + $0xf08] sm:$0xff] }
 0x32c   :  { %v3718_v46 = vld [vmem:[#allocation8 + $0xf28] sm:$0xff] }
 0x32d   :  { %6639 = vmatpush1.bf16.msra.mxu1 %v8122_v62  ;;  %v3347_v62 = vld [vmem:[#allocation8 + $0x390] sm:$0xff] }
 0x32e   :  { %6682 = vmatpush1.bf16.msra.mxu0 %v7732_v12  ;;  %6640 = vmatprep.subr.bf16.mxu1 %v8115_v30  ;;  %v3351_v12 = vld [vmem:[#allocation8 + $0x3b0] sm:$0xff]  ;;  %v8082_v30 = vcombine.low %v3618_v0, %v3622_v3  ;;  %v8179_v0 = vcombine.high %v3714_v58, %v3718_v46 }
 0x32f   :  { %6683 = vmatprep.subr.bf16.mxu0 %v7725_v15  ;;  %v7820_v15 = vcombine.low %v3355_v63, %v3359_v51  ;;  %v7813_v18 = vcombine.high %v3347_v62, %v3351_v12  ;;  %v3706_v63 = vld [vmem:[#allocation8 + $0xec8] sm:$0xff] }
 0x330   :  { %v3710_v51 = vld [vmem:[#allocation8 + $0xee8] sm:$0xff] }
 0x331   :  { %6641 = vmatpush1.bf16.msra.mxu1 %v8114_v23  ;;  %v3339_v23 = vld [vmem:[#allocation8 + $0x350] sm:$0xff] }
 0x332   :  { %6684 = vmatpush1.bf16.msra.mxu0 %v7724_v24  ;;  %6642 = vmatprep.subr.bf16.mxu1 %v8107_v2  ;;  %v3343_v24 = vld [vmem:[#allocation8 + $0x370] sm:$0xff]  ;;  %v8202_v2 = vcombine.low %v3738_v11, %v3742_v54  ;;  %v8171_v11 = vcombine.high %v3706_v63, %v3710_v51 }
 0x333   :  { %6685 = vmatprep.subr.bf16.mxu0 %v7717_v32  ;;  %v7812_v32 = vcombine.low %v3347_v62, %v3351_v12  ;;  %v7805_v39 = vcombine.high %v3339_v23, %v3343_v24  ;;  %v3698_v62 = vld [vmem:[#allocation8 + $0xe88] sm:$0xff] }
 0x334   :  { %v3702_v12 = vld [vmem:[#allocation8 + $0xea8] sm:$0xff] }
 0x335   :  { %6643 = vmatpush1.bf16.msra.mxu1 %v8106_v44  ;;  %v3331_v44 = vld [vmem:[#allocation8 + $0x310] sm:$0xff] }
 0x336   :  { %6686 = vmatpush1.bf16.msra.mxu0 %v7716_v48  ;;  %6644 = vmatprep.subr.bf16.mxu1 %v8099_v49  ;;  %v3335_v48 = vld [vmem:[#allocation8 + $0x330] sm:$0xff]  ;;  %v8194_v49 = vcombine.low %v3730_v21, %v3734_v22  ;;  %v8163_v21 = vcombine.high %v3698_v62, %v3702_v12 }
 0x337   :  { %6687 = vmatprep.subr.bf16.mxu0 %v7709_v57  ;;  %v7804_v57 = vcombine.low %v3339_v23, %v3343_v24  ;;  %v7797_v34 = vcombine.high %v3331_v44, %v3335_v48  ;;  %v3690_v23 = vld [vmem:[#allocation8 + $0xe48] sm:$0xff] }
 0x338   :  { %v3694_v24 = vld [vmem:[#allocation8 + $0xe68] sm:$0xff] }
 0x339   :  { %6645 = vmatpush1.bf16.msra.mxu1 %v8098_v47  ;;  %v3323_v47 = vld [vmem:[#allocation8 + $0x2d0] sm:$0xff] }
 0x33a   :  { %6688 = vmatpush1.bf16.msra.mxu0 %v7708_v52  ;;  %6646 = vmatprep.subr.bf16.mxu1 %v8091_v56  ;;  %v3327_v52 = vld [vmem:[#allocation8 + $0x2f0] sm:$0xff]  ;;  %v8186_v56 = vcombine.low %v3722_v42, %v3726_v10  ;;  %v8155_v42 = vcombine.high %v3690_v23, %v3694_v24 }
 0x33b   :  { %6689 = vmatprep.subr.bf16.mxu0 %v7701_v19  ;;  %v7796_v19 = vcombine.low %v3331_v44, %v3335_v48  ;;  %v7789_v3 = vcombine.high %v3323_v47, %v3327_v52  ;;  %v3682_v44 = vld [vmem:[#allocation8 + $0xe08] sm:$0xff] }
 0x33c   :  { %v3686_v48 = vld [vmem:[#allocation8 + $0xe28] sm:$0xff] }
 0x33d   :  { %6647 = vmatpush1.bf16.msra.mxu1 %v8090_v6  ;;  %v3315_v6 = vld [vmem:[#allocation8 + $0x290] sm:$0xff] }
 0x33e   :  { %6690 = vmatpush1.bf16.msra.mxu0 %v7700_v7  ;;  %6648 = vmatprep.subr.bf16.mxu1 %v8083_v8  ;;  %v3319_v7 = vld [vmem:[#allocation8 + $0x2b0] sm:$0xff]  ;;  %v8178_v8 = vcombine.low %v3714_v58, %v3718_v46  ;;  %v8147_v58 = vcombine.high %v3682_v44, %v3686_v48 }
 0x33f   :  { %6691 = vmatprep.subr.bf16.mxu0 %v7821_v59  ;;  %v7788_v59 = vcombine.low %v3323_v47, %v3327_v52  ;;  %v7781_v54 = vcombine.high %v3315_v6, %v3319_v7  ;;  %v3419_v47 = vld [vmem:[#allocation8 + $0x5d0] sm:$0xff] }
 0x340   :  { %v3423_v52 = vld [vmem:[#allocation8 + $0x5f0] sm:$0xff] }
 0x341   :  { %6649 = vmatpush1.bf16.msra.mxu1 %v8082_v30  ;;  %v3307_v30 = vld [vmem:[#allocation8 + $0x250] sm:$0xff] }
 0x342   :  { %6692 = vmatpush2.bf16.msra.mxu0 %v7820_v15  ;;  %6650 = vmatprep.subr.bf16.mxu1 %v8203_v17  ;;  %v3311_v15 = vld [vmem:[#allocation8 + $0x270] sm:$0xff]  ;;  %v8170_v17 = vcombine.low %v3706_v63, %v3710_v51  ;;  %v7885_v63 = vcombine.high %v3419_v47, %v3423_v52 }
 0x343   :  { %6693 = vmatprep.subr.bf16.mxu0 %v7813_v18  ;;  %v7780_v18 = vcombine.low %v3315_v6, %v3319_v7  ;;  %v7773_v22 = vcombine.high %v3307_v30, %v3311_v15  ;;  %v3411_v6 = vld [vmem:[#allocation8 + $0x590] sm:$0xff] }
 0x344   :  { %v3415_v7 = vld [vmem:[#allocation8 + $0x5b0] sm:$0xff] }
 0x345   :  { %6651 = vmatpush2.bf16.msra.mxu1 %v8202_v2  ;;  %v3299_v2 = vld [vmem:[#allocation8 + $0x210] sm:$0xff] }
 0x346   :  { %6694 = vmatpush2.bf16.msra.mxu0 %v7812_v32  ;;  %6652 = vmatprep.subr.bf16.mxu1 %v8195_v36  ;;  %v3303_v32 = vld [vmem:[#allocation8 + $0x230] sm:$0xff]  ;;  %v8162_v36 = vcombine.low %v3698_v62, %v3702_v12 }
 0x347   :  { %6695 = vmatprep.subr.bf16.mxu0 %v7805_v39  ;;  %v7772_v39 = vcombine.low %v3307_v30, %v3311_v15  ;;  %v7765_v10 = vcombine.high %v3299_v2, %v3303_v32  ;;  %v7877_v30 = vcombine.high %v3411_v6, %v3415_v7 }
 0x349   :  { %6653 = vmatpush2.bf16.msra.mxu1 %v8194_v49  ;;  %v3547_v49 = vld [vmem:[#allocation8 + $0x9d0] sm:$0xff] }
 0x34a   :  { %6696 = vmatpush2.bf16.msra.mxu0 %v7804_v57  ;;  %6654 = vmatprep.subr.bf16.mxu1 %v8187_v43  ;;  %v3551_v57 = vld [vmem:[#allocation8 + $0x9f0] sm:$0xff]  ;;  %v8154_v43 = vcombine.low %v3690_v23, %v3694_v24 }
 0x34b   :  { %6697 = vmatprep.subr.bf16.mxu0 %v7797_v34  ;;  %v7764_v34 = vcombine.low %v3299_v2, %v3303_v32  ;;  %v8013_v46 = vcombine.high %v3547_v49, %v3551_v57  ;;  %v3523_v23 = vld [vmem:[#allocation8 + $0x910] sm:$0xff]  ;;  %v7876_v2 = vcombine.low %v3411_v6, %v3415_v7 }
 0x34c   :  { %v3527_v24 = vld [vmem:[#allocation8 + $0x930] sm:$0xff] }
 0x34d   :  { %6655 = vmatpush2.bf16.msra.mxu1 %v8186_v56  ;;  %v3539_v56 = vld [vmem:[#allocation8 + $0x990] sm:$0xff] }
 0x34e   :  { %6698 = vmatpush2.bf16.msra.mxu0 %v7796_v19  ;;  %6656 = vmatprep.subr.bf16.mxu1 %v8179_v0  ;;  %v3543_v19 = vld [vmem:[#allocation8 + $0x9b0] sm:$0xff]  ;;  %v8146_v0 = vcombine.low %v3682_v44, %v3686_v48 }
 0x34f   :  { %6699 = vmatprep.subr.bf16.mxu0 %v7789_v3  ;;  %v8012_v3 = vcombine.low %v3547_v49, %v3551_v57  ;;  %v8005_v51 = vcombine.high %v3539_v56, %v3543_v19  ;;  %v8004_v12 = vcombine.low %v3539_v56, %v3543_v19  ;;  %v3399_v44 = vld [vmem:[#allocation8 + $0x530] sm:$0xff]  ;;  %v7988_v57 = vcombine.low %v3523_v23, %v3527_v24 }
 0x350   :  { %v3515_v48 = vld [vmem:[#allocation8 + $0x8d0] sm:$0xff] }
 0x351   :  { %6657 = vmatpush2.bf16.msra.mxu1 %v8178_v8  ;;  %v3531_v8 = vld [vmem:[#allocation8 + $0x950] sm:$0xff] }
 0x352   :  { %6700 = vmatpush2.bf16.msra.mxu0 %v7788_v59  ;;  %6658 = vmatprep.subr.bf16.mxu1 %v8171_v11  ;;  %v3535_v59 = vld [vmem:[#allocation8 + $0x970] sm:$0xff] }
 0x353   :  { %6701 = vmatprep.subr.bf16.mxu0 %v7781_v54  ;;  %v7884_v54 = vcombine.low %v3419_v47, %v3423_v52  ;;  %v7996_v32 = vcombine.low %v3531_v8, %v3535_v59  ;;  %v3519_v49 = vld [vmem:[#allocation8 + $0x8f0] sm:$0xff] }
 0x354   :  { %v3507_v47 = vld [vmem:[#allocation8 + $0x890] sm:$0xff]  ;;  %v7980_v19 = vcombine.low %v3515_v48, %v3519_v49 }
 0x355   :  { %6659 = vmatpush2.bf16.msra.mxu1 %v8170_v17  ;;  %v7997_v17 = vcombine.high %v3531_v8, %v3535_v59  ;;  %v3511_v52 = vld [vmem:[#allocation8 + $0x8b0] sm:$0xff] }
 0x356   :  { %6702 = vmatpush2.bf16.msra.mxu0 %v7780_v18  ;;  %6660 = vmatprep.subr.bf16.mxu1 %v8163_v21  ;;  %v3403_v18 = vld [vmem:[#allocation8 + $0x550] sm:$0xff]  ;;  %v7972_v59 = vcombine.low %v3507_v47, %v3511_v52 }
 0x357   :  { %6703 = vmatprep.subr.bf16.mxu0 %v7773_v22  ;;  %v3407_v21 = vld [vmem:[#allocation8 + $0x570] sm:$0xff] }
 0x358   :  { %v3499_v6 = vld [vmem:[#allocation8 + $0x850] sm:$0xff] }
 0x359   :  { %6661 = vmatpush2.bf16.msra.mxu1 %v8162_v36  ;;  %v7869_v36 = vcombine.high %v3403_v18, %v3407_v21  ;;  %v3503_v7 = vld [vmem:[#allocation8 + $0x870] sm:$0xff] }
 0x35a   :  { %6704 = vmatpush2.bf16.msra.mxu0 %v7772_v39  ;;  %6662 = vmatprep.subr.bf16.mxu1 %v8155_v42  ;;  %v7989_v42 = vcombine.high %v3523_v23, %v3527_v24 }
 0x35b   :  { %6705 = vmatprep.subr.bf16.mxu0 %v7765_v10  ;;  %v3395_v10 = vld [vmem:[#allocation8 + $0x510] sm:$0xff] }
 0x35c   :  { %v7860_v56 = vcombine.low %v3395_v10, %v3399_v44 }
 0x35d   :  { %6663 = vmatpush2.bf16.msra.mxu1 %v8154_v43  ;;  %v7861_v43 = vcombine.high %v3395_v10, %v3399_v44 }
 0x35e   :  { %6706 = vmatpush2.bf16.msra.mxu0 %v7764_v34  ;;  %6664 = vmatprep.subr.bf16.mxu1 %v8147_v58  ;;  %v7981_v34 = vcombine.high %v3515_v48, %v3519_v49  ;;  %v3387_v58 = vld [vmem:[#allocation8 + $0x4d0] sm:$0xff] }
 0x35f   :  { %6757 = vmatprep.subr.bf16.mxu0 %v8013_v46  ;;  %v3391_v46 = vld [vmem:[#allocation8 + $0x4f0] sm:$0xff] }
 0x360   :  { %v7852_v8 = vcombine.low %v3387_v58, %v3391_v46  ;;  %v3483_v48 = vld [vmem:[#allocation8 + $0x7d0] sm:$0xff] }
 0x361   :  { %6665 = vmatpush2.bf16.msra.mxu1 %v8146_v0  ;;  %6708 = vmatmul.mubr.bf16.vlgmr.msra.gmra.mxu0 %v8688_v1  ;;  %v6463_v11 = vpop.f32.mrf.mxu0  ;;  %v7853_v0 = vcombine.high %v3387_v58, %v3391_v46  ;;  %v3487_v49 = vld [vmem:[#allocation8 + $0x7f0] sm:$0xff] }
 0x362   :  { %v8791_v62 = vadd.f32 %v6463_v11, %v8781_v13  ;;  %6758 = vmatpush1.bf16.msra.mxu0 %v8012_v3  ;;  %6789 = vmatprep.mubr.bf16.mxu0 %v8742_v28  ;;  %v7973_v3 = vcombine.high %v3507_v47, %v3511_v52  ;;  %v7949_v58 = vcombine.high %v3483_v48, %v3487_v49  ;;  %v3475_v47 = vld [vmem:[#allocation8 + $0x790] sm:$0xff] }
 0x363   :  { %6716 = vmatprep.subr.bf16.mxu1 %v7885_v63  ;;  %v6465_v15 = vpop.f32.mrf.mxu0  ;;  %6759 = vmatprep.subr.bf16.mxu0 %v8005_v51  ;;  %v3379_v63 = vld [vmem:[#allocation8 + $0x490] sm:$0xff] }
 0x364   :  { %6667 = vmatmul.mubr.bf16.vlgmr.msra.gmra.mxu1 %v8771_v31  ;;  %v8796_v22 = vadd.f32 %v6465_v15, %v8783_v37  ;;  %v7868_v37 = vcombine.low %v3403_v18, %v3407_v21  ;;  %v3383_v51 = vld [vmem:[#allocation8 + $0x4b0] sm:$0xff]  ;;  %v7964_v21 = vcombine.low %v3499_v6, %v3503_v7 }
 0x365   :  { %6717 = vmatpush1.bf16.msra.mxu1 %v7884_v54  ;;  %6748 = vmatprep.mubr.bf16.mxu1 %v8681_v45  ;;  %v6467_v13 = vpop.f32.mrf.mxu0  ;;  %v7845_v11 = vcombine.high %v3379_v63, %v3383_v51  ;;  %v7965_v54 = vcombine.high %v3499_v6, %v3503_v7  ;;  %v3491_v15 = vld [vmem:[#allocation8 + $0x810] sm:$0xff]  ;;  %v7844_v18 = vcombine.low %v3379_v63, %v3383_v51 }
 0x366   :  { %6760 = vmatpush1.bf16.msra.mxu0 %v8004_v12  ;;  %6718 = vmatprep.subr.bf16.mxu1 %v7877_v30  ;;  %v3371_v12 = vld [vmem:[#allocation8 + $0x450] sm:$0xff] }
 0x367   :  { %v6468_v39 = vpop.f32.mrf.mxu0  ;;  %6761 = vmatprep.subr.bf16.mxu0 %v7997_v17  ;;  %v3375_v30 = vld [vmem:[#allocation8 + $0x470] sm:$0xff] }
 0x368   :  { %v3495_v17 = vld [vmem:[#allocation8 + $0x830] sm:$0xff]  ;;  %v7837_v23 = vcombine.high %v3371_v12, %v3375_v30  ;;  %v7836_v39 = vcombine.low %v3371_v12, %v3375_v30 }
 0x369   :  { %6719 = vmatpush1.bf16.msra.mxu1 %v7876_v2  ;;  %v7957_v24 = vcombine.high %v3491_v15, %v3495_v17  ;;  %v3363_v13 = vld [vmem:[#allocation8 + $0x410] sm:$0xff] }
 0x36a   :  { %6762 = vmatpush1.bf16.msra.mxu0 %v7996_v32  ;;  %6720 = vmatprep.subr.bf16.mxu1 %v7869_v36  ;;  %v3367_v2 = vld [vmem:[#allocation8 + $0x430] sm:$0xff] }
 0x36b   :  { %6763 = vmatprep.subr.bf16.mxu0 %v7989_v42  ;;  %v3611_v32 = vld [vmem:[#allocation8 + $0xbd0] sm:$0xff]  ;;  %v7956_v42 = vcombine.low %v3491_v15, %v3495_v17  ;;  %v7829_v10 = vcombine.high %v3363_v13, %v3367_v2 }
 0x36c   :  { %v3615_v36 = vld [vmem:[#allocation8 + $0xbf0] sm:$0xff] }
 0x36d   :  { %6721 = vmatpush1.bf16.msra.mxu1 %v7868_v37  ;;  %v8077_v44 = vcombine.high %v3611_v32, %v3615_v36  ;;  %v3603_v37 = vld [vmem:[#allocation8 + $0xb90] sm:$0xff] }
 0x36e   :  { %6764 = vmatpush1.bf16.msra.mxu0 %v7988_v57  ;;  %6722 = vmatprep.subr.bf16.mxu1 %v7861_v43  ;;  %v3607_v57 = vld [vmem:[#allocation8 + $0xbb0] sm:$0xff]  ;;  %v7828_v43 = vcombine.low %v3363_v13, %v3367_v2 }
 0x36f   :  { %6765 = vmatprep.subr.bf16.mxu0 %v7981_v34  ;;  %v8076_v34 = vcombine.low %v3611_v32, %v3615_v36  ;;  %v8069_v46 = vcombine.high %v3603_v37, %v3607_v57  ;;  %v3479_v52 = vld [vmem:[#allocation8 + $0x7b0] sm:$0xff] }
 0x370   :  { %v7941_v63 = vcombine.high %v3475_v47, %v3479_v52  ;;  %v3467_v6 = vld [vmem:[#allocation8 + $0x750] sm:$0xff] }
 0x371   :  { %6723 = vmatpush1.bf16.msra.mxu1 %v7860_v56  ;;  %v3595_v56 = vld [vmem:[#allocation8 + $0xb50] sm:$0xff] }
 0x372   :  { %6766 = vmatpush1.bf16.msra.mxu0 %v7980_v19  ;;  %6724 = vmatprep.subr.bf16.mxu1 %v7853_v0  ;;  %v3599_v19 = vld [vmem:[#allocation8 + $0xb70] sm:$0xff]  ;;  %v7948_v0 = vcombine.low %v3483_v48, %v3487_v49 }
 0x373   :  { %6767 = vmatprep.subr.bf16.mxu0 %v7973_v3  ;;  %v8068_v3 = vcombine.low %v3603_v37, %v3607_v57  ;;  %v8061_v51 = vcombine.high %v3595_v56, %v3599_v19  ;;  %v3471_v7 = vld [vmem:[#allocation8 + $0x770] sm:$0xff] }
 0x374   :  { %v7933_v12 = vcombine.high %v3467_v6, %v3471_v7  ;;  %v3459_v15 = vld [vmem:[#allocation8 + $0x710] sm:$0xff] }
 0x375   :  { %6725 = vmatpush1.bf16.msra.mxu1 %v7852_v8  ;;  %v3587_v8 = vld [vmem:[#allocation8 + $0xb10] sm:$0xff] }
 0x376   :  { %6768 = vmatpush1.bf16.msra.mxu0 %v7972_v59  ;;  %6726 = vmatprep.subr.bf16.mxu1 %v7845_v11  ;;  %v3591_v59 = vld [vmem:[#allocation8 + $0xb30] sm:$0xff]  ;;  %v7940_v11 = vcombine.low %v3475_v47, %v3479_v52 }
 0x377   :  { %6769 = vmatprep.subr.bf16.mxu0 %v7965_v54  ;;  %v8060_v54 = vcombine.low %v3595_v56, %v3599_v19  ;;  %v8053_v30 = vcombine.high %v3587_v8, %v3591_v59  ;;  %v3463_v17 = vld [vmem:[#allocation8 + $0x730] sm:$0xff] }
 0x378   :  { %v7925_v13 = vcombine.high %v3459_v15, %v3463_v17  ;;  %v3451_v32 = vld [vmem:[#allocation8 + $0x6d0] sm:$0xff] }
 0x379   :  { %6727 = vmatpush1.bf16.msra.mxu1 %v7844_v18  ;;  %v3579_v18 = vld [vmem:[#allocation8 + $0xad0] sm:$0xff] }
 0x37a   :  { %6770 = vmatpush1.bf16.msra.mxu0 %v7964_v21  ;;  %6728 = vmatprep.subr.bf16.mxu1 %v7837_v23  ;;  %v3583_v21 = vld [vmem:[#allocation8 + $0xaf0] sm:$0xff]  ;;  %v7932_v23 = vcombine.low %v3467_v6, %v3471_v7 }
 0x37b   :  { %6771 = vmatprep.subr.bf16.mxu0 %v7957_v24  ;;  %v8052_v24 = vcombine.low %v3587_v8, %v3591_v59  ;;  %v8045_v2 = vcombine.high %v3579_v18, %v3583_v21  ;;  %v3455_v36 = vld [vmem:[#allocation8 + $0x6f0] sm:$0xff] }
 0x37c   :  { %v7917_v48 = vcombine.high %v3451_v32, %v3455_v36  ;;  %v3443_v37 = vld [vmem:[#allocation8 + $0x690] sm:$0xff] }
 0x37d   :  { %6729 = vmatpush1.bf16.msra.mxu1 %v7836_v39  ;;  %v3571_v39 = vld [vmem:[#allocation8 + $0xa90] sm:$0xff] }
 0x37e   :  { %6772 = vmatpush1.bf16.msra.mxu0 %v7956_v42  ;;  %6730 = vmatprep.subr.bf16.mxu1 %v7829_v10  ;;  %v3575_v42 = vld [vmem:[#allocation8 + $0xab0] sm:$0xff]  ;;  %v7924_v10 = vcombine.low %v3459_v15, %v3463_v17 }
 0x37f   :  { %6773 = vmatprep.subr.bf16.mxu0 %v8077_v44  ;;  %v8044_v44 = vcombine.low %v3579_v18, %v3583_v21  ;;  %v8037_v49 = vcombine.high %v3571_v39, %v3575_v42  ;;  %v3447_v57 = vld [vmem:[#allocation8 + $0x6b0] sm:$0xff] }
 0x380   :  { %v7909_v47 = vcombine.high %v3443_v37, %v3447_v57  ;;  %v3435_v56 = vld [vmem:[#allocation8 + $0x650] sm:$0xff] }
 0x381   :  { %6731 = vmatpush1.bf16.msra.mxu1 %v7828_v43  ;;  %v3563_v43 = vld [vmem:[#allocation8 + $0xa50] sm:$0xff] }
 0x382   :  { %6774 = vmatpush2.bf16.msra.mxu0 %v8076_v34  ;;  %6732 = vmatprep.subr.bf16.mxu1 %v7949_v58  ;;  %v3567_v34 = vld [vmem:[#allocation8 + $0xa70] sm:$0xff]  ;;  %v7916_v58 = vcombine.low %v3451_v32, %v3455_v36 }
 0x383   :  { %6775 = vmatprep.subr.bf16.mxu0 %v8069_v46  ;;  %v8036_v46 = vcombine.low %v3571_v39, %v3575_v42  ;;  %v8029_v52 = vcombine.high %v3563_v43, %v3567_v34  ;;  %v3439_v19 = vld [vmem:[#allocation8 + $0x670] sm:$0xff] }
 0x384   :  { %v7901_v6 = vcombine.high %v3435_v56, %v3439_v19  ;;  %v3427_v8 = vld [vmem:[#allocation8 + $0x610] sm:$0xff] }
 0x385   :  { %6733 = vmatpush2.bf16.msra.mxu1 %v7948_v0  ;;  %v3555_v0 = vld [vmem:[#allocation8 + $0xa10] sm:$0xff] }
 0x386   :  { %6776 = vmatpush2.bf16.msra.mxu0 %v8068_v3  ;;  %6734 = vmatprep.subr.bf16.mxu1 %v7941_v63  ;;  %v3559_v3 = vld [vmem:[#allocation8 + $0xa30] sm:$0xff]  ;;  %v7908_v63 = vcombine.low %v3443_v37, %v3447_v57 }
 0x387   :  { %6777 = vmatprep.subr.bf16.mxu0 %v8061_v51  ;;  %v8028_v51 = vcombine.low %v3563_v43, %v3567_v34  ;;  %v8021_v7 = vcombine.high %v3555_v0, %v3559_v3  ;;  %v3431_v59 = vld [vmem:[#allocation8 + $0x630] sm:$0xff] }
 0x388   :  { %v7893_v15 = vcombine.high %v3427_v8, %v3431_v59  ;;  %v3675_v18 = vld [vmem:[#allocation8 + $0xdd0] sm:$0xff] }
 0x389   :  { %6735 = vmatpush2.bf16.msra.mxu1 %v7940_v11  ;;  %v3292_v11 = vld [vmem:[#allocation8 + $0x1d8] sm:$0xff]  ;;  %v3679_v21 = vld [vmem:[#allocation8 + $0xdf0] sm:$0xff] }
 0x38a   :  { %6778 = vmatpush2.bf16.msra.mxu0 %v8060_v54  ;;  %6736 = vmatprep.subr.bf16.mxu1 %v7933_v12  ;;  %v3296_v54 = vld [vmem:[#allocation8 + $0x1f8] sm:$0xff]  ;;  %v7900_v12 = vcombine.low %v3435_v56, %v3439_v19  ;;  %v8141_v32 = vcombine.high %v3675_v18, %v3679_v21  ;;  %v3667_v39 = vld [vmem:[#allocation8 + $0xd90] sm:$0xff] }
 0x38b   :  { %6779 = vmatprep.subr.bf16.mxu0 %v8053_v30  ;;  %v8020_v30 = vcombine.low %v3555_v0, %v3559_v3  ;;  %v7759_v17 = vcombine.high %v3292_v11, %v3296_v54  ;;  %v3671_v42 = vld [vmem:[#allocation8 + $0xdb0] sm:$0xff]  ;;  %v3272_v56 = vld [vmem:[#allocation8 + $0x138] sm:$0xff] }
 0x38c   :  { %v8133_v57 = vcombine.high %v3667_v39, %v3671_v42  ;;  %v8132_v0 = vcombine.low %v3667_v39, %v3671_v42  ;;  %v3635_v42 = vld [vmem:[#allocation8 + $0xc90] sm:$0xff] }
 0x38d   :  { %6737 = vmatpush2.bf16.msra.mxu1 %v7932_v23  ;;  %v3284_v23 = vld [vmem:[#allocation8 + $0x198] sm:$0xff] }
 0x38e   :  { %6780 = vmatpush2.bf16.msra.mxu0 %v8052_v24  ;;  %6738 = vmatprep.subr.bf16.mxu1 %v7925_v13  ;;  %v3288_v24 = vld [vmem:[#allocation8 + $0x1b8] sm:$0xff]  ;;  %v7892_v13 = vcombine.low %v3427_v8, %v3431_v59  ;;  %v3651_v59 = vld [vmem:[#allocation8 + $0xd10] sm:$0xff] }
 0x38f   :  { %6781 = vmatprep.subr.bf16.mxu0 %v8045_v2  ;;  %v7758_v2 = vcombine.low %v3292_v11, %v3296_v54  ;;  %v7751_v36 = vcombine.high %v3284_v23, %v3288_v24  ;;  %v7750_v37 = vcombine.low %v3284_v23, %v3288_v24  ;;  %v3655_v11 = vld [vmem:[#allocation8 + $0xd30] sm:$0xff]  ;;  %v3260_v54 = vld [vmem:[#allocation8 + $0xd8] sm:$0xff] }
 0x390   :  { %v3643_v23 = vld [vmem:[#allocation8 + $0xcd0] sm:$0xff]  ;;  %v3252_v24 = vld [vmem:[#allocation8 + $0x98] sm:$0xff] }
 0x391   :  { %6739 = vmatpush2.bf16.msra.mxu1 %v7924_v10  ;;  %v3276_v10 = vld [vmem:[#allocation8 + $0x158] sm:$0xff] }
 0x392   :  { %6782 = vmatpush2.bf16.msra.mxu0 %v8044_v44  ;;  %6740 = vmatprep.subr.bf16.mxu1 %v7917_v48  ;;  %v3280_v44 = vld [vmem:[#allocation8 + $0x178] sm:$0xff] }
 0x393   :  { %6783 = vmatprep.subr.bf16.mxu0 %v8037_v49  ;;  %v8140_v49 = vcombine.low %v3675_v18, %v3679_v21  ;;  %v7743_v34 = vcombine.high %v3276_v10, %v3280_v44  ;;  %v8117_v18 = vcombine.high %v3651_v59, %v3655_v11 }
 0x395   :  { %6741 = vmatpush2.bf16.msra.mxu1 %v7916_v58  ;;  %v3659_v58 = vld [vmem:[#allocation8 + $0xd50] sm:$0xff] }
 0x396   :  { %6784 = vmatpush2.bf16.msra.mxu0 %v8036_v46  ;;  %6742 = vmatprep.subr.bf16.mxu1 %v7909_v47  ;;  %v3663_v46 = vld [vmem:[#allocation8 + $0xd70] sm:$0xff] }
 0x397   :  { %6785 = vmatprep.subr.bf16.mxu0 %v8029_v52  ;;  %v3268_v52 = vld [vmem:[#allocation8 + $0x118] sm:$0xff] }
 0x398   :  { %v7735_v8 = vcombine.high %v3268_v52, %v3272_v56 }
 0x399   :  { %6743 = vmatpush2.bf16.msra.mxu1 %v7908_v63  ;;  %v7742_v63 = vcombine.low %v3276_v10, %v3280_v44  ;;  %v3639_v10 = vld [vmem:[#allocation8 + $0xcb0] sm:$0xff]  ;;  %v3244_v44 = vld [vmem:[#allocation8 + $0x58] sm:$0xff] }
 0x39a   :  { %6786 = vmatpush2.bf16.msra.mxu0 %v8028_v51  ;;  %6744 = vmatprep.subr.bf16.mxu1 %v7901_v6  ;;  %v8125_v51 = vcombine.high %v3659_v58, %v3663_v46 }
 0x39b   :  { %6787 = vmatprep.subr.bf16.mxu0 %v8021_v7 }
 0x39d   :  { %6745 = vmatpush2.bf16.msra.mxu1 %v7900_v12  ;;  %v3264_v12 = vld [vmem:[#allocation8 + $0xf8] sm:$0xff] }
 0x39e   :  { %6788 = vmatpush2.bf16.msra.mxu0 %v8020_v30  ;;  %6746 = vmatprep.subr.bf16.mxu1 %v7893_v15  ;;  %v8124_v30 = vcombine.low %v3659_v58, %v3663_v46  ;;  %v7727_v21 = vcombine.high %v3260_v54, %v3264_v12  ;;  %v3627_v46 = vld [vmem:[#allocation8 + $0xc50] sm:$0xff] }
 0x39f   :  { %6839 = vmatprep.subr.bf16.mxu0 %v7759_v17  ;;  %v7734_v17 = vcombine.low %v3268_v52, %v3272_v56  ;;  %v3236_v52 = vld [vmem:[#allocation8 + $0x18] sm:$0xff] }
 0x3a0   :  { %v3240_v56 = vld [vmem:[#allocation8 + $0x38] sm:$0xff] }
 0x3a1   :  { %6747 = vmatpush2.bf16.msra.mxu1 %v7892_v13  ;;  %v8799_v48 = vpop.f32.mrf.mxu0  ;;  %6790 = vmatmul.mubr.bf16.vlgmr.msra.gmra.mxu0 %v8746_v33  ;;  %v3256_v13 = vld [vmem:[#allocation8 + $0xb8] sm:$0xff] }
 0x3a2   :  { %6840 = vmatpush1.bf16.msra.mxu0 %v7758_v2  ;;  %6871 = vmatprep.mubr.bf16.mxu0 %v8638_v55  ;;  %v8116_v2 = vcombine.low %v3651_v59, %v3655_v11  ;;  %v7719_v39 = vcombine.high %v3252_v24, %v3256_v13  ;;  %v3360_v59 = vld [vmem:[#allocation8 + $0x3f8] sm:$0xff] }
 0x3a3   :  { %v8803_v43 = vpop.f32.mrf.mxu0  ;;  %6798 = vmatprep.subr.bf16.mxu1 %v8141_v32  ;;  %6841 = vmatprep.subr.bf16.mxu0 %v7751_v36  ;;  %v7726_v32 = vcombine.low %v3260_v54, %v3264_v12 }
 0x3a4   :  { %6749 = vmatmul.mubr.bf16.vlgmr.msra.gmra.mxu1 %v8690_v4  ;;  %v6504_v47 = vpop.f32.mrf.mxu1 }
 0x3a5   :  { %v8807_v19 = vadd.f32 %v6504_v47, %v8791_v62  ;;  %6799 = vmatpush1.bf16.msra.mxu1 %v8140_v49  ;;  %6830 = vmatprep.mubr.bf16.mxu1 %v8767_v40  ;;  %v6549_v55 = vpop.f32.mrf.mxu0  ;;  %v3248_v49 = vld [vmem:[#allocation8 + $0x78] sm:$0xff]  ;;  %v3631_v47 = vld [vmem:[#allocation8 + $0xc70] sm:$0xff] }
 0x3a6   :  { %v6506_v3 = vpop.f32.mrf.mxu1  ;;  %6842 = vmatpush1.bf16.msra.mxu0 %v7750_v37  ;;  %6800 = vmatprep.subr.bf16.mxu1 %v8133_v57  ;;  %v7718_v57 = vcombine.low %v3252_v24, %v3256_v13  ;;  %v7711_v58 = vcombine.high %v3244_v44, %v3248_v49  ;;  %v8100_v55 = vcombine.low %v3635_v42, %v3639_v10  ;;  %v3731_v13 = vld [vmem:[#allocation8 + $0xf90] sm:$0xff] }
 0x3a7   :  { %v8811_v6 = vadd.f32 %v6506_v3, %v8796_v22  ;;  %v6550_v7 = vpop.f32.mrf.mxu0  ;;  %6843 = vmatprep.subr.bf16.mxu0 %v7743_v34  ;;  %v3647_v22 = vld [vmem:[#allocation8 + $0xcf0] sm:$0xff]  ;;  %v8101_v34 = vcombine.high %v3635_v42, %v3639_v10  ;;  %v8093_v3 = vcombine.high %v3627_v46, %v3631_v47  ;;  %v8092_v11 = vcombine.low %v3627_v46, %v3631_v47 }
 0x3a8   :  { %v6508_v62 = vpop.f32.mrf.mxu1  ;;  %v8109_v36 = vcombine.high %v3643_v23, %v3647_v22  ;;  %v8108_v37 = vcombine.low %v3643_v23, %v3647_v22  ;;  %v3623_v7 = vld [vmem:[#allocation8 + $0xc30] sm:$0xff] }
 0x3a9   :  { %6801 = vmatpush1.bf16.msra.mxu1 %v8132_v0  ;;  %v7710_v0 = vcombine.low %v3244_v44, %v3248_v49  ;;  %v7702_v62 = vcombine.low %v3236_v52, %v3240_v56  ;;  %v3723_v49 = vld [vmem:[#allocation8 + $0xf50] sm:$0xff] }
 0x3aa   :  { %v6509_v15 = vpop.f32.mrf.mxu1  ;;  %6844 = vmatpush1.bf16.msra.mxu0 %v7742_v63  ;;  %6802 = vmatprep.subr.bf16.mxu1 %v8125_v51  ;;  %v7703_v63 = vcombine.high %v3236_v52, %v3240_v56  ;;  %v3619_v51 = vld [vmem:[#allocation8 + $0xc10] sm:$0xff] }
 0x3ab   :  { %6845 = vmatprep.subr.bf16.mxu0 %v7735_v8  ;;  %v3356_v8 = vld [vmem:[#allocation8 + $0x3d8] sm:$0xff]  ;;  %v8085_v54 = vcombine.high %v3619_v51, %v3623_v7  ;;  %v3743_v15 = vld [vmem:[#allocation8 + $0xff0] sm:$0xff] }
 0x3ac   :  { %v7823_v12 = vcombine.high %v3356_v8, %v3360_v59  ;;  %v7822_v23 = vcombine.low %v3356_v8, %v3360_v59  ;;  %v3715_v56 = vld [vmem:[#allocation8 + $0xf10] sm:$0xff] }
 0x3ad   :  { %6803 = vmatpush1.bf16.msra.mxu1 %v8124_v30  ;;  %v3739_v30 = vld [vmem:[#allocation8 + $0xfd0] sm:$0xff] }
 0x3ae   :  { %6846 = vmatpush1.bf16.msra.mxu0 %v7734_v17  ;;  %6804 = vmatprep.subr.bf16.mxu1 %v8117_v18  ;;  %v3348_v17 = vld [vmem:[#allocation8 + $0x398] sm:$0xff]  ;;  %v8205_v22 = vcombine.high %v3739_v30, %v3743_v15  ;;  %v3707_v59 = vld [vmem:[#allocation8 + $0xed0] sm:$0xff] }
 0x3af   :  { %6847 = vmatprep.subr.bf16.mxu0 %v7727_v21  ;;  %v3352_v18 = vld [vmem:[#allocation8 + $0x3b8] sm:$0xff]  ;;  %v8084_v21 = vcombine.low %v3619_v51, %v3623_v7 }
 0x3b0   :  { %v7815_v24 = vcombine.high %v3348_v17, %v3352_v18  ;;  %v7814_v42 = vcombine.low %v3348_v17, %v3352_v18  ;;  %v3699_v18 = vld [vmem:[#allocation8 + $0xe90] sm:$0xff] }
 0x3b1   :  { %6805 = vmatpush1.bf16.msra.mxu1 %v8116_v2  ;;  %v3735_v2 = vld [vmem:[#allocation8 + $0xfb0] sm:$0xff] }
 0x3b2   :  { %6848 = vmatpush1.bf16.msra.mxu0 %v7726_v32  ;;  %6806 = vmatprep.subr.bf16.mxu1 %v8109_v36  ;;  %v3340_v32 = vld [vmem:[#allocation8 + $0x358] sm:$0xff]  ;;  %v8197_v10 = vcombine.high %v3731_v13, %v3735_v2 }
 0x3b3   :  { %6849 = vmatprep.subr.bf16.mxu0 %v7719_v39  ;;  %v3344_v36 = vld [vmem:[#allocation8 + $0x378] sm:$0xff]  ;;  %v8204_v39 = vcombine.low %v3739_v30, %v3743_v15 }
 0x3b4   :  { %v7807_v44 = vcombine.high %v3340_v32, %v3344_v36  ;;  %v7806_v46 = vcombine.low %v3340_v32, %v3344_v36  ;;  %v3691_v36 = vld [vmem:[#allocation8 + $0xe50] sm:$0xff] }
 0x3b5   :  { %6807 = vmatpush1.bf16.msra.mxu1 %v8108_v37  ;;  %v3727_v37 = vld [vmem:[#allocation8 + $0xf70] sm:$0xff] }
 0x3b6   :  { %6850 = vmatpush1.bf16.msra.mxu0 %v7718_v57  ;;  %6808 = vmatprep.subr.bf16.mxu1 %v8101_v34  ;;  %v3332_v57 = vld [vmem:[#allocation8 + $0x318] sm:$0xff]  ;;  %v8189_v47 = vcombine.high %v3723_v49, %v3727_v37 }
 0x3b7   :  { %6851 = vmatprep.subr.bf16.mxu0 %v7711_v58  ;;  %v3336_v34 = vld [vmem:[#allocation8 + $0x338] sm:$0xff]  ;;  %v8196_v58 = vcombine.low %v3731_v13, %v3735_v2 }
 0x3b8   :  { %v7799_v52 = vcombine.high %v3332_v57, %v3336_v34  ;;  %v7798_v51 = vcombine.low %v3332_v57, %v3336_v34  ;;  %v3683_v34 = vld [vmem:[#allocation8 + $0xe10] sm:$0xff] }
 0x3b9   :  { %6809 = vmatpush1.bf16.msra.mxu1 %v8100_v55  ;;  %v3719_v55 = vld [vmem:[#allocation8 + $0xf30] sm:$0xff] }
 0x3ba   :  { %6852 = vmatpush1.bf16.msra.mxu0 %v7710_v0  ;;  %6810 = vmatprep.subr.bf16.mxu1 %v8093_v3  ;;  %v3324_v0 = vld [vmem:[#allocation8 + $0x2d8] sm:$0xff]  ;;  %v8181_v7 = vcombine.high %v3715_v56, %v3719_v55 }
 0x3bb   :  { %6853 = vmatprep.subr.bf16.mxu0 %v7703_v63  ;;  %v3328_v3 = vld [vmem:[#allocation8 + $0x2f8] sm:$0xff]  ;;  %v8188_v63 = vcombine.low %v3723_v49, %v3727_v37 }
 0x3bc   :  { %v7791_v8 = vcombine.high %v3324_v0, %v3328_v3  ;;  %v7790_v30 = vcombine.low %v3324_v0, %v3328_v3  ;;  %v3420_v3 = vld [vmem:[#allocation8 + $0x5d8] sm:$0xff] }
 0x3bd   :  { %6811 = vmatpush1.bf16.msra.mxu1 %v8092_v11  ;;  %v3711_v11 = vld [vmem:[#allocation8 + $0xef0] sm:$0xff] }
 0x3be   :  { %6854 = vmatpush1.bf16.msra.mxu0 %v7702_v62  ;;  %6812 = vmatprep.subr.bf16.mxu1 %v8085_v54  ;;  %v3316_v62 = vld [vmem:[#allocation8 + $0x298] sm:$0xff]  ;;  %v8173_v15 = vcombine.high %v3707_v59, %v3711_v11 }
 0x3bf   :  { %6855 = vmatprep.subr.bf16.mxu0 %v7823_v12  ;;  %v3320_v54 = vld [vmem:[#allocation8 + $0x2b8] sm:$0xff]  ;;  %v8180_v12 = vcombine.low %v3715_v56, %v3719_v55 }
 0x3c0   :  { %v7783_v17 = vcombine.high %v3316_v62, %v3320_v54  ;;  %v7782_v13 = vcombine.low %v3316_v62, %v3320_v54 }
 0x3c1   :  { %6813 = vmatpush1.bf16.msra.mxu1 %v8084_v21  ;;  %v3703_v21 = vld [vmem:[#allocation8 + $0xeb0] sm:$0xff] }
 0x3c2   :  { %6856 = vmatpush2.bf16.msra.mxu0 %v7822_v23  ;;  %6814 = vmatprep.subr.bf16.mxu1 %v8205_v22  ;;  %v3308_v23 = vld [vmem:[#allocation8 + $0x258] sm:$0xff]  ;;  %v8165_v2 = vcombine.high %v3699_v18, %v3703_v21 }
 0x3c3   :  { %6857 = vmatprep.subr.bf16.mxu0 %v7815_v24  ;;  %v3312_v22 = vld [vmem:[#allocation8 + $0x278] sm:$0xff]  ;;  %v8172_v24 = vcombine.low %v3707_v59, %v3711_v11  ;;  %v8813_v11 = vld [vmem:[#allocation10] sm:$0xff] }
 0x3c4   :  { %v7775_v32 = vcombine.high %v3308_v23, %v3312_v22  ;;  %v7774_v49 = vcombine.low %v3308_v23, %v3312_v22  ;;  %v3758_v62 = vrot.slane %v8813_v11, %v8627_v25 }
 0x3c5   :  { %6815 = vmatpush2.bf16.msra.mxu1 %v8204_v39  ;;  %v3695_v39 = vld [vmem:[#allocation8 + $0xe70] sm:$0xff] }
 0x3c6   :  { %6858 = vmatpush2.bf16.msra.mxu0 %v7814_v42  ;;  %6816 = vmatprep.subr.bf16.mxu1 %v8197_v10  ;;  %v3300_v42 = vld [vmem:[#allocation8 + $0x218] sm:$0xff]  ;;  %v8157_v37 = vcombine.high %v3691_v36, %v3695_v39 }
 0x3c7   :  { %6859 = vmatprep.subr.bf16.mxu0 %v7807_v44  ;;  %v3304_v10 = vld [vmem:[#allocation8 + $0x238] sm:$0xff]  ;;  %v8164_v44 = vcombine.low %v3699_v18, %v3703_v21  ;;  %v3762_v21 = vrot.slane %v8813_v11, %v8630_v35 }
 0x3c8   :  { %v7767_v57 = vcombine.high %v3300_v42, %v3304_v10  ;;  %v7766_v56 = vcombine.low %v3300_v42, %v3304_v10  ;;  %v3536_v18 = vld [vmem:[#allocation8 + $0x978] sm:$0xff] }
 0x3c9   :  { %6817 = vmatpush2.bf16.msra.mxu1 %v8196_v58  ;;  %v3687_v58 = vld [vmem:[#allocation8 + $0xe30] sm:$0xff]  ;;  %v3408_v42 = vld [vmem:[#allocation8 + $0x578] sm:$0xff] }
 0x3ca   :  { %6860 = vmatpush2.bf16.msra.mxu0 %v7806_v46  ;;  %6818 = vmatprep.subr.bf16.mxu1 %v8189_v47  ;;  %v3548_v46 = vld [vmem:[#allocation8 + $0x9d8] sm:$0xff]  ;;  %v8149_v55 = vcombine.high %v3683_v34, %v3687_v58 }
 0x3cb   :  { %6861 = vmatprep.subr.bf16.mxu0 %v7799_v52  ;;  %v3552_v47 = vld [vmem:[#allocation8 + $0x9f8] sm:$0xff]  ;;  %v8156_v52 = vcombine.low %v3691_v36, %v3695_v39 }
 0x3cc   :  { %v8015_v0 = vcombine.high %v3548_v46, %v3552_v47  ;;  %v8014_v59 = vcombine.low %v3548_v46, %v3552_v47  ;;  %v3404_v39 = vld [vmem:[#allocation8 + $0x558] sm:$0xff] }
 0x3cd   :  { %6819 = vmatpush2.bf16.msra.mxu1 %v8188_v63  ;;  %v3424_v63 = vld [vmem:[#allocation8 + $0x5f8] sm:$0xff] }
 0x3ce   :  { %6862 = vmatpush2.bf16.msra.mxu0 %v7798_v51  ;;  %6820 = vmatprep.subr.bf16.mxu1 %v8181_v7  ;;  %v3540_v51 = vld [vmem:[#allocation8 + $0x998] sm:$0xff]  ;;  %v7887_v54 = vcombine.high %v3420_v3, %v3424_v63  ;;  %v7886_v22 = vcombine.low %v3420_v3, %v3424_v63 }
 0x3cf   :  { %6863 = vmatprep.subr.bf16.mxu0 %v7791_v8  ;;  %v3544_v7 = vld [vmem:[#allocation8 + $0x9b8] sm:$0xff]  ;;  %v8148_v8 = vcombine.low %v3683_v34, %v3687_v58  ;;  %v7871_v58 = vcombine.high %v3404_v39, %v3408_v42 }
 0x3d0   :  { %v3516_v3 = vld [vmem:[#allocation8 + $0x8d8] sm:$0xff] }
 0x3d1   :  { %6821 = vmatpush2.bf16.msra.mxu1 %v8180_v12  ;;  %v8007_v12 = vcombine.high %v3540_v51, %v3544_v7  ;;  %v3520_v63 = vld [vmem:[#allocation8 + $0x8f8] sm:$0xff] }
 0x3d2   :  { %6864 = vmatpush2.bf16.msra.mxu0 %v7790_v30  ;;  %6822 = vmatprep.subr.bf16.mxu1 %v8173_v15  ;;  %v3412_v30 = vld [vmem:[#allocation8 + $0x598] sm:$0xff] }
 0x3d3   :  { %6865 = vmatprep.subr.bf16.mxu0 %v7783_v17  ;;  %v3416_v15 = vld [vmem:[#allocation8 + $0x5b8] sm:$0xff] }
 0x3d4   :  { %v3532_v17 = vld [vmem:[#allocation8 + $0x958] sm:$0xff] }
 0x3d5   :  { %6823 = vmatpush2.bf16.msra.mxu1 %v8172_v24  ;;  %v8006_v24 = vcombine.low %v3540_v51, %v3544_v7  ;;  %v7999_v36 = vcombine.high %v3532_v17, %v3536_v18  ;;  %v7998_v34 = vcombine.low %v3532_v17, %v3536_v18  ;;  %v7982_v18 = vcombine.low %v3516_v3, %v3520_v63 }
 0x3d6   :  { %6866 = vmatpush2.bf16.msra.mxu0 %v7782_v13  ;;  %6824 = vmatprep.subr.bf16.mxu1 %v8165_v2  ;;  %v7879_v13 = vcombine.high %v3412_v30, %v3416_v15  ;;  %v6546_v2 = vadd.f32 %v8799_v48, %v3758_v62  ;;  %v7983_v62 = vcombine.high %v3516_v3, %v3520_v63  ;;  %v3484_v3 = vld [vmem:[#allocation8 + $0x7d8] sm:$0xff] }
 0x3d7   :  { %6867 = vmatprep.subr.bf16.mxu0 %v7775_v32  ;;  %v3488_v63 = vld [vmem:[#allocation8 + $0x7f8] sm:$0xff] }
 0x3d9   :  { %6825 = vmatpush2.bf16.msra.mxu1 %v8164_v44  ;;  %v3524_v44 = vld [vmem:[#allocation8 + $0x918] sm:$0xff] }
 0x3da   :  { %6868 = vmatpush2.bf16.msra.mxu0 %v7774_v49  ;;  %6826 = vmatprep.subr.bf16.mxu1 %v8157_v37  ;;  %v3528_v49 = vld [vmem:[#allocation8 + $0x938] sm:$0xff] }
 0x3db   :  { %6869 = vmatprep.subr.bf16.mxu0 %v7767_v57  ;;  %v7878_v57 = vcombine.low %v3412_v30, %v3416_v15  ;;  %v3508_v30 = vld [vmem:[#allocation8 + $0x898] sm:$0xff] }
 0x3dc   :  { %v3512_v15 = vld [vmem:[#allocation8 + $0x8b8] sm:$0xff] }
 0x3dd   :  { %6827 = vmatpush2.bf16.msra.mxu1 %v8156_v52  ;;  %v7991_v52 = vcombine.high %v3524_v44, %v3528_v49 }
 0x3de   :  { %6870 = vmatpush2.bf16.msra.mxu0 %v7766_v56  ;;  %6828 = vmatprep.subr.bf16.mxu1 %v8149_v55  ;;  %v3396_v56 = vld [vmem:[#allocation8 + $0x518] sm:$0xff] }
 0x3df   :  { %6921 = vmatprep.subr.bf16.mxu0 %v8015_v0  ;;  %v3400_v55 = vld [vmem:[#allocation8 + $0x538] sm:$0xff] }
 0x3e0   :  { %v7862_v17 = vcombine.low %v3396_v56, %v3400_v55 }
 0x3e1   :  { %6829 = vmatpush2.bf16.msra.mxu1 %v8148_v8  ;;  %v6627_v23 = vpop.f32.mrf.mxu0  ;;  %6872 = vmatmul.mubr.bf16.vlgmr.msra.gmra.mxu0 %v8688_v1  ;;  %v6548_v1 = vadd.f32 %v8803_v43, %v3762_v21  ;;  %v7990_v8 = vcombine.low %v3524_v44, %v3528_v49  ;;  %v3376_v44 = vld [vmem:[#allocation8 + $0x478] sm:$0xff] }
 0x3e2   :  { %6922 = vmatpush1.bf16.msra.mxu0 %v8014_v59  ;;  %6953 = vmatprep.mubr.bf16.mxu0 %v8742_v28  ;;  %v7863_v59 = vcombine.high %v3396_v56, %v3400_v55  ;;  %v3492_v49 = vld [vmem:[#allocation8 + $0x818] sm:$0xff] }
 0x3e3   :  { %v6629_v32 = vpop.f32.mrf.mxu0  ;;  %6880 = vmatprep.subr.bf16.mxu1 %v7887_v54  ;;  %6923 = vmatprep.subr.bf16.mxu0 %v8007_v12  ;;  %v3388_v54 = vld [vmem:[#allocation8 + $0x4d8] sm:$0xff] }
 0x3e4   :  { %v6586_v10 = vpop.f32.mrf.mxu1  ;;  %6831 = vmatmul.mubr.bf16.vlgmr.msra.gmra.mxu1 %v8771_v31  ;;  %v3392_v12 = vld [vmem:[#allocation8 + $0x4f8] sm:$0xff] }
 0x3e5   :  { %v6587_v37 = vadd.f32 %v6586_v10, %v6546_v2  ;;  %6881 = vmatpush1.bf16.msra.mxu1 %v7886_v22  ;;  %6912 = vmatprep.mubr.bf16.mxu1 %v8681_v45  ;;  %v6631_v28 = vpop.f32.mrf.mxu0  ;;  %v7870_v45 = vcombine.low %v3404_v39, %v3408_v42  ;;  %v7855_v21 = vcombine.high %v3388_v54, %v3392_v12  ;;  %v3380_v22 = vld [vmem:[#allocation8 + $0x498] sm:$0xff] }
 0x3e6   :  { %v6588_v48 = vpop.f32.mrf.mxu1  ;;  %6924 = vmatpush1.bf16.msra.mxu0 %v8006_v24  ;;  %6882 = vmatprep.subr.bf16.mxu1 %v7879_v13  ;;  %v3384_v24 = vld [vmem:[#allocation8 + $0x4b8] sm:$0xff] }
 0x3e7   :  { %v6589_v46 = vadd.f32 %v6588_v48, %v6548_v1  ;;  %v6632_v47 = vpop.f32.mrf.mxu0  ;;  %6925 = vmatprep.subr.bf16.mxu0 %v7999_v36  ;;  %v8825_v0 = vadd.f32 %v6627_v23, %v6587_v37  ;;  %v7975_v23 = vcombine.high %v3508_v30, %v3512_v15  ;;  %v3500_v13 = vld [vmem:[#allocation8 + $0x858] sm:$0xff]  ;;  %v7974_v36 = vcombine.low %v3508_v30, %v3512_v15 }
 0x3e8   :  { %v6590_v43 = vpop.f32.mrf.mxu1  ;;  %v3504_v2 = vld [vmem:[#allocation8 + $0x878] sm:$0xff]  ;;  %v7847_v39 = vcombine.high %v3380_v22, %v3384_v24  ;;  %v7846_v37 = vcombine.low %v3380_v22, %v3384_v24 }
 0x3e9   :  { %6883 = vmatpush1.bf16.msra.mxu1 %v7878_v57  ;;  %v8827_v51 = vadd.f32 %v6629_v32, %v6589_v46  ;;  %v7854_v32 = vcombine.low %v3388_v54, %v3392_v12  ;;  %v7967_v42 = vcombine.high %v3500_v13, %v3504_v2  ;;  %v3372_v10 = vld [vmem:[#allocation8 + $0x458] sm:$0xff]  ;;  %v7966_v28 = vcombine.low %v3500_v13, %v3504_v2 }
 0x3ea   :  { %v6591_v7 = vpop.f32.mrf.mxu1  ;;  %6926 = vmatpush1.bf16.msra.mxu0 %v7998_v34  ;;  %6884 = vmatprep.subr.bf16.mxu1 %v7871_v58  ;;  %v3496_v1 = vld [vmem:[#allocation8 + $0x838] sm:$0xff]  ;;  %v7839_v57 = vcombine.high %v3372_v10, %v3376_v44 }
 0x3eb   :  { %6927 = vmatprep.subr.bf16.mxu0 %v7991_v52  ;;  %v7959_v48 = vcombine.high %v3492_v49, %v3496_v1  ;;  %v3364_v34 = vld [vmem:[#allocation8 + $0x418] sm:$0xff]  ;;  %v7838_v52 = vcombine.low %v3372_v10, %v3376_v44  ;;  %v7958_v56 = vcombine.low %v3492_v49, %v3496_v1 }
 0x3ec   :  { %v3368_v58 = vld [vmem:[#allocation8 + $0x438] sm:$0xff] }
 0x3ed   :  { %6885 = vmatpush1.bf16.msra.mxu1 %v7870_v45  ;;  %v3612_v46 = vld [vmem:[#allocation8 + $0xbd8] sm:$0xff]  ;;  %v7831_v55 = vcombine.high %v3364_v34, %v3368_v58 }
 0x3ee   :  { %6928 = vmatpush1.bf16.msra.mxu0 %v7990_v8  ;;  %6886 = vmatprep.subr.bf16.mxu1 %v7863_v59  ;;  %v3616_v47 = vld [vmem:[#allocation8 + $0xbf8] sm:$0xff]  ;;  %v7830_v8 = vcombine.low %v3364_v34, %v3368_v58 }
 0x3ef   :  { %6929 = vmatprep.subr.bf16.mxu0 %v7983_v62  ;;  %v8079_v43 = vcombine.high %v3612_v46, %v3616_v47  ;;  %v3604_v45 = vld [vmem:[#allocation8 + $0xb98] sm:$0xff]  ;;  %v8078_v59 = vcombine.low %v3612_v46, %v3616_v47  ;;  %v7951_v62 = vcombine.high %v3484_v3, %v3488_v63 }
 0x3f0   :  { %v3608_v7 = vld [vmem:[#allocation8 + $0xbb8] sm:$0xff] }
 0x3f1   :  { %6887 = vmatpush1.bf16.msra.mxu1 %v7862_v17  ;;  %v8071_v54 = vcombine.high %v3604_v45, %v3608_v7  ;;  %v3476_v12 = vld [vmem:[#allocation8 + $0x798] sm:$0xff] }
 0x3f2   :  { %6930 = vmatpush1.bf16.msra.mxu0 %v7982_v18  ;;  %6888 = vmatprep.subr.bf16.mxu1 %v7855_v21  ;;  %v3480_v30 = vld [vmem:[#allocation8 + $0x7b8] sm:$0xff]  ;;  %v7950_v18 = vcombine.low %v3484_v3, %v3488_v63  ;;  %v8070_v21 = vcombine.low %v3604_v45, %v3608_v7 }
 0x3f3   :  { %6931 = vmatprep.subr.bf16.mxu0 %v7975_v23  ;;  %v3596_v15 = vld [vmem:[#allocation8 + $0xb58] sm:$0xff]  ;;  %v7943_v23 = vcombine.high %v3476_v12, %v3480_v30 }
 0x3f4   :  { %v3600_v17 = vld [vmem:[#allocation8 + $0xb78] sm:$0xff] }
 0x3f5   :  { %6889 = vmatpush1.bf16.msra.mxu1 %v7854_v32  ;;  %v8063_v22 = vcombine.high %v3596_v15, %v3600_v17  ;;  %v3468_v24 = vld [vmem:[#allocation8 + $0x758] sm:$0xff] }
 0x3f6   :  { %6932 = vmatpush1.bf16.msra.mxu0 %v7974_v36  ;;  %6890 = vmatprep.subr.bf16.mxu1 %v7847_v39  ;;  %v3472_v13 = vld [vmem:[#allocation8 + $0x778] sm:$0xff]  ;;  %v7942_v36 = vcombine.low %v3476_v12, %v3480_v30  ;;  %v8062_v39 = vcombine.low %v3596_v15, %v3600_v17 }
 0x3f7   :  { %6933 = vmatprep.subr.bf16.mxu0 %v7967_v42  ;;  %v3588_v2 = vld [vmem:[#allocation8 + $0xb18] sm:$0xff]  ;;  %v7935_v42 = vcombine.high %v3468_v24, %v3472_v13 }
 0x3f8   :  { %v3592_v32 = vld [vmem:[#allocation8 + $0xb38] sm:$0xff] }
 0x3f9   :  { %6891 = vmatpush1.bf16.msra.mxu1 %v7846_v37  ;;  %v8055_v10 = vcombine.high %v3588_v2, %v3592_v32  ;;  %v3460_v44 = vld [vmem:[#allocation8 + $0x718] sm:$0xff] }
 0x3fa   :  { %6934 = vmatpush1.bf16.msra.mxu0 %v7966_v28  ;;  %6892 = vmatprep.subr.bf16.mxu1 %v7839_v57  ;;  %v3464_v49 = vld [vmem:[#allocation8 + $0x738] sm:$0xff]  ;;  %v7934_v28 = vcombine.low %v3468_v24, %v3472_v13  ;;  %v8054_v57 = vcombine.low %v3588_v2, %v3592_v32 }
 0x3fb   :  { %6935 = vmatprep.subr.bf16.mxu0 %v7959_v48  ;;  %v3580_v1 = vld [vmem:[#allocation8 + $0xad8] sm:$0xff]  ;;  %v7927_v48 = vcombine.high %v3460_v44, %v3464_v49 }
 0x3fc   :  { %v3584_v37 = vld [vmem:[#allocation8 + $0xaf8] sm:$0xff] }
 0x3fd   :  { %6893 = vmatpush1.bf16.msra.mxu1 %v7838_v52  ;;  %v8047_v34 = vcombine.high %v3580_v1, %v3584_v37  ;;  %v3452_v58 = vld [vmem:[#allocation8 + $0x6d8] sm:$0xff] }
 0x3fe   :  { %6936 = vmatpush1.bf16.msra.mxu0 %v7958_v56  ;;  %6894 = vmatprep.subr.bf16.mxu1 %v7831_v55  ;;  %v3456_v46 = vld [vmem:[#allocation8 + $0x6f8] sm:$0xff]  ;;  %v7926_v56 = vcombine.low %v3460_v44, %v3464_v49  ;;  %v8046_v55 = vcombine.low %v3580_v1, %v3584_v37 }
 0x3ff   :  { %6937 = vmatprep.subr.bf16.mxu0 %v8079_v43  ;;  %v3572_v47 = vld [vmem:[#allocation8 + $0xa98] sm:$0xff]  ;;  %v7919_v43 = vcombine.high %v3452_v58, %v3456_v46 }
 0x400   :  { %v3576_v52 = vld [vmem:[#allocation8 + $0xab8] sm:$0xff] }
 0x401   :  { %6895 = vmatpush1.bf16.msra.mxu1 %v7830_v8  ;;  %v8039_v3 = vcombine.high %v3572_v47, %v3576_v52  ;;  %v3444_v63 = vld [vmem:[#allocation8 + $0x698] sm:$0xff] }
 0x402   :  { %6938 = vmatpush2.bf16.msra.mxu0 %v8078_v59  ;;  %6896 = vmatprep.subr.bf16.mxu1 %v7951_v62  ;;  %v3448_v45 = vld [vmem:[#allocation8 + $0x6b8] sm:$0xff]  ;;  %v7918_v59 = vcombine.low %v3452_v58, %v3456_v46  ;;  %v8038_v62 = vcombine.low %v3572_v47, %v3576_v52 }
 0x403   :  { %6939 = vmatprep.subr.bf16.mxu0 %v8071_v54  ;;  %v3564_v7 = vld [vmem:[#allocation8 + $0xa58] sm:$0xff]  ;;  %v7911_v54 = vcombine.high %v3444_v63, %v3448_v45 }
 0x404   :  { %v3568_v8 = vld [vmem:[#allocation8 + $0xa78] sm:$0xff] }
 0x405   :  { %6897 = vmatpush2.bf16.msra.mxu1 %v7950_v18  ;;  %v8031_v12 = vcombine.high %v3564_v7, %v3568_v8  ;;  %v3436_v30 = vld [vmem:[#allocation8 + $0x658] sm:$0xff] }
 0x406   :  { %6940 = vmatpush2.bf16.msra.mxu0 %v8070_v21  ;;  %6898 = vmatprep.subr.bf16.mxu1 %v7943_v23  ;;  %v3440_v15 = vld [vmem:[#allocation8 + $0x678] sm:$0xff]  ;;  %v7910_v21 = vcombine.low %v3444_v63, %v3448_v45  ;;  %v8030_v23 = vcombine.low %v3564_v7, %v3568_v8 }
 0x407   :  { %6941 = vmatprep.subr.bf16.mxu0 %v8063_v22  ;;  %v3556_v17 = vld [vmem:[#allocation8 + $0xa18] sm:$0xff]  ;;  %v7903_v22 = vcombine.high %v3436_v30, %v3440_v15  ;;  %v7902_v32 = vcombine.low %v3436_v30, %v3440_v15 }
 0x408   :  { %v3560_v18 = vld [vmem:[#allocation8 + $0xa38] sm:$0xff] }
 0x409   :  { %6899 = vmatpush2.bf16.msra.mxu1 %v7942_v36  ;;  %v8023_v24 = vcombine.high %v3556_v17, %v3560_v18  ;;  %v3428_v13 = vld [vmem:[#allocation8 + $0x618] sm:$0xff]  ;;  %v8022_v36 = vcombine.low %v3556_v17, %v3560_v18 }
 0x40a   :  { %6942 = vmatpush2.bf16.msra.mxu0 %v8062_v39  ;;  %6900 = vmatprep.subr.bf16.mxu1 %v7935_v42  ;;  %v3432_v2 = vld [vmem:[#allocation8 + $0x638] sm:$0xff] }
 0x40b   :  { %6943 = vmatprep.subr.bf16.mxu0 %v8055_v10  ;;  %v7895_v39 = vcombine.high %v3428_v13, %v3432_v2  ;;  %v3676_v42 = vld [vmem:[#allocation8 + $0xdd8] sm:$0xff]  ;;  %v7894_v44 = vcombine.low %v3428_v13, %v3432_v2 }
 0x40c   :  { %v3680_v10 = vld [vmem:[#allocation8 + $0xdf8] sm:$0xff] }
 0x40d   :  { %6901 = vmatpush2.bf16.msra.mxu1 %v7934_v28  ;;  %v8143_v49 = vcombine.high %v3676_v42, %v3680_v10  ;;  %v3668_v1 = vld [vmem:[#allocation8 + $0xd98] sm:$0xff] }
 0x40e   :  { %6944 = vmatpush2.bf16.msra.mxu0 %v8054_v57  ;;  %6902 = vmatprep.subr.bf16.mxu1 %v7927_v48  ;;  %v3672_v37 = vld [vmem:[#allocation8 + $0xdb8] sm:$0xff]  ;;  %v8142_v57 = vcombine.low %v3676_v42, %v3680_v10 }
 0x40f   :  { %6945 = vmatprep.subr.bf16.mxu0 %v8047_v34  ;;  %v8135_v48 = vcombine.high %v3668_v1, %v3672_v37  ;;  %v3660_v58 = vld [vmem:[#allocation8 + $0xd58] sm:$0xff] }
 0x410   :  { %v3664_v46 = vld [vmem:[#allocation8 + $0xd78] sm:$0xff] }
 0x411   :  { %6903 = vmatpush2.bf16.msra.mxu1 %v7926_v56  ;;  %v3652_v45 = vld [vmem:[#allocation8 + $0xd18] sm:$0xff] }
 0x412   :  { %6946 = vmatpush2.bf16.msra.mxu0 %v8046_v55  ;;  %6904 = vmatprep.subr.bf16.mxu1 %v7919_v43  ;;  %v8134_v55 = vcombine.low %v3668_v1, %v3672_v37  ;;  %v3656_v7 = vld [vmem:[#allocation8 + $0xd38] sm:$0xff] }
 0x413   :  { %6947 = vmatprep.subr.bf16.mxu0 %v8039_v3  ;;  %v3636_v30 = vld [vmem:[#allocation8 + $0xc98] sm:$0xff] }
 0x414   :  { %v3640_v15 = vld [vmem:[#allocation8 + $0xcb8] sm:$0xff] }
 0x415   :  { %6905 = vmatpush2.bf16.msra.mxu1 %v7918_v59  ;;  %v8103_v17 = vcombine.high %v3636_v30, %v3640_v15  ;;  %v3628_v18 = vld [vmem:[#allocation8 + $0xc58] sm:$0xff] }
 0x416   :  { %6948 = vmatpush2.bf16.msra.mxu0 %v8038_v62  ;;  %6906 = vmatprep.subr.bf16.mxu1 %v7911_v54  ;;  %v3644_v62 = vld [vmem:[#allocation8 + $0xcd8] sm:$0xff] }
 0x417   :  { %6949 = vmatprep.subr.bf16.mxu0 %v8031_v12  ;;  %v3648_v54 = vld [vmem:[#allocation8 + $0xcf8] sm:$0xff] }
 0x418   :  { %v8111_v12 = vcombine.high %v3644_v62, %v3648_v54  ;;  %v3624_v13 = vld [vmem:[#allocation8 + $0xc38] sm:$0xff] }
 0x419   :  { %6907 = vmatpush2.bf16.msra.mxu1 %v7910_v21  ;;  %v3632_v21 = vld [vmem:[#allocation8 + $0xc78] sm:$0xff] }
 0x41a   :  { %6950 = vmatpush2.bf16.msra.mxu0 %v8030_v23  ;;  %6908 = vmatprep.subr.bf16.mxu1 %v7903_v22  ;;  %v8102_v23 = vcombine.low %v3636_v30, %v3640_v15  ;;  %v8095_v22 = vcombine.high %v3628_v18, %v3632_v21  ;;  %v8094_v2 = vcombine.low %v3628_v18, %v3632_v21  ;;  %v3684_v30 = vld [vmem:[#allocation8 + $0xe18] sm:$0xff] }
 0x41b   :  { %6951 = vmatprep.subr.bf16.mxu0 %v8023_v24  ;;  %v3620_v24 = vld [vmem:[#allocation8 + $0xc18] sm:$0xff]  ;;  %v3766_v21 = vrot.slane %v8813_v11, %v8679_v41 }
 0x41c   :  { %v8086_v42 = vcombine.low %v3620_v24, %v3624_v13  ;;  %v3688_v15 = vld [vmem:[#allocation8 + $0xe38] sm:$0xff] }
 0x41d   :  { %6909 = vmatpush2.bf16.msra.mxu1 %v7902_v32  ;;  %v8087_v32 = vcombine.high %v3620_v24, %v3624_v13  ;;  %v8150_v18 = vcombine.low %v3684_v30, %v3688_v15 }
 0x41e   :  { %6952 = vmatpush2.bf16.msra.mxu0 %v8022_v36  ;;  %6910 = vmatprep.subr.bf16.mxu1 %v7895_v39  ;;  %v3740_v36 = vld [vmem:[#allocation8 + $0xfd8] sm:$0xff] }
 0x41f   :  { %v3744_v39 = vld [vmem:[#allocation8 + $0xff8] sm:$0xff] }
 0x420   :  { %v8207_v10 = vcombine.high %v3740_v36, %v3744_v39  ;;  %v8206_v1 = vcombine.low %v3740_v36, %v3744_v39 }
 0x421   :  { %6911 = vmatpush2.bf16.msra.mxu1 %v7894_v44  ;;  %v8829_v28 = vpop.f32.mrf.mxu0  ;;  %6954 = vmatmul.mubr.bf16.vlgmr.msra.gmra.mxu0 %v8746_v33  ;;  %v8127_v33 = vcombine.high %v3660_v58, %v3664_v46  ;;  %v3732_v44 = vld [vmem:[#allocation8 + $0xf98] sm:$0xff] }
 0x422   :  { %6962 = vmatprep.subr.bf16.mxu1 %v8143_v49  ;;  %v3736_v49 = vld [vmem:[#allocation8 + $0xfb8] sm:$0xff]  ;;  %v6710_v24 = vadd.f32 %v8829_v28, %v3766_v21 }
 0x423   :  { %v8832_v34 = vpop.f32.mrf.mxu0  ;;  %v8199_v37 = vcombine.high %v3732_v44, %v3736_v49 }
 0x424   :  { %v6668_v47 = vpop.f32.mrf.mxu1  ;;  %6913 = vmatmul.mubr.bf16.vlgmr.msra.gmra.mxu1 %v8690_v4  ;;  %v8126_v4 = vcombine.low %v3660_v58, %v3664_v46  ;;  %v8198_v58 = vcombine.low %v3732_v44, %v3736_v49 }
 0x425   :  { %v8836_v52 = vadd.f32 %v6668_v47, %v8825_v0  ;;  %6963 = vmatpush1.bf16.msra.mxu1 %v8142_v57  ;;  %6994 = vmatprep.mubr.bf16.mxu1 %v8767_v40  ;;  %v6713_v56 = vpop.f32.mrf.mxu0  ;;  %v8119_v0 = vcombine.high %v3652_v45, %v3656_v7  ;;  %v8118_v40 = vcombine.low %v3652_v45, %v3656_v7  ;;  %v3724_v57 = vld [vmem:[#allocation8 + $0xf58] sm:$0xff] }
 0x426   :  { %v6670_v43 = vpop.f32.mrf.mxu1  ;;  %6964 = vmatprep.subr.bf16.mxu1 %v8135_v48  ;;  %v3728_v48 = vld [vmem:[#allocation8 + $0xf78] sm:$0xff] }
 0x427   :  { %v8840_v3 = vadd.f32 %v6670_v43, %v8827_v51  ;;  %v6714_v63 = vpop.f32.mrf.mxu0  ;;  %v8110_v51 = vcombine.low %v3644_v62, %v3648_v54  ;;  %v8191_v46 = vcombine.high %v3724_v57, %v3728_v48  ;;  %v3716_v47 = vld [vmem:[#allocation8 + $0xf18] sm:$0xff] }
 0x428   :  { %v6672_v8 = vpop.f32.mrf.mxu1  ;;  %v3720_v56 = vld [vmem:[#allocation8 + $0xf38] sm:$0xff] }
 0x429   :  { %6965 = vmatpush1.bf16.msra.mxu1 %v8134_v55  ;;  %v8190_v55 = vcombine.low %v3724_v57, %v3728_v48  ;;  %v8183_v43 = vcombine.high %v3716_v47, %v3720_v56  ;;  %v3712_v63 = vld [vmem:[#allocation8 + $0xef8] sm:$0xff]  ;;  %v8182_v45 = vcombine.low %v3716_v47, %v3720_v56 }
 0x42a   :  { %v6673_v59 = vpop.f32.mrf.mxu1  ;;  %6966 = vmatprep.subr.bf16.mxu1 %v8127_v33  ;;  %v3708_v33 = vld [vmem:[#allocation8 + $0xed8] sm:$0xff] }
 0x42b   :  { %v8175_v7 = vcombine.high %v3708_v33, %v3712_v63  ;;  %v3700_v8 = vld [vmem:[#allocation8 + $0xe98] sm:$0xff]  ;;  %v8174_v59 = vcombine.low %v3708_v33, %v3712_v63  ;;  %v8464_v63 = vmov 0  }
 0x42c   :  { %v3692_v62 = vld [vmem:[#allocation8 + $0xe58] sm:$0xff]  ;;  %8220 = vset.pattern.permute.xlu1 %v8464_v63  ;;  %8221 = vset.pattern.permute.xlu0 %v8464_v63 }
 0x42d   :  { %6967 = vmatpush1.bf16.msra.mxu1 %v8126_v4  ;;  %v3704_v4 = vld [vmem:[#allocation8 + $0xeb8] sm:$0xff] }
 0x42e   :  { %6968 = vmatprep.subr.bf16.mxu1 %v8119_v0  ;;  %v8167_v0 = vcombine.high %v3700_v8, %v3704_v4  ;;  %v3696_v54 = vld [vmem:[#allocation8 + $0xe78] sm:$0xff] }
 0x431   :  { %6969 = vmatpush1.bf16.msra.mxu1 %v8118_v40  ;;  %v8166_v40 = vcombine.low %v3700_v8, %v3704_v4  ;;  %v3778_v8 = vrot.slane %v8813_v11, %v8740_v26 }
 0x432   :  { %6970 = vmatprep.subr.bf16.mxu1 %v8111_v12  ;;  %v8159_v12 = vcombine.high %v3692_v62, %v3696_v54 }
 0x435   :  { %6971 = vmatpush1.bf16.msra.mxu1 %v8110_v51  ;;  %v8158_v51 = vcombine.low %v3692_v62, %v3696_v54 }
 0x436   :  { %6972 = vmatprep.subr.bf16.mxu1 %v8103_v17  ;;  %v8151_v17 = vcombine.high %v3684_v30, %v3688_v15 }
 0x439   :  { %6973 = vmatpush1.bf16.msra.mxu1 %v8102_v23  ;;  %v3770_v23 = vrot.slane %v8813_v11, %v8701_v29 }
 0x43a   :  { %6974 = vmatprep.subr.bf16.mxu1 %v8095_v22 }
 0x43d   :  { %6975 = vmatpush1.bf16.msra.mxu1 %v8094_v2 }
 0x43e   :  { %6976 = vmatprep.subr.bf16.mxu1 %v8087_v32  ;;  %v6712_v32 = vadd.f32 %v8832_v34, %v3770_v23  ;;  %v7176_v34 = vld [vmem:[%s9026_s9] sm:$0xff] }
 0x43f   :  { %vm7177_vm8 = vcmp.gt.f32.partialorder %v7176_v34, 0.5 }
 0x441   :  { %6977 = vmatpush1.bf16.msra.mxu1 %v8086_v42 }
 0x442   :  { %6978 = vmatprep.subr.bf16.mxu1 %v8207_v10 }
 0x445   :  { %6979 = vmatpush2.bf16.msra.mxu1 %v8206_v1 }
 0x446   :  { %6980 = vmatprep.subr.bf16.mxu1 %v8199_v37 }
 0x449   :  { %6981 = vmatpush2.bf16.msra.mxu1 %v8198_v58 }
 0x44a   :  { %6982 = vmatprep.subr.bf16.mxu1 %v8191_v46 }
 0x44d   :  { %6983 = vmatpush2.bf16.msra.mxu1 %v8190_v55 }
 0x44e   :  { %6984 = vmatprep.subr.bf16.mxu1 %v8183_v43 }
 0x451   :  { %6985 = vmatpush2.bf16.msra.mxu1 %v8182_v45  ;;  %v7186_v45 = vsel %vm7177_vm8, 1, %v8464_v63 }
 0x452   :  { %6986 = vmatprep.subr.bf16.mxu1 %v8175_v7  ;;  %7188 = vperm.xlu1 %8220, %v7186_v45   ;;  %v3774_v7 = vrot.slane %v8813_v11, %v8737_v27  ;;  %v8862_v11 = vadd.f32 %v8807_v19, %v8600_v50  ;;  %v8878_v50 = vadd.f32 %v8840_v3, %v8648_v14 }
 0x455   :  { %6987 = vmatpush2.bf16.msra.mxu1 %v8174_v59 }
 0x456   :  { %6988 = vmatprep.subr.bf16.mxu1 %v8167_v0 }
 0x459   :  { %6989 = vmatpush2.bf16.msra.mxu1 %v8166_v40 }
 0x45a   :  { %6990 = vmatprep.subr.bf16.mxu1 %v8159_v12 }
 0x45d   :  { %6991 = vmatpush2.bf16.msra.mxu1 %v8158_v51 }
 0x45e   :  { %6992 = vmatprep.subr.bf16.mxu1 %v8151_v17 }
 0x461   :  { %6993 = vmatpush2.bf16.msra.mxu1 %v8150_v18  ;;  %v6791_v22 = vpop.f32.mrf.mxu0 }
 0x463   :  { %v6793_v13 = vpop.f32.mrf.mxu0 }
 0x464   :  { %v6750_v2 = vpop.f32.mrf.mxu1  ;;  %6995 = vmatmul.mubr.bf16.vlgmr.msra.gmra.mxu1 %v8771_v31 }
 0x465   :  { %v6751_v36 = vadd.f32 %v6750_v2, %v6710_v24  ;;  %v6795_v39 = vpop.f32.mrf.mxu0  ;;  %v8866_v24 = vadd.f32 %v8836_v52, %v8645_v20  ;;  %v7020_v2 = vmul.f32 %v8862_v11, %v8862_v11 }
 0x466   :  { %v6752_v42 = vpop.f32.mrf.mxu1 }
 0x467   :  { %v6753_v10 = vadd.f32 %v6752_v42, %v6712_v32  ;;  %v6796_v44 = vpop.f32.mrf.mxu0  ;;  %v6792_v49 = vadd.f32 %v6791_v22, %v6751_v36  ;;  %v8858_v22 = vadd.f32 %v8811_v6, %v8606_v61  ;;  %v7022_v61 = vmul.f32 %v8866_v24, %v8866_v24 }
 0x468   :  { %v6754_v1 = vpop.f32.mrf.mxu1  ;;  %v7023_v36 = vmul.f32 %v8878_v50, %v8878_v50 }
 0x469   :  { %v6794_v37 = vadd.f32 %v6793_v13, %v6753_v10  ;;  %v7021_v13 = vmul.f32 %v8858_v22, %v8858_v22  ;;  %v7011_v32 = vadd.f32 %v8858_v22, %v8862_v11 }
 0x46a   :  { %v6755_v57 = vpop.f32.mrf.mxu1 }
 0x46b   :  { %v7028_v19 = vadd.f32 %v7021_v13, %v7020_v2  ;;  %v7012_v20 = vadd.f32 %v7011_v32, %v8866_v24 }
 0x46d   :  { %v7029_v52 = vadd.f32 %v7028_v19, %v7022_v61  ;;  %v7013_v39 = vadd.f32 %v7012_v20, %v8878_v50 }
 0x46f   :  { %v7030_v14 = vadd.f32 %v7029_v52, %v7023_v36 }
 0x4a1   :  { %v6873_v48 = vpop.f32.mrf.mxu0 }
 0x4a2   :  { %v6874_v59 = vadd.f32 %v6873_v48, %v3774_v7 }
 0x4a3   :  { %v6875_v58 = vpop.f32.mrf.mxu0 }
 0x4a4   :  { %v6832_v46 = vpop.f32.mrf.mxu1  ;;  %v6876_v54 = vadd.f32 %v6875_v58, %v3778_v8 }
 0x4a5   :  { %v6833_v47 = vadd.f32 %v6832_v46, %v6792_v49  ;;  %v6877_v28 = vpop.f32.mrf.mxu0 }
 0x4a6   :  { %v6834_v56 = vpop.f32.mrf.mxu1 }
 0x4a7   :  { %v6835_v55 = vadd.f32 %v6834_v56, %v6794_v37  ;;  %v6878_v43 = vpop.f32.mrf.mxu0  ;;  %v8882_v6 = vadd.f32 %v6833_v47, %v8722_v16 }
 0x4a8   :  { %v6836_v31 = vpop.f32.mrf.mxu1 }
 0x4a9   :  { %v7024_v42 = vmul.f32 %v8882_v6, %v8882_v6  ;;  %v8890_v10 = vadd.f32 %v6835_v55, %v8727_v5  ;;  %v7014_v3 = vadd.f32 %v7013_v39, %v8882_v6 }
 0x4aa   :  { %v6837_v33 = vpop.f32.mrf.mxu1 }
 0x4ab   :  { %v7025_v16 = vmul.f32 %v8890_v10, %v8890_v10  ;;  %v7031_v1 = vadd.f32 %v7030_v14, %v7024_v42  ;;  %v7015_v58 = vadd.f32 %v7014_v3, %v8890_v10 }
 0x4ad   :  { %v7032_v56 = vadd.f32 %v7031_v1, %v7025_v16 }
 0x4e1   :  { %v6955_v4 = vpop.f32.mrf.mxu0 }
 0x4e3   :  { %v6957_v0 = vpop.f32.mrf.mxu0 }
 0x4e4   :  { %v6914_v62 = vpop.f32.mrf.mxu1 }
 0x4e5   :  { %v6915_v40 = vadd.f32 %v6914_v62, %v6874_v59  ;;  %v6959_v12 = vpop.f32.mrf.mxu0  ;;  %v7110_v62 = vld [vmem:[#allocation13] sm:$0xff] }
 0x4e6   :  { %v6916_v30 = vpop.f32.mrf.mxu1  ;;  %v7139_v32 = vrot.slane %v7110_v62, %v8737_v27 }
 0x4e7   :  { %v6917_v15 = vadd.f32 %v6916_v30, %v6876_v54  ;;  %v6960_v51 = vpop.f32.mrf.mxu0  ;;  %v6956_v17 = vadd.f32 %v6955_v4, %v6915_v40  ;;  %v7115_v40 = vrot.slane %v7110_v62, %v8579_v53  ;;  %v7119_v30 = vrot.slane %v7110_v62, %v8584_v60 }
 0x4e8   :  { %v6918_v18 = vpop.f32.mrf.mxu1  ;;  %v7123_v51 = vrot.slane %v7110_v62, %v8627_v25 }
 0x4e9   :  { %v6958_v21 = vadd.f32 %v6957_v0, %v6917_v15  ;;  %v7127_v18 = vrot.slane %v7110_v62, %v8630_v35 }
 0x4ea   :  { %v6919_v23 = vpop.f32.mrf.mxu1 }
 0x4eb   :  { %v7131_v23 = vrot.slane %v7110_v62, %v8679_v41 }
 0x524   :  { %v6996_v44 = vpop.f32.mrf.mxu1 }
 0x525   :  { %v6997_v49 = vadd.f32 %v6996_v44, %v6956_v17 }
 0x526   :  { %v6998_v37 = vpop.f32.mrf.mxu1 }
 0x527   :  { %v7009_v57 = vadd.f32 %v6997_v49, %v8757_v38  ;;  %v6999_v48 = vadd.f32 %v6998_v37, %v6958_v21 }
 0x528   :  { %v7000_v46 = vpop.f32.mrf.mxu1 }
 0x529   :  { %v7010_v47 = vadd.f32 %v6999_v48, %v8760_v9  ;;  %v7016_v5 = vadd.f32 %v7015_v58, %v7009_v57  ;;  %v7026_v28 = vmul.f32 %v7009_v57, %v7009_v57  ;;  %v7060_v9 = vld [vmem:[#allocation11] sm:$0xff]  ;;  %v7168_v58 = vld [vmem:[#allocation14] sm:$0xff] }
 0x52a   :  { %v7001_v55 = vpop.f32.mrf.mxu1  ;;  %v7065_v54 = vrot.slane %v7060_v9, %v8579_v53  ;;  %v7069_v12 = vrot.slane %v7060_v9, %v8584_v60  ;;  %v7073_v15 = vrot.slane %v7060_v9, %v8627_v25  ;;  %v7077_v17 = vrot.slane %v7060_v9, %v8630_v35 }
 0x52b   :  { %v7017_v43 = vadd.f32 %v7016_v5, %v7010_v47  ;;  %v7027_v31 = vmul.f32 %v7010_v47, %v7010_v47  ;;  %v7033_v33 = vadd.f32 %v7032_v56, %v7026_v28  ;;  %v7081_v21 = vrot.slane %v7060_v9, %v8679_v41  ;;  %v7170_v56 = vld [vmem:[#allocation14 + $0x10] sm:$0xff]  ;;  %v7171_v55 = vld [vmem:[#allocation14 + $0x18] sm:$0xff] }
 0x52c   :  { %v7085_v13 = vrot.slane %v7060_v9, %v8701_v29  ;;  %v7089_v53 = vrot.slane %v7060_v9, %v8737_v27  ;;  %v7093_v2 = vrot.slane %v7060_v9, %v8740_v26  ;;  %v7135_v60 = vrot.slane %v7110_v62, %v8701_v29  ;;  %v7174_v9 = vld [vmem:[#allocation14 + $0x30] sm:$0xff] }
 0x52d   :  { %7018 = vadd.xlane.f32.xlu0 %v7017_v43  ;;  %v7034_v34 = vadd.f32 %v7033_v33, %v7027_v31  ;;  %v7143_v25 = vrot.slane %v7110_v62, %v8740_v26 }
 0x531   :  { %7035 = vadd.xlane.f32.xlu0 %v7034_v34 }
 0x5b6   :  { %v7019_v63 = vpop.xlane.xlu0 %7018 }
 0x5b7   :  { %v7037_v45 = vmul.f32 0.0009765625, %v7019_v63  ;;  %v7172_v63 = vld [vmem:[#allocation14 + $0x20] sm:$0xff] }
 0x5b9   :  { %v7039_v38 = vmul.f32 %v7037_v45, %v7037_v45  ;;  %v7042_v61 = vsub.f32 %v8862_v11, %v7037_v45  ;;  %v7043_v35 = vsub.f32 %v8858_v22, %v7037_v45  ;;  %v7044_v19 = vsub.f32 %v8866_v24, %v7037_v45 }
 0x5ba   :  { %v7036_v7 = vpop.xlane.xlu0 %7035  ;;  %v7045_v41 = vsub.f32 %v8878_v50, %v7037_v45  ;;  %v7046_v52 = vsub.f32 %v8882_v6, %v7037_v45  ;;  %v7047_v36 = vsub.f32 %v8890_v10, %v7037_v45  ;;  %v7048_v39 = vsub.f32 %v7009_v57, %v7037_v45  ;;  %v7169_v10 = vld [vmem:[#allocation14 + $0x8] sm:$0xff]  ;;  %v8920_v57 = vpop.permute.xlu1 %7188 }
 0x5bb   :  { %v7038_v8 = vmul.f32 0.0009765625, %v7036_v7  ;;  %v7049_v42 = vsub.f32 %v7010_v47, %v7037_v45  ;;  %v7173_v45 = vld [vmem:[#allocation14 + $0x28] sm:$0xff]  ;;  %vm7190_vm9 = vcmp.eq.s32.totalorder %v8920_v57, 1 }
 0x5bd   :  { %v7040_v4 = vsub.f32 %v7038_v8, %v7039_v38  ;;  %v7178_v8 = vld [vmem:[%s9025_s8] sm:$0xff] }
 0x5bf   :  { %v7041_v59 = vmax.f32 %v7040_v4, 0.0  ;;  %v7179_v4 = vld [vmem:[%s9025_s8 + $0x8] sm:$0xff] }
 0x5c1   :  { %v7050_v0 = vadd.f32 1e-05, %v7041_v59 }
 0x5c3   :  { %8254 = vrsqrt.f32 %v7050_v0 }
 0x5d0   :  { %v8255_v20 = vpop.eup %8254 }
 0x5d1   :  { %v7052_v29 = vmul.f32 %v8255_v20, %v7042_v61  ;;  %v7053_v14 = vmul.f32 %v8255_v20, %v7043_v35  ;;  %v7054_v27 = vmul.f32 %v8255_v20, %v7044_v19  ;;  %v7055_v3 = vmul.f32 %v8255_v20, %v7045_v41 }
 0x5d2   :  { %v7056_v26 = vmul.f32 %v8255_v20, %v7046_v52  ;;  %v7057_v44 = vmul.f32 %v8255_v20, %v7047_v36  ;;  %v7058_v11 = vmul.f32 %v8255_v20, %v7048_v39  ;;  %v7059_v16 = vmul.f32 %v8255_v20, %v7049_v42  ;;  %v7183_v52 = vld [vmem:[%s9025_s8 + $0x28] sm:$0xff]  ;;  %v7184_v36 = vld [vmem:[%s9025_s8 + $0x30] sm:$0xff] }
 0x5d3   :  { %v7102_v22 = vmul.f32 %v7065_v54, %v7052_v29  ;;  %v7103_v49 = vmul.f32 %v7069_v12, %v7053_v14  ;;  %v7104_v24 = vmul.f32 %v7073_v15, %v7054_v27  ;;  %v7105_v1 = vmul.f32 %v7077_v17, %v7055_v3  ;;  %v7180_v12 = vld [vmem:[%s9025_s8 + $0x10] sm:$0xff] }
 0x5d4   :  { %v7106_v50 = vmul.f32 %v7081_v21, %v7056_v26  ;;  %v7107_v37 = vmul.f32 %v7085_v13, %v7057_v44  ;;  %v7108_v48 = vmul.f32 %v7089_v53, %v7058_v11  ;;  %v7109_v6 = vmul.f32 %v7093_v2, %v7059_v16  ;;  %v7175_v21 = vld [vmem:[#allocation14 + $0x38] sm:$0xff]  ;;  %v7185_v44 = vld [vmem:[%s9025_s8 + $0x38] sm:$0xff] }
 0x5d5   :  { %v8922_v46 = vadd.f32 %v7115_v40, %v7102_v22  ;;  %v8924_v47 = vadd.f32 %v7119_v30, %v7103_v49  ;;  %v8926_v5 = vadd.f32 %v7123_v51, %v7104_v24  ;;  %v8928_v28 = vadd.f32 %v7127_v18, %v7105_v1  ;;  %v7181_v51 = vld [vmem:[%s9025_s8 + $0x18] sm:$0xff] }
 0x5d6   :  { %v8930_v43 = vadd.f32 %v7131_v23, %v7106_v50  ;;  %v8932_v31 = vadd.f32 %v7135_v60, %v7107_v37  ;;  %v8934_v33 = vadd.f32 %v7139_v32, %v7108_v48  ;;  %v8936_v34 = vadd.f32 %v7143_v25, %v7109_v6  ;;  %v7182_v60 = vld [vmem:[%s9025_s8 + $0x20] sm:$0xff]  ;;  %s8465_s8 = smov [#allocation16]  }
 0x5d7   :  { %7160 = vst [vmem:[#allocation16] sm:$0xff] %v8922_v46  ;;  %7161 = vst [vmem:[#allocation16 + $0x8] sm:$0xff] %v8924_v47  ;;  %v7199_v7 = vsub.f32 %v8922_v46, %v7168_v58  ;;  %v7200_v38 = vsub.f32 %v8924_v47, %v7169_v10  ;;  %v7201_v59 = vsub.f32 %v8926_v5, %v7170_v56  ;;  %s7295_s0 = sshll.u32 %s8465_s8, 4  ;;  %s7296_s0 = int_to_ptr.vmem [resolvable:$true] %s7295_s0 }
 0x5d8   :  { %7162 = vst [vmem:[#allocation16 + $0x10] sm:$0xff] %v8926_v5  ;;  %7163 = vst [vmem:[#allocation16 + $0x18] sm:$0xff] %v8928_v28  ;;  %v7202_v0 = vsub.f32 %v8928_v28, %v7171_v55  ;;  %v7203_v62 = vsub.f32 %v8930_v43, %v7172_v63  ;;  %v7204_v30 = vsub.f32 %v8932_v31, %v7173_v45  ;;  %s8422_s27 = scalar_lea.vmem %s7296_s0, 1024  ;;  %p8427_p13 = scmp.lt.s32.totalorder %s7296_s0, %s7296_s0 }
 0x5d9   :  { %7166 = vst [vmem:[#allocation16 + $0x30] sm:$0xff] %v8934_v33  ;;  %7167 = vst [vmem:[#allocation16 + $0x38] sm:$0xff] %v8936_v34  ;;  %v7207_v54 = vadd.f32 1e-06, %v7199_v7  ;;  %v7208_v40 = vadd.f32 1e-06, %v7200_v38  ;;  %v7191_v17 = vsel %vm7190_vm9, %v8922_v46, %v7178_v8  ;;  %v7192_v18 = vsel %vm7190_vm9, %v8924_v47, %v7179_v4  ;;  %p8423_p12 = scmp.ne.s32.totalorder %s7296_s0, %s8422_s27  ;;  %p8428_p0 = scmp.lt.s32.totalorder %s8422_s27, %s8422_s27 }
 0x5da   :  { %7164 = vst [vmem:[#allocation16 + $0x20] sm:$0xff] %v8930_v43  ;;  %7165 = vst [vmem:[#allocation16 + $0x28] sm:$0xff] %v8932_v31  ;;  %v7209_v15 = vadd.f32 1e-06, %v7201_v59  ;;  %v7205_v13 = vsub.f32 %v8934_v33, %v7174_v9  ;;  %v7210_v53 = vadd.f32 1e-06, %v7202_v0  ;;  %v7193_v32 = vsel %vm7190_vm9, %v8926_v5, %v7180_v12 }
 0x5db   :  { %v7215_v23 = vmul.f32 %v7207_v54, %v7207_v54  ;;  %v7216_v2 = vmul.f32 %v7208_v40, %v7208_v40  ;;  %v7211_v25 = vadd.f32 1e-06, %v7203_v62  ;;  %v7194_v61 = vsel %vm7190_vm9, %v8928_v28, %v7181_v51  ;;  %p8429_p1 = por %p8428_p0, %p8427_p13 }
 0x5dc   :  { %v7206_v35 = vsub.f32 %v8936_v34, %v7175_v21  ;;  %v7212_v19 = vadd.f32 1e-06, %v7204_v30  ;;  %v7217_v41 = vmul.f32 %v7209_v15, %v7209_v15  ;;  %v7195_v39 = vsel %vm7190_vm9, %v8930_v43, %v7182_v60 }
 0x5dd   :  { %v7223_v20 = vadd.f32 %v7216_v2, %v7215_v23  ;;  %v7239_v42 = vsub.f32 %v8922_v46, %v7191_v17  ;;  %v7240_v29 = vsub.f32 %v8924_v47, %v7192_v18  ;;  %v7241_v14 = vsub.f32 %v8926_v5, %v7193_v32  ;;  %p8430_p2 = pnand %p8429_p1, %p8423_p12 }
 0x5de   :  { %v7213_v27 = vadd.f32 1e-06, %v7205_v13  ;;  %v7218_v3 = vmul.f32 %v7210_v53, %v7210_v53  ;;  %v7242_v11 = vsub.f32 %v8928_v28, %v7194_v61  ;;  %v7219_v16 = vmul.f32 %v7211_v25, %v7211_v25 }
 0x5df   :  { %v7224_v26 = vadd.f32 %v7223_v20, %v7217_v41  ;;  %v7196_v22 = vsel %vm7190_vm9, %v8932_v31, %v7183_v52  ;;  %v7247_v49 = vadd.f32 1e-06, %v7239_v42  ;;  %v7248_v24 = vadd.f32 1e-06, %v7240_v29 }
 0x5e0   :  { %v7197_v50 = vsel %vm7190_vm9, %v8934_v33, %v7184_v36  ;;  %v7243_v37 = vsub.f32 %v8930_v43, %v7195_v39  ;;  %v7249_v48 = vadd.f32 1e-06, %v7241_v14  ;;  %v7214_v6 = vadd.f32 1e-06, %v7206_v35 }
 0x5e1   :  { %v7225_v1 = vadd.f32 %v7224_v26, %v7218_v3  ;;  %v7220_v58 = vmul.f32 %v7212_v19, %v7212_v19  ;;  %v7198_v10 = vsel %vm7190_vm9, %v8936_v34, %v7185_v44  ;;  %v7255_v46 = vmul.f32 %v7247_v49, %v7247_v49 }
 0x5e2   :  { %v7244_v5 = vsub.f32 %v8932_v31, %v7196_v22  ;;  %v7250_v28 = vadd.f32 1e-06, %v7242_v11  ;;  %v7256_v56 = vmul.f32 %v7248_v24, %v7248_v24  ;;  %v7221_v55 = vmul.f32 %v7213_v27, %v7213_v27 }
 0x5e3   :  { %v7226_v47 = vadd.f32 %v7225_v1, %v7219_v16  ;;  %v7245_v63 = vsub.f32 %v8934_v33, %v7197_v50  ;;  %v7251_v7 = vadd.f32 1e-06, %v7243_v37  ;;  %v7257_v38 = vmul.f32 %v7249_v48, %v7249_v48 }
 0x5e4   :  { %v7263_v43 = vadd.f32 %v7256_v56, %v7255_v46  ;;  %v7222_v8 = vmul.f32 %v7214_v6, %v7214_v6  ;;  %v7246_v4 = vsub.f32 %v8936_v34, %v7198_v10  ;;  %v7252_v0 = vadd.f32 1e-06, %v7244_v5 }
 0x5e5   :  { %v7227_v45 = vadd.f32 %v7226_v47, %v7220_v58  ;;  %v7258_v57 = vmul.f32 %v7250_v28, %v7250_v28  ;;  %v7253_v54 = vadd.f32 1e-06, %v7245_v63  ;;  %v7259_v40 = vmul.f32 %v7251_v7, %v7251_v7 }
 0x5e6   :  { %v7264_v9 = vadd.f32 %v7263_v43, %v7257_v38  ;;  %v7254_v12 = vadd.f32 1e-06, %v7246_v4  ;;  %v7260_v30 = vmul.f32 %v7252_v0, %v7252_v0 }
 0x5e7   :  { %v7228_v59 = vadd.f32 %v7227_v45, %v7221_v55  ;;  %v7261_v33 = vmul.f32 %v7253_v54, %v7253_v54 }
 0x5e8   :  { %v7265_v31 = vadd.f32 %v7264_v9, %v7258_v57  ;;  %v7262_v17 = vmul.f32 %v7254_v12, %v7254_v12 }
 0x5e9   :  { %v7229_v62 = vadd.f32 %v7228_v59, %v7222_v8 }
 0x5ea   :  { %v7266_v15 = vadd.f32 %v7265_v31, %v7259_v40 }
 0x5eb   :  { %7230 = vadd.xlane.f32.xlu1 %v7229_v62 }
 0x5ec   :  { %v7267_v51 = vadd.f32 %v7266_v15, %v7260_v30 }
 0x5ee   :  { %v7268_v18 = vadd.f32 %v7267_v51, %v7261_v33 }
 0x5f0   :  { %v7269_v21 = vadd.f32 %v7268_v18, %v7262_v17 }
 0x5f2   :  { %7270 = vadd.xlane.f32.xlu0 %v7269_v21 }
 0x5f3   :  { %8433 = shalt.err (!%p8430_p2)
}
 0x5f4   :  { %7298 = dma.vmem_to_hbm [thread:$0]  %s7296_s0, 1024, %s9027_s10, [#allocation4]  }
 0x674   :  { %v7231_v34 = vpop.xlane.xlu1 %7230 }
 0x675   :  { %8256 = vrsqrt.f32 %v7231_v34  ;;  %vm7234_vm10 = vcmp.eq.f32.partialorder %v7231_v34, inf  ;;  %v7237_v32 = vand.u32 2147483648, %v7231_v34  ;;  %vm7236_vm11 = vcmp.eq.f32.partialorder %v7231_v34, 0.0 }
 0x67b   :  { %v7271_v23 = vpop.xlane.xlu0 %7270 }
 0x67c   :  { %8258 = vrsqrt.f32 %v7271_v23  ;;  %vm7274_vm12 = vcmp.eq.f32.partialorder %v7271_v23, inf  ;;  %v7277_v35 = vand.u32 2147483648, %v7271_v23  ;;  %vm7276_vm13 = vcmp.eq.f32.partialorder %v7271_v23, 0.0 }
 0x682   :  { %v8257_v13 = vpop.eup %8256 }
 0x683   :  { %v7233_v53 = vmul.f32 %v8257_v13, %v7231_v34 }
 0x685   :  { %v7235_v2 = vsel %vm7234_vm10, %v7231_v34, %v7233_v53 }
 0x686   :  { %v7238_v61 = vsel %vm7236_vm11, %v7237_v32, %v7235_v2 }
 0x689   :  { %v8259_v60 = vpop.eup %8258 }
 0x68a   :  { %v7273_v25 = vmul.f32 %v8259_v60, %v7271_v23 }
 0x68c   :  { %v7275_v19 = vsel %vm7274_vm12, %v7271_v23, %v7273_v25 }
 0x68d   :  { %v7278_v41 = vsel %vm7276_vm13, %v7277_v35, %v7275_v19 }
 0x68e   :  { %v7279_v20 = vsub.f32 %v7238_v61, %v7278_v41 }
 0x690   :  { %v7280_v52 = vadd.f32 10.0, %v7279_v20 }
 0x692   :  { %v7281_v36 = vmax.f32 %v7280_v52, 0.0 }
 0x694   :  { %v7282_v39 = vrot.slane %v7281_v36, 4 }
 0x696   :  { %v7283_v42 = vadd.f32 %v7282_v39, %v7281_v36 }
 0x698   :  { %v7284_v29 = vrot.slane %v7283_v42, 2 }
 0x69a   :  { %v7285_v14 = vadd.f32 %v7284_v29, %v7283_v42 }
 0x69c   :  { %v7286_v27 = vrot.slane %v7285_v14, 1 }
 0x69e   :  { %v7287_v3 = vadd.f32 %v7286_v27, %v7285_v14 }
 0x6a0   :  { %7288 = vst [vmem:[%s9028_s11] sm:$0xff] %v7287_v3 }
 0x6a1   :  { %8452 = dma.done.wait [#allocation4], 1024  }
 0x6a2   :  { %8453 = vsyncadd [#allocation4], 4294966272 }
 0x6a3   :  { %7306 = vsyncpa [#allocation3], 1 }
 0x6a4   :  { %7307 = vsyncpa [#allocation6], 1 }
 0x6a5   :  { %7308 = vsyncpa [#allocation9], 1 }
 0x6a6   :  { %7309 = vsyncpa [#allocation12], 1 }
 0x6a7   :  { %7310 = vsyncpa [#allocation15], 1 }
 0x6a8   :  { %7311 = vsyncpa [#allocation4], 1 }

</bundles_post_ra>
